<compile_context>
chip_gen: v6e
topology: v6e:2x2x1
jax: 0.10.0
libtpu: 0.0.40
codegen_flags: <defaults>
</compile_context>

<pallas_src>
import functools

import numpy as np
import jax
import jax.numpy as jnp
from jax.experimental import pallas as pl
from jax.experimental.pallas import tpu as pltpu  # noqa: F401  (TPU backend assumed)

# ---------------- hyperparameters (small, consistent with the module) ----------------
BATCH = 2
SEQLEN = 16
N_HEADS = 4
D_INPUT = 1
D_EMBED = 8
D_HIDDEN = 16
D_KERNEL = 3
D_OUT = 5
DMIN = 1.0
BN_EPS = 1e-5

# ---------------- packed output-slab layout (rows of a (rows, 128) f32 slab) ---------
_ROW_XC = 0                                  # x_concepts      (B*H, D_HIDDEN)
_ROW_SC = _ROW_XC + BATCH * N_HEADS          # attention scores (B*S, H)
_ROW_RW = _ROW_SC + BATCH * SEQLEN           # relevance_weights (B, H)
_ROW_OUT = _ROW_RW + BATCH                   # out              (B, D_OUT)
_ROW_FC = _ROW_OUT + BATCH                   # fc_out           (B*H, D_OUT)
_SLAB_ROWS = ((_ROW_FC + BATCH * N_HEADS + 7) // 8) * 8
_SLAB_COLS = 128


def _round_up(x, m):
    return (x + m - 1) // m * m


# ---------------------------------------------------------------------------
# Structural helper matrices (built once with numpy, packed into the blob).
# ---------------------------------------------------------------------------
def _shift_matrix(n_seq, length, offset):
    """M[r_out, r_in] = 1 iff same sequence and l_in == l_out + offset (zero pad)."""
    rows = n_seq * length
    m = np.zeros((rows, rows), np.float32)
    for n in range(n_seq):
        for l in range(length):
            li = l + offset
            if 0 <= li < length:
                m[n * length + l, n * length + li] = 1.0
    return m


def _pool_select(n_seq, length, parity):
    """P[r_out, r_in] = 1 iff r_in is element 2*j+parity of pair j of the same sequence."""
    lo = length // 2
    m = np.zeros((n_seq * lo, n_seq * length), np.float32)
    for n in range(n_seq):
        for j in range(lo):
            m[n * lo + j, n * length + 2 * j + parity] = 1.0
    return m


def build_const_blob(raw, b=BATCH, s=SEQLEN, h=N_HEADS):
    """Pack all folded weights + structural matrices into one (rows, 128) f32 blob."""
    entries = []

    def add(name, arr):
        arr = np.asarray(arr, np.float32)
        if arr.ndim == 1:
            arr = arr.reshape(1, -1)
        entries.append((name, arr))

    def wcat(w):  # (k, cin, cout) -> (cin, k*cout): fold taps onto the lane axis
        w = np.asarray(w, np.float32)
        return np.concatenate([w[t] for t in range(w.shape[0])], axis=1)

    # ---- folded weights ----
    add("emb_wcat", wcat(raw["emb_w"])); add("emb_b", raw["emb_b"])
    add("emb_sc", raw["emb_scale"]); add("emb_sh", raw["emb_shift"])
    add("attn_w", raw["attn_w"]); add("attn_b", raw["attn_b"])
    for pre in ("c1", "c2", "p1", "p2"):
        add(pre + "_wcat", wcat(raw[pre + "_w"])); add(pre + "_b", raw[pre + "_b"])
        add(pre + "_sc", raw[pre + "_scale"]); add(pre + "_sh", raw[pre + "_shift"])
    add("pr_sc", raw["pr_scale"]); add("pr_sh", raw["pr_shift"])
    add("pr_w", raw["pr_w"]); add("pr_b", raw["pr_b"])
    add("ag_sc", raw["ag_scale"]); add("ag_sh", raw["ag_shift"])
    add("ag_w", raw["ag_w"]); add("ag_b", raw["ag_b"])

    # ---- structural matrices ----
    add("s32m", _shift_matrix(b, s, -1)); add("s32p", _shift_matrix(b, s, +1))
    add("s128m", _shift_matrix(b * h, s, -1)); add("s128p", _shift_matrix(b * h, s, +1))
    add("s64m", _shift_matrix(b * h, s // 2, -1)); add("s64p", _shift_matrix(b * h, s // 2, +1))
    add("s16m", _shift_matrix(b, s // 2, -1)); add("s16p", _shift_matrix(b, s // 2, +1))
    add("pe128", _pool_select(b * h, s, 0)); add("po128", _pool_select(b * h, s, 1))
    add("pe32", _pool_select(b, s, 0)); add("po32", _pool_select(b, s, 1))

    rrep = np.zeros((b * h * s, b * s), np.float32)     # replicate (b,s) rows per head
    hmask = np.zeros((b * h * s, h), np.float32)        # one-hot of the head of each row
    for bi in range(b):
        for hi in range(h):
            for si in range(s):
                rrep[(bi * h + hi) * s + si, bi * s + si] = 1.0
                hmask[(bi * h + hi) * s + si, hi] = 1.0
    add("rrep", rrep); add("hmask", hmask)

    rb = np.zeros((b * h, b), np.float32)
    hmask_bh = np.zeros((b * h, h), np.float32)
    sum_h = np.zeros((b, b * h), np.float32)
    for bi in range(b):
        for hi in range(h):
            rb[bi * h + hi, bi] = 1.0
            hmask_bh[bi * h + hi, hi] = 1.0
            sum_h[bi, bi * h + hi] = 1.0
    add("rb", rb); add("hmask_bh", hmask_bh); add("sum_h", sum_h)

    # ---- pack (each block starts on an 8-row / sublane-tile boundary) ----
    layout = {}
    row = 0
    for name, arr in entries:
        nr, nc = arr.shape
        assert nc <= _SLAB_COLS
        layout[name] = (row, nr, nc)
        row += _round_up(nr, 8)
    blob = np.zeros((_round_up(row, 8), _SLAB_COLS), np.float32)
    for name, arr in entries:
        r, nr, nc = layout[name]
        blob[r:r + nr, :nc] = arr
    return jnp.asarray(blob), layout


# ---------------------------------------------------------------------------
# The single fused Pallas kernel (grid=(), everything resident in VMEM).
# ---------------------------------------------------------------------------
def _sesm_fused_kernel(x_ref, c_ref, o_ref, *, layout, b, s, h, dh, d_out, k):
    f32 = jnp.float32

    def cst(name):                       # static slice of the packed constant blob
        r, nr, nc = layout[name]
        return c_ref[r:r + nr, 0:nc]

    def dot(a, m):
        return jnp.dot(a, m, preferred_element_type=f32)

    def sigmoid(v):
        return 1.0 / (1.0 + jnp.exp(-v))

    def swish(v):                        # TODO(synk): Swish source not given; x*sigmoid(x)
        return v * sigmoid(v)

    def conv_bn_swish(x2d, prefix, s_minus, s_plus, cin_is_one=False):
        # Conv1d(padding='same') + eval BatchNorm1d + Swish, channels-last 2D slab form:
        #   y = sum_t S_t @ (x @ W_t);  S_t are block-diagonal shift matrices with the
        #   zero 'same'-padding baked in; the k taps are folded into one weight matmul.
        assert k == 3
        wcat = cst(prefix + "_wcat")                       # (Cin, k*Cout)
        cout = wcat.shape[-1] // k
        z = (x2d * wcat) if cin_is_one else dot(x2d, wcat)  # (rows, k*Cout)
        acc = z[:, cout:2 * cout]                           # centre tap (identity shift)
        acc = acc + dot(s_minus, z[:, 0:cout])              # tap reading x[l-1]
        acc = acc + dot(s_plus, z[:, 2 * cout:3 * cout])    # tap reading x[l+1]
        y = acc + cst(prefix + "_b")
        y = y * cst(prefix + "_sc") + cst(prefix + "_sh")   # folded BatchNorm1d (eval)
        return swish(y)

    x2d = x_ref[...]                                        # (B*S, d_input), rows (b, s)

    # ---- Embedder: Conv1d('same') + BN + Swish ------------------------------------
    x_emb = conv_bn_swish(x2d, "emb", cst("s32m"), cst("s32p"), cin_is_one=True)   # (B*S, E)

    # ---- Conceptizer: multi-head selective attention -------------------------------
    # TODO(synk): MultiHeadSelectiveAttention source not provided; reconstructed as a
    # per-timestep Linear(d_embed -> n_heads) + sigmoid gate (sent_mask is None).
    scores = sigmoid(dot(x_emb, cst("attn_w")) + cst("attn_b"))                    # (B*S, H)

    # x_sel[(b,h,s), :] = x_emb[(b,s), :] * scores[(b,s), h]
    rrep = cst("rrep")
    x_rep = dot(rrep, x_emb)                                                       # (B*H*S, E)
    sel_col = jnp.sum(dot(rrep, scores) * cst("hmask"), axis=1, keepdims=True)     # (B*H*S, 1)
    x_sel = x_rep * sel_col

    # ---- Conceptizer encoder: ConvNormPool x2 + AdaptiveMaxPool1d(1) ----------------
    # TODO(synk): ConvNormPool source not provided; reconstructed as
    # Conv1d('same') -> BatchNorm1d -> Swish -> MaxPool1d(2).
    h1 = conv_bn_swish(x_sel, "c1", cst("s128m"), cst("s128p"))                    # (B*H*S, Dh)
    h1 = jnp.maximum(dot(cst("pe128"), h1), dot(cst("po128"), h1))                 # MaxPool1d(2)
    h2 = conv_bn_swish(h1, "c2", cst("s64m"), cst("s64p"))                         # (B*H*S/2, Dh)
    # MaxPool1d(2) followed by AdaptiveMaxPool1d(1) == global max over the length axis.
    x_concepts = jnp.max(h2.reshape(b * h, s // 2, dh), axis=1)                    # (B*H, Dh)

    # ---- Parameterizer --------------------------------------------------------------
    g1 = conv_bn_swish(x_emb, "p1", cst("s32m"), cst("s32p"))                      # (B*S, Dh)
    g1 = jnp.maximum(dot(cst("pe32"), g1), dot(cst("po32"), g1))                   # MaxPool1d(2)
    g2 = conv_bn_swish(g1, "p2", cst("s16m"), cst("s16p"))                         # (B*S/2, Dh)
    enc = jnp.max(g2.reshape(b, s // 2, dh), axis=1)                               # (B, Dh)
    tproj = swish(enc * cst("pr_sc") + cst("pr_sh"))        # BN(eval)+Swish (+Dropout = id)
    rw_lin = dot(tproj, cst("pr_w")) + cst("pr_b")
    rw = jnp.maximum(rw_lin, 0.0) + jnp.log(1.0 + jnp.exp(-jnp.abs(rw_lin)))       # Softplus

    # ---- Aggregator -----------------------------------------------------------------
    a = swish(x_concepts * cst("ag_sc") + cst("ag_sh"))
    fc_out = dot(a, cst("ag_w")) + cst("ag_b")                                     # (B*H, d_out)
    rw_col = jnp.sum(dot(cst("rb"), rw) * cst("hmask_bh"), axis=1, keepdims=True)  # (B*H, 1)
    out = dot(cst("sum_h"), fc_out * rw_col)                                       # (B, d_out)

    # ---- one lane-dense packed output slab (single output DMA) ----------------------
    o_ref[...] = jnp.zeros((_SLAB_ROWS, _SLAB_COLS), f32)
    o_ref[_ROW_XC:_ROW_XC + b * h, 0:dh] = x_concepts
    o_ref[_ROW_SC:_ROW_SC + b * s, 0:h] = scores
    o_ref[_ROW_RW:_ROW_RW + b, 0:h] = rw
    o_ref[_ROW_OUT:_ROW_OUT + b, 0:d_out] = out
    o_ref[_ROW_FC:_ROW_FC + b * h, 0:d_out] = fc_out


# ---------------------------------------------------------------------------
# Regularization terms (tiny reductions, plain JAX glue on the kernel outputs)
# ---------------------------------------------------------------------------
def _diversity_term(sa, dmin):
    diff = sa[:, :, None, :] - sa[:, None, :, :]
    d = jnp.sqrt(jnp.sum(diff * diff, axis=-1))                  # torch.cdist(x, x, 2)
    rd = jnp.maximum(dmin - d, 0.0)
    zero_diag = 1.0 - jnp.eye(sa.shape[1], dtype=sa.dtype)
    return (rd * zero_diag).sum() / 2.0


def _stability_term(x_concepts, rw):
    x = jnp.transpose(x_concepts, (1, 0, 2))                     # (H, B, Dh)
    xn = jnp.sqrt(jnp.sum(x * x, axis=-1, keepdims=True))
    xnorm = x / jnp.maximum(xn, 1e-9)
    d = 1.0 - jnp.einsum("hbd,hcd->hbc", xnorm, xnorm)
    mask = rw.T                                                  # (H, B)
    m2 = mask[:, None, :] * mask[:, :, None]
    return (d * m2).sum() / 2.0


def _locality_term(sa, sent_mask):
    if sent_mask is not None:
        return (sa.sum(2) / sent_mask.sum(2)).sum()
    return sa.mean(2).sum()


def _simplicity_term(rw):
    return (rw.sum(1) / rw.shape[1]).sum()


# ---------------------------------------------------------------------------
# Full Model forward (single fused pallas_call + tiny JAX unpack/reductions)
# ---------------------------------------------------------------------------
def model_forward(blob, layout, seq_ncw, sent_mask=None, ignore_relevance_weights=False):
    b, d_in, s = seq_ncw.shape
    h, dh = N_HEADS, D_HIDDEN
    x2d = jnp.transpose(seq_ncw, (0, 2, 1)).reshape(b * s, d_in)     # NCW -> (B*S, d_input)

    kern = functools.partial(_sesm_fused_kernel, layout=layout, b=b, s=s, h=h,
                             dh=dh, d_out=D_OUT, k=D_KERNEL)
    slab = pl.pallas_call(
        kern,
        out_shape=jax.ShapeDtypeStruct((_SLAB_ROWS, _SLAB_COLS), jnp.float32),
    )(x2d, blob)

    x_concepts = slab[_ROW_XC:_ROW_XC + b * h, 0:dh].reshape(b, h, dh)
    scores = slab[_ROW_SC:_ROW_SC + b * s, 0:h].reshape(b, s, h)
    selective_actions = jnp.transpose(scores, (0, 2, 1))             # (B, H, S)
    relevance_weights = slab[_ROW_RW:_ROW_RW + b, 0:h]               # (B, H)
    out = slab[_ROW_OUT:_ROW_OUT + b, 0:D_OUT]                       # (B, D_OUT)
    if ignore_relevance_weights:
        out = slab[_ROW_FC:_ROW_FC + b * h, 0:D_OUT]                 # (B*H, D_OUT)

    L_div = _diversity_term(selective_actions, DMIN)
    L_stab = _stability_term(x_concepts, relevance_weights)
    L_loc = _locality_term(selective_actions, sent_mask)
    L_simp = _simplicity_term(relevance_weights)
    return out, [L_div, L_stab, L_loc, L_simp], selective_actions, relevance_weights


# ---------------------------------------------------------------------------
# Deterministic parameter initialization (eval-mode BN folded to scale/shift)
# ---------------------------------------------------------------------------
def init_params(key):
    keys = iter(jax.random.split(key, 64))
    nxt = lambda: next(keys)

    def conv_w(cin, cout):
        return jax.random.normal(nxt(), (D_KERNEL, cin, cout), jnp.float32) / jnp.sqrt(cin * D_KERNEL)

    def lin_w(din, dout):
        return jax.random.normal(nxt(), (din, dout), jnp.float32) / jnp.sqrt(din)

    def bias(d):
        return 0.05 * jax.random.normal(nxt(), (d,), jnp.float32)

    def bn(d):
        gamma = 1.0 + 0.1 * jax.random.normal(nxt(), (d,), jnp.float32)
        beta = 0.1 * jax.random.normal(nxt(), (d,), jnp.float32)
        mean = 0.1 * jax.random.normal(nxt(), (d,), jnp.float32)
        var = 1.0 + 0.1 * jax.random.uniform(nxt(), (d,), jnp.float32)
        scale = gamma / jnp.sqrt(var + BN_EPS)
        shift = beta - mean * scale
        return scale, shift

    p = {}
    p["emb_w"], p["emb_b"] = conv_w(D_INPUT, D_EMBED), bias(D_EMBED)
    p["emb_scale"], p["emb_shift"] = bn(D_EMBED)
    p["attn_w"], p["attn_b"] = lin_w(D_EMBED, N_HEADS), bias(N_HEADS)
    p["c1_w"], p["c1_b"] = conv_w(D_EMBED, D_HIDDEN), bias(D_HIDDEN)
    p["c1_scale"], p["c1_shift"] = bn(D_HIDDEN)
    p["c2_w"], p["c2_b"] = conv_w(D_HIDDEN, D_HIDDEN), bias(D_HIDDEN)
    p["c2_scale"], p["c2_shift"] = bn(D_HIDDEN)
    p["p1_w"], p["p1_b"] = conv_w(D_EMBED, D_HIDDEN), bias(D_HIDDEN)
    p["p1_scale"], p["p1_shift"] = bn(D_HIDDEN)
    p["p2_w"], p["p2_b"] = conv_w(D_HIDDEN, D_HIDDEN), bias(D_HIDDEN)
    p["p2_scale"], p["p2_shift"] = bn(D_HIDDEN)
    p["pr_scale"], p["pr_shift"] = bn(D_HIDDEN)
    p["pr_w"], p["pr_b"] = lin_w(D_HIDDEN, N_HEADS), bias(N_HEADS)
    p["ag_scale"], p["ag_shift"] = bn(D_HIDDEN)
    p["ag_w"], p["ag_b"] = lin_w(D_HIDDEN, D_OUT), bias(D_OUT)
    return p


if __name__ == "__main__":
    key = jax.random.PRNGKey(0)
    pkey, xkey = jax.random.split(key)
    raw_params = init_params(pkey)
    blob, layout = build_const_blob(raw_params)
    sequence = jax.random.normal(xkey, (BATCH, D_INPUT, SEQLEN), jnp.float32)

    fwd = jax.jit(lambda seq: model_forward(blob, layout, seq))
    out, losses, selective_actions, relevance_weights = fwd(sequence)
    jax.block_until_ready((out, losses, selective_actions, relevance_weights))

    assert out.shape == (BATCH, D_OUT)
    assert selective_actions.shape == (BATCH, N_HEADS, SEQLEN)
    assert relevance_weights.shape == (BATCH, N_HEADS)
    print("KERNEL_OK")
</pallas_src>

<mosaic_0001>
module attributes {stable_mosaic.version = 11 : i64} {
  func.func @_sesm_fused_kernel(%arg0: memref<32x1xf32, #tpu.memory_space<vmem>>, %arg1: memref<1192x128xf32, #tpu.memory_space<vmem>>, %arg2: memref<56x128xf32, #tpu.memory_space<vmem>>) attributes {dimension_semantics = [], scalar_prefetch = 0 : i64, scratch_operands = 0 : i64, tpu.core_type = #tpu.core_type<tc>} {
    %c0 = arith.constant 0 : index
    %c0_0 = arith.constant 0 : index
    %0 = vector.load %arg0[%c0, %c0_0] : memref<32x1xf32, #tpu.memory_space<vmem>>, vector<32x1xf32>
    %c272 = arith.constant 272 : index
    %c0_1 = arith.constant 0 : index
    %1 = vector.load %arg1[%c272, %c0_1] : memref<1192x128xf32, #tpu.memory_space<vmem>>, vector<32x32xf32>
    %c304 = arith.constant 304 : index
    %c0_2 = arith.constant 0 : index
    %2 = vector.load %arg1[%c304, %c0_2] : memref<1192x128xf32, #tpu.memory_space<vmem>>, vector<32x32xf32>
    %c0_3 = arith.constant 0 : index
    %c0_4 = arith.constant 0 : index
    %3 = vector.load %arg1[%c0_3, %c0_4] : memref<1192x128xf32, #tpu.memory_space<vmem>>, vector<1x24xf32>
    %4 = vector.broadcast %0 : vector<32x1xf32> to vector<32x24xf32>
    %5 = vector.broadcast %3 : vector<1x24xf32> to vector<32x24xf32>
    %6 = arith.mulf %4, %5 : vector<32x24xf32>
    %7 = vector.extract_strided_slice %6 {offsets = [0, 8], sizes = [32, 8], strides = [1, 1]} : vector<32x24xf32> to vector<32x8xf32>
    %8 = vector.extract_strided_slice %6 {offsets = [0, 0], sizes = [32, 8], strides = [1, 1]} : vector<32x24xf32> to vector<32x8xf32>
    %cst = arith.constant dense<0.000000e+00> : vector<32x8xf32>
    %9 = tpu.matmul %1, %8, %cst {dimension_numbers = #tpu.dot_dimension_numbers<[1], [0], [0], [1], [0, 0, 1, 1], [], []>} : vector<32x32xf32>, vector<32x8xf32>, vector<32x8xf32> -> vector<32x8xf32>
    %10 = arith.addf %7, %9 : vector<32x8xf32>
    %11 = vector.extract_strided_slice %6 {offsets = [0, 16], sizes = [32, 8], strides = [1, 1]} : vector<32x24xf32> to vector<32x8xf32>
    %cst_5 = arith.constant dense<0.000000e+00> : vector<32x8xf32>
    %12 = tpu.matmul %2, %11, %cst_5 {dimension_numbers = #tpu.dot_dimension_numbers<[1], [0], [0], [1], [0, 0, 1, 1], [], []>} : vector<32x32xf32>, vector<32x8xf32>, vector<32x8xf32> -> vector<32x8xf32>
    %13 = arith.addf %10, %12 : vector<32x8xf32>
    %c8 = arith.constant 8 : index
    %c0_6 = arith.constant 0 : index
    %14 = vector.load %arg1[%c8, %c0_6] : memref<1192x128xf32, #tpu.memory_space<vmem>>, vector<1x8xf32>
    %15 = vector.broadcast %14 : vector<1x8xf32> to vector<32x8xf32>
    %16 = arith.addf %13, %15 : vector<32x8xf32>
    %c16 = arith.constant 16 : index
    %c0_7 = arith.constant 0 : index
    %17 = vector.load %arg1[%c16, %c0_7] : memref<1192x128xf32, #tpu.memory_space<vmem>>, vector<1x8xf32>
    %18 = vector.broadcast %17 : vector<1x8xf32> to vector<32x8xf32>
    %19 = arith.mulf %16, %18 : vector<32x8xf32>
    %c24 = arith.constant 24 : index
    %c0_8 = arith.constant 0 : index
    %20 = vector.load %arg1[%c24, %c0_8] : memref<1192x128xf32, #tpu.memory_space<vmem>>, vector<1x8xf32>
    %21 = vector.broadcast %20 : vector<1x8xf32> to vector<32x8xf32>
    %22 = arith.addf %19, %21 : vector<32x8xf32>
    %cst_9 = arith.constant 0.000000e+00 : f32
    %23 = vector.broadcast %cst_9 : f32 to vector<32x8xf32>
    %24 = arith.subf %23, %22 : vector<32x8xf32>
    %25 = math.exp %24 : vector<32x8xf32>
    %cst_10 = arith.constant 1.000000e+00 : f32
    %26 = vector.broadcast %cst_10 : f32 to vector<32x8xf32>
    %27 = arith.addf %26, %25 : vector<32x8xf32>
    %cst_11 = arith.constant 1.000000e+00 : f32
    %28 = vector.broadcast %cst_11 : f32 to vector<32x8xf32>
    %29 = arith.divf %28, %27 : vector<32x8xf32>
    %30 = arith.mulf %22, %29 : vector<32x8xf32>
    %c32 = arith.constant 32 : index
    %c0_12 = arith.constant 0 : index
    %31 = vector.load %arg1[%c32, %c0_12] : memref<1192x128xf32, #tpu.memory_space<vmem>>, vector<8x4xf32>
    %cst_13 = arith.constant dense<0.000000e+00> : vector<32x4xf32>
    %32 = tpu.matmul %30, %31, %cst_13 {dimension_numbers = #tpu.dot_dimension_numbers<[1], [0], [0], [1], [0, 0, 1, 1], [], []>} : vector<32x8xf32>, vector<8x4xf32>, vector<32x4xf32> -> vector<32x4xf32>
    %c40 = arith.constant 40 : index
    %c0_14 = arith.constant 0 : index
    %33 = vector.load %arg1[%c40, %c0_14] : memref<1192x128xf32, #tpu.memory_space<vmem>>, vector<1x4xf32>
    %34 = vector.broadcast %33 : vector<1x4xf32> to vector<32x4xf32>
    %35 = arith.addf %32, %34 : vector<32x4xf32>
    %cst_15 = arith.constant 0.000000e+00 : f32
    %36 = vector.broadcast %cst_15 : f32 to vector<32x4xf32>
    %37 = arith.subf %36, %35 : vector<32x4xf32>
    %38 = math.exp %37 : vector<32x4xf32>
    %cst_16 = arith.constant 1.000000e+00 : f32
    %39 = vector.broadcast %cst_16 : f32 to vector<32x4xf32>
    %40 = arith.addf %39, %38 : vector<32x4xf32>
    %cst_17 = arith.constant 1.000000e+00 : f32
    %41 = vector.broadcast %cst_17 : f32 to vector<32x4xf32>
    %42 = arith.divf %41, %40 : vector<32x4xf32>
    %c912 = arith.constant 912 : index
    %c0_18 = arith.constant 0 : index
    %43 = vector.load %arg1[%c912, %c0_18] : memref<1192x128xf32, #tpu.memory_space<vmem>>, vector<128x32xf32>
    %cst_19 = arith.constant dense<0.000000e+00> : vector<128x8xf32>
    %44 = tpu.matmul %43, %30, %cst_19 {dimension_numbers = #tpu.dot_dimension_numbers<[1], [0], [0], [1], [0, 0, 1, 1], [], []>} : vector<128x32xf32>, vector<32x8xf32>, vector<128x8xf32> -> vector<128x8xf32>
    %cst_20 = arith.constant dense<0.000000e+00> : vector<128x4xf32>
    %45 = tpu.matmul %43, %42, %cst_20 {dimension_numbers = #tpu.dot_dimension_numbers<[1], [0], [0], [1], [0, 0, 1, 1], [], []>} : vector<128x32xf32>, vector<32x4xf32>, vector<128x4xf32> -> vector<128x4xf32>
    %c1040 = arith.constant 1040 : index
    %c0_21 = arith.constant 0 : index
    %46 = vector.load %arg1[%c1040, %c0_21] : memref<1192x128xf32, #tpu.memory_space<vmem>>, vector<128x4xf32>
    %47 = arith.mulf %45, %46 : vector<128x4xf32>
    %cst_22 = arith.constant dense<0.000000e+00> : vector<128xf32>
    %48 = vector.multi_reduction <add>, %47, %cst_22 [1] : vector<128x4xf32> to vector<128xf32>
    %49 = vector.shape_cast %48 : vector<128xf32> to vector<128x1xf32>
    %50 = vector.broadcast %49 : vector<128x1xf32> to vector<128x8xf32>
    %51 = arith.mulf %44, %50 : vector<128x8xf32>
    %c336 = arith.constant 336 : index
    %c0_23 = arith.constant 0 : index
    %52 = vector.load %arg1[%c336, %c0_23] : memref<1192x128xf32, #tpu.memory_space<vmem>>, vector<128x128xf32>
    %c464 = arith.constant 464 : index
    %c0_24 = arith.constant 0 : index
    %53 = vector.load %arg1[%c464, %c0_24] : memref<1192x128xf32, #tpu.memory_space<vmem>>, vector<128x128xf32>
    %c48 = arith.constant 48 : index
    %c0_25 = arith.constant 0 : index
    %54 = vector.load %arg1[%c48, %c0_25] : memref<1192x128xf32, #tpu.memory_space<vmem>>, vector<8x48xf32>
    %cst_26 = arith.constant dense<0.000000e+00> : vector<128x48xf32>
    %55 = tpu.matmul %51, %54, %cst_26 {dimension_numbers = #tpu.dot_dimension_numbers<[1], [0], [0], [1], [0, 0, 1, 1], [], []>} : vector<128x8xf32>, vector<8x48xf32>, vector<128x48xf32> -> vector<128x48xf32>
    %56 = vector.extract_strided_slice %55 {offsets = [0, 16], sizes = [128, 16], strides = [1, 1]} : vector<128x48xf32> to vector<128x16xf32>
    %57 = vector.extract_strided_slice %55 {offsets = [0, 0], sizes = [128, 16], strides = [1, 1]} : vector<128x48xf32> to vector<128x16xf32>
    %cst_27 = arith.constant dense<0.000000e+00> : vector<128x16xf32>
    %58 = tpu.matmul %52, %57, %cst_27 {dimension_numbers = #tpu.dot_dimension_numbers<[1], [0], [0], [1], [0, 0, 1, 1], [], []>} : vector<128x128xf32>, vector<128x16xf32>, vector<128x16xf32> -> vector<128x16xf32>
    %59 = arith.addf %56, %58 : vector<128x16xf32>
    %60 = vector.extract_strided_slice %55 {offsets = [0, 32], sizes = [128, 16], strides = [1, 1]} : vector<128x48xf32> to vector<128x16xf32>
    %cst_28 = arith.constant dense<0.000000e+00> : vector<128x16xf32>
    %61 = tpu.matmul %53, %60, %cst_28 {dimension_numbers = #tpu.dot_dimension_numbers<[1], [0], [0], [1], [0, 0, 1, 1], [], []>} : vector<128x128xf32>, vector<128x16xf32>, vector<128x16xf32> -> vector<128x16xf32>
    %62 = arith.addf %59, %61 : vector<128x16xf32>
    %c56 = arith.constant 56 : index
    %c0_29 = arith.constant 0 : index
    %63 = vector.load %arg1[%c56, %c0_29] : memref<1192x128xf32, #tpu.memory_space<vmem>>, vector<1x16xf32>
    %64 = vector.broadcast %63 : vector<1x16xf32> to vector<128x16xf32>
    %65 = arith.addf %62, %64 : vector<128x16xf32>
    %c64 = arith.constant 64 : index
    %c0_30 = arith.constant 0 : index
    %66 = vector.load %arg1[%c64, %c0_30] : memref<1192x128xf32, #tpu.memory_space<vmem>>, vector<1x16xf32>
    %67 = vector.broadcast %66 : vector<1x16xf32> to vector<128x16xf32>
    %68 = arith.mulf %65, %67 : vector<128x16xf32>
    %c72 = arith.constant 72 : index
    %c0_31 = arith.constant 0 : index
    %69 = vector.load %arg1[%c72, %c0_31] : memref<1192x128xf32, #tpu.memory_space<vmem>>, vector<1x16xf32>
    %70 = vector.broadcast %69 : vector<1x16xf32> to vector<128x16xf32>
    %71 = arith.addf %68, %70 : vector<128x16xf32>
    %cst_32 = arith.constant 0.000000e+00 : f32
    %72 = vector.broadcast %cst_32 : f32 to vector<128x16xf32>
    %73 = arith.subf %72, %71 : vector<128x16xf32>
    %74 = math.exp %73 : vector<128x16xf32>
    %cst_33 = arith.constant 1.000000e+00 : f32
    %75 = vector.broadcast %cst_33 : f32 to vector<128x16xf32>
    %76 = arith.addf %75, %74 : vector<128x16xf32>
    %cst_34 = arith.constant 1.000000e+00 : f32
    %77 = vector.broadcast %cst_34 : f32 to vector<128x16xf32>
    %78 = arith.divf %77, %76 : vector<128x16xf32>
    %79 = arith.mulf %71, %78 : vector<128x16xf32>
    %c752 = arith.constant 752 : index
    %c0_35 = arith.constant 0 : index
    %80 = vector.load %arg1[%c752, %c0_35] : memref<1192x128xf32, #tpu.memory_space<vmem>>, vector<64x128xf32>
    %cst_36 = arith.constant dense<0.000000e+00> : vector<64x16xf32>
    %81 = tpu.matmul %80, %79, %cst_36 {dimension_numbers = #tpu.dot_dimension_numbers<[1], [0], [0], [1], [0, 0, 1, 1], [], []>} : vector<64x128xf32>, vector<128x16xf32>, vector<64x16xf32> -> vector<64x16xf32>
    %c816 = arith.constant 816 : index
    %c0_37 = arith.constant 0 : index
    %82 = vector.load %arg1[%c816, %c0_37] : memref<1192x128xf32, #tpu.memory_space<vmem>>, vector<64x128xf32>
    %cst_38 = arith.constant dense<0.000000e+00> : vector<64x16xf32>
    %83 = tpu.matmul %82, %79, %cst_38 {dimension_numbers = #tpu.dot_dimension_numbers<[1], [0], [0], [1], [0, 0, 1, 1], [], []>} : vector<64x128xf32>, vector<128x16xf32>, vector<64x16xf32> -> vector<64x16xf32>
    %84 = arith.maximumf %81, %83 : vector<64x16xf32>
    %c592 = arith.constant 592 : index
    %c0_39 = arith.constant 0 : index
    %85 = vector.load %arg1[%c592, %c0_39] : memref<1192x128xf32, #tpu.memory_space<vmem>>, vector<64x64xf32>
    %c656 = arith.constant 656 : index
    %c0_40 = arith.constant 0 : index
    %86 = vector.load %arg1[%c656, %c0_40] : memref<1192x128xf32, #tpu.memory_space<vmem>>, vector<64x64xf32>
    %c80 = arith.constant 80 : index
    %c0_41 = arith.constant 0 : index
    %87 = vector.load %arg1[%c80, %c0_41] : memref<1192x128xf32, #tpu.memory_space<vmem>>, vector<16x48xf32>
    %cst_42 = arith.constant dense<0.000000e+00> : vector<64x48xf32>
    %88 = tpu.matmul %84, %87, %cst_42 {dimension_numbers = #tpu.dot_dimension_numbers<[1], [0], [0], [1], [0, 0, 1, 1], [], []>} : vector<64x16xf32>, vector<16x48xf32>, vector<64x48xf32> -> vector<64x48xf32>
    %89 = vector.extract_strided_slice %88 {offsets = [0, 16], sizes = [64, 16], strides = [1, 1]} : vector<64x48xf32> to vector<64x16xf32>
    %90 = vector.extract_strided_slice %88 {offsets = [0, 0], sizes = [64, 16], strides = [1, 1]} : vector<64x48xf32> to vector<64x16xf32>
    %cst_43 = arith.constant dense<0.000000e+00> : vector<64x16xf32>
    %91 = tpu.matmul %85, %90, %cst_43 {dimension_numbers = #tpu.dot_dimension_numbers<[1], [0], [0], [1], [0, 0, 1, 1], [], []>} : vector<64x64xf32>, vector<64x16xf32>, vector<64x16xf32> -> vector<64x16xf32>
    %92 = arith.addf %89, %91 : vector<64x16xf32>
    %93 = vector.extract_strided_slice %88 {offsets = [0, 32], sizes = [64, 16], strides = [1, 1]} : vector<64x48xf32> to vector<64x16xf32>
    %cst_44 = arith.constant dense<0.000000e+00> : vector<64x16xf32>
    %94 = tpu.matmul %86, %93, %cst_44 {dimension_numbers = #tpu.dot_dimension_numbers<[1], [0], [0], [1], [0, 0, 1, 1], [], []>} : vector<64x64xf32>, vector<64x16xf32>, vector<64x16xf32> -> vector<64x16xf32>
    %95 = arith.addf %92, %94 : vector<64x16xf32>
    %c96 = arith.constant 96 : index
    %c0_45 = arith.constant 0 : index
    %96 = vector.load %arg1[%c96, %c0_45] : memref<1192x128xf32, #tpu.memory_space<vmem>>, vector<1x16xf32>
    %97 = vector.broadcast %96 : vector<1x16xf32> to vector<64x16xf32>
    %98 = arith.addf %95, %97 : vector<64x16xf32>
    %c104 = arith.constant 104 : index
    %c0_46 = arith.constant 0 : index
    %99 = vector.load %arg1[%c104, %c0_46] : memref<1192x128xf32, #tpu.memory_space<vmem>>, vector<1x16xf32>
    %100 = vector.broadcast %99 : vector<1x16xf32> to vector<64x16xf32>
    %101 = arith.mulf %98, %100 : vector<64x16xf32>
    %c112 = arith.constant 112 : index
    %c0_47 = arith.constant 0 : index
    %102 = vector.load %arg1[%c112, %c0_47] : memref<1192x128xf32, #tpu.memory_space<vmem>>, vector<1x16xf32>
    %103 = vector.broadcast %102 : vector<1x16xf32> to vector<64x16xf32>
    %104 = arith.addf %101, %103 : vector<64x16xf32>
    %cst_48 = arith.constant 0.000000e+00 : f32
    %105 = vector.broadcast %cst_48 : f32 to vector<64x16xf32>
    %106 = arith.subf %105, %104 : vector<64x16xf32>
    %107 = math.exp %106 : vector<64x16xf32>
    %cst_49 = arith.constant 1.000000e+00 : f32
    %108 = vector.broadcast %cst_49 : f32 to vector<64x16xf32>
    %109 = arith.addf %108, %107 : vector<64x16xf32>
    %cst_50 = arith.constant 1.000000e+00 : f32
    %110 = vector.broadcast %cst_50 : f32 to vector<64x16xf32>
    %111 = arith.divf %110, %109 : vector<64x16xf32>
    %112 = arith.mulf %104, %111 : vector<64x16xf32>
    %113 = vector.shape_cast %112 : vector<64x16xf32> to vector<8x8x16xf32>
    %cst_51 = arith.constant dense<0xFF800000> : vector<8x16xf32>
    %114 = vector.multi_reduction <maximumf>, %113, %cst_51 [1] : vector<8x8x16xf32> to vector<8x16xf32>
    %c272_52 = arith.constant 272 : index
    %c0_53 = arith.constant 0 : index
    %115 = vector.load %arg1[%c272_52, %c0_53] : memref<1192x128xf32, #tpu.memory_space<vmem>>, vector<32x32xf32>
    %c304_54 = arith.constant 304 : index
    %c0_55 = arith.constant 0 : index
    %116 = vector.load %arg1[%c304_54, %c0_55] : memref<1192x128xf32, #tpu.memory_space<vmem>>, vector<32x32xf32>
    %c120 = arith.constant 120 : index
    %c0_56 = arith.constant 0 : index
    %117 = vector.load %arg1[%c120, %c0_56] : memref<1192x128xf32, #tpu.memory_space<vmem>>, vector<8x48xf32>
    %cst_57 = arith.constant dense<0.000000e+00> : vector<32x48xf32>
    %118 = tpu.matmul %30, %117, %cst_57 {dimension_numbers = #tpu.dot_dimension_numbers<[1], [0], [0], [1], [0, 0, 1, 1], [], []>} : vector<32x8xf32>, vector<8x48xf32>, vector<32x48xf32> -> vector<32x48xf32>
    %119 = vector.extract_strided_slice %118 {offsets = [0, 16], sizes = [32, 16], strides = [1, 1]} : vector<32x48xf32> to vector<32x16xf32>
    %120 = vector.extract_strided_slice %118 {offsets = [0, 0], sizes = [32, 16], strides = [1, 1]} : vector<32x48xf32> to vector<32x16xf32>
    %cst_58 = arith.constant dense<0.000000e+00> : vector<32x16xf32>
    %121 = tpu.matmul %115, %120, %cst_58 {dimension_numbers = #tpu.dot_dimension_numbers<[1], [0], [0], [1], [0, 0, 1, 1], [], []>} : vector<32x32xf32>, vector<32x16xf32>, vector<32x16xf32> -> vector<32x16xf32>
    %122 = arith.addf %119, %121 : vector<32x16xf32>
    %123 = vector.extract_strided_slice %118 {offsets = [0, 32], sizes = [32, 16], strides = [1, 1]} : vector<32x48xf32> to vector<32x16xf32>
    %cst_59 = arith.constant dense<0.000000e+00> : vector<32x16xf32>
    %124 = tpu.matmul %116, %123, %cst_59 {dimension_numbers = #tpu.dot_dimension_numbers<[1], [0], [0], [1], [0, 0, 1, 1], [], []>} : vector<32x32xf32>, vector<32x16xf32>, vector<32x16xf32> -> vector<32x16xf32>
    %125 = arith.addf %122, %124 : vector<32x16xf32>
    %c128 = arith.constant 128 : index
    %c0_60 = arith.constant 0 : index
    %126 = vector.load %arg1[%c128, %c0_60] : memref<1192x128xf32, #tpu.memory_space<vmem>>, vector<1x16xf32>
    %127 = vector.broadcast %126 : vector<1x16xf32> to vector<32x16xf32>
    %128 = arith.addf %125, %127 : vector<32x16xf32>
    %c136 = arith.constant 136 : index
    %c0_61 = arith.constant 0 : index
    %129 = vector.load %arg1[%c136, %c0_61] : memref<1192x128xf32, #tpu.memory_space<vmem>>, vector<1x16xf32>
    %130 = vector.broadcast %129 : vector<1x16xf32> to vector<32x16xf32>
    %131 = arith.mulf %128, %130 : vector<32x16xf32>
    %c144 = arith.constant 144 : index
    %c0_62 = arith.constant 0 : index
    %132 = vector.load %arg1[%c144, %c0_62] : memref<1192x128xf32, #tpu.memory_space<vmem>>, vector<1x16xf32>
    %133 = vector.broadcast %132 : vector<1x16xf32> to vector<32x16xf32>
    %134 = arith.addf %131, %133 : vector<32x16xf32>
    %cst_63 = arith.constant 0.000000e+00 : f32
    %135 = vector.broadcast %cst_63 : f32 to vector<32x16xf32>
    %136 = arith.subf %135, %134 : vector<32x16xf32>
    %137 = math.exp %136 : vector<32x16xf32>
    %cst_64 = arith.constant 1.000000e+00 : f32
    %138 = vector.broadcast %cst_64 : f32 to vector<32x16xf32>
    %139 = arith.addf %138, %137 : vector<32x16xf32>
    %cst_65 = arith.constant 1.000000e+00 : f32
    %140 = vector.broadcast %cst_65 : f32 to vector<32x16xf32>
    %141 = arith.divf %140, %139 : vector<32x16xf32>
    %142 = arith.mulf %134, %141 : vector<32x16xf32>
    %c880 = arith.constant 880 : index
    %c0_66 = arith.constant 0 : index
    %143 = vector.load %arg1[%c880, %c0_66] : memref<1192x128xf32, #tpu.memory_space<vmem>>, vector<16x32xf32>
    %cst_67 = arith.constant dense<0.000000e+00> : vector<16x16xf32>
    %144 = tpu.matmul %143, %142, %cst_67 {dimension_numbers = #tpu.dot_dimension_numbers<[1], [0], [0], [1], [0, 0, 1, 1], [], []>} : vector<16x32xf32>, vector<32x16xf32>, vector<16x16xf32> -> vector<16x16xf32>
    %c896 = arith.constant 896 : index
    %c0_68 = arith.constant 0 : index
    %145 = vector.load %arg1[%c896, %c0_68] : memref<1192x128xf32, #tpu.memory_space<vmem>>, vector<16x32xf32>
    %cst_69 = arith.constant dense<0.000000e+00> : vector<16x16xf32>
    %146 = tpu.matmul %145, %142, %cst_69 {dimension_numbers = #tpu.dot_dimension_numbers<[1], [0], [0], [1], [0, 0, 1, 1], [], []>} : vector<16x32xf32>, vector<32x16xf32>, vector<16x16xf32> -> vector<16x16xf32>
    %147 = arith.maximumf %144, %146 : vector<16x16xf32>
    %c720 = arith.constant 720 : index
    %c0_70 = arith.constant 0 : index
    %148 = vector.load %arg1[%c720, %c0_70] : memref<1192x128xf32, #tpu.memory_space<vmem>>, vector<16x16xf32>
    %c736 = arith.constant 736 : index
    %c0_71 = arith.constant 0 : index
    %149 = vector.load %arg1[%c736, %c0_71] : memref<1192x128xf32, #tpu.memory_space<vmem>>, vector<16x16xf32>
    %c152 = arith.constant 152 : index
    %c0_72 = arith.constant 0 : index
    %150 = vector.load %arg1[%c152, %c0_72] : memref<1192x128xf32, #tpu.memory_space<vmem>>, vector<16x48xf32>
    %cst_73 = arith.constant dense<0.000000e+00> : vector<16x48xf32>
    %151 = tpu.matmul %147, %150, %cst_73 {dimension_numbers = #tpu.dot_dimension_numbers<[1], [0], [0], [1], [0, 0, 1, 1], [], []>} : vector<16x16xf32>, vector<16x48xf32>, vector<16x48xf32> -> vector<16x48xf32>
    %152 = vector.extract_strided_slice %151 {offsets = [0, 16], sizes = [16, 16], strides = [1, 1]} : vector<16x48xf32> to vector<16x16xf32>
    %153 = vector.extract_strided_slice %151 {offsets = [0, 0], sizes = [16, 16], strides = [1, 1]} : vector<16x48xf32> to vector<16x16xf32>
    %cst_74 = arith.constant dense<0.000000e+00> : vector<16x16xf32>
    %154 = tpu.matmul %148, %153, %cst_74 {dimension_numbers = #tpu.dot_dimension_numbers<[1], [0], [0], [1], [0, 0, 1, 1], [], []>} : vector<16x16xf32>, vector<16x16xf32>, vector<16x16xf32> -> vector<16x16xf32>
    %155 = arith.addf %152, %154 : vector<16x16xf32>
    %156 = vector.extract_strided_slice %151 {offsets = [0, 32], sizes = [16, 16], strides = [1, 1]} : vector<16x48xf32> to vector<16x16xf32>
    %cst_75 = arith.constant dense<0.000000e+00> : vector<16x16xf32>
    %157 = tpu.matmul %149, %156, %cst_75 {dimension_numbers = #tpu.dot_dimension_numbers<[1], [0], [0], [1], [0, 0, 1, 1], [], []>} : vector<16x16xf32>, vector<16x16xf32>, vector<16x16xf32> -> vector<16x16xf32>
    %158 = arith.addf %155, %157 : vector<16x16xf32>
    %c168 = arith.constant 168 : index
    %c0_76 = arith.constant 0 : index
    %159 = vector.load %arg1[%c168, %c0_76] : memref<1192x128xf32, #tpu.memory_space<vmem>>, vector<1x16xf32>
    %160 = vector.broadcast %159 : vector<1x16xf32> to vector<16x16xf32>
    %161 = arith.addf %158, %160 : vector<16x16xf32>
    %c176 = arith.constant 176 : index
    %c0_77 = arith.constant 0 : index
    %162 = vector.load %arg1[%c176, %c0_77] : memref<1192x128xf32, #tpu.memory_space<vmem>>, vector<1x16xf32>
    %163 = vector.broadcast %162 : vector<1x16xf32> to vector<16x16xf32>
    %164 = arith.mulf %161, %163 : vector<16x16xf32>
    %c184 = arith.constant 184 : index
    %c0_78 = arith.constant 0 : index
    %165 = vector.load %arg1[%c184, %c0_78] : memref<1192x128xf32, #tpu.memory_space<vmem>>, vector<1x16xf32>
    %166 = vector.broadcast %165 : vector<1x16xf32> to vector<16x16xf32>
    %167 = arith.addf %164, %166 : vector<16x16xf32>
    %cst_79 = arith.constant 0.000000e+00 : f32
    %168 = vector.broadcast %cst_79 : f32 to vector<16x16xf32>
    %169 = arith.subf %168, %167 : vector<16x16xf32>
    %170 = math.exp %169 : vector<16x16xf32>
    %cst_80 = arith.constant 1.000000e+00 : f32
    %171 = vector.broadcast %cst_80 : f32 to vector<16x16xf32>
    %172 = arith.addf %171, %170 : vector<16x16xf32>
    %cst_81 = arith.constant 1.000000e+00 : f32
    %173 = vector.broadcast %cst_81 : f32 to vector<16x16xf32>
    %174 = arith.divf %173, %172 : vector<16x16xf32>
    %175 = arith.mulf %167, %174 : vector<16x16xf32>
    %176 = vector.shape_cast %175 : vector<16x16xf32> to vector<2x8x16xf32>
    %cst_82 = arith.constant dense<0xFF800000> : vector<2x16xf32>
    %177 = vector.multi_reduction <maximumf>, %176, %cst_82 [1] : vector<2x8x16xf32> to vector<2x16xf32>
    %c192 = arith.constant 192 : index
    %c0_83 = arith.constant 0 : index
    %178 = vector.load %arg1[%c192, %c0_83] : memref<1192x128xf32, #tpu.memory_space<vmem>>, vector<1x16xf32>
    %179 = vector.broadcast %178 : vector<1x16xf32> to vector<2x16xf32>
    %180 = arith.mulf %177, %179 : vector<2x16xf32>
    %c200 = arith.constant 200 : index
    %c0_84 = arith.constant 0 : index
    %181 = vector.load %arg1[%c200, %c0_84] : memref<1192x128xf32, #tpu.memory_space<vmem>>, vector<1x16xf32>
    %182 = vector.broadcast %181 : vector<1x16xf32> to vector<2x16xf32>
    %183 = arith.addf %180, %182 : vector<2x16xf32>
    %cst_85 = arith.constant 0.000000e+00 : f32
    %184 = vector.broadcast %cst_85 : f32 to vector<2x16xf32>
    %185 = arith.subf %184, %183 : vector<2x16xf32>
    %186 = math.exp %185 : vector<2x16xf32>
    %cst_86 = arith.constant 1.000000e+00 : f32
    %187 = vector.broadcast %cst_86 : f32 to vector<2x16xf32>
    %188 = arith.addf %187, %186 : vector<2x16xf32>
    %cst_87 = arith.constant 1.000000e+00 : f32
    %189 = vector.broadcast %cst_87 : f32 to vector<2x16xf32>
    %190 = arith.divf %189, %188 : vector<2x16xf32>
    %191 = arith.mulf %183, %190 : vector<2x16xf32>
    %c208 = arith.constant 208 : index
    %c0_88 = arith.constant 0 : index
    %192 = vector.load %arg1[%c208, %c0_88] : memref<1192x128xf32, #tpu.memory_space<vmem>>, vector<16x4xf32>
    %cst_89 = arith.constant dense<0.000000e+00> : vector<2x4xf32>
    %193 = tpu.matmul %191, %192, %cst_89 {dimension_numbers = #tpu.dot_dimension_numbers<[1], [0], [0], [1], [0, 0, 1, 1], [], []>} : vector<2x16xf32>, vector<16x4xf32>, vector<2x4xf32> -> vector<2x4xf32>
    %c224 = arith.constant 224 : index
    %c0_90 = arith.constant 0 : index
    %194 = vector.load %arg1[%c224, %c0_90] : memref<1192x128xf32, #tpu.memory_space<vmem>>, vector<1x4xf32>
    %195 = vector.broadcast %194 : vector<1x4xf32> to vector<2x4xf32>
    %196 = arith.addf %193, %195 : vector<2x4xf32>
    %cst_91 = arith.constant 0.000000e+00 : f32
    %197 = vector.broadcast %cst_91 : f32 to vector<2x4xf32>
    %198 = arith.maximumf %196, %197 : vector<2x4xf32>
    %199 = math.absf %196 : vector<2x4xf32>
    %cst_92 = arith.constant 0.000000e+00 : f32
    %200 = vector.broadcast %cst_92 : f32 to vector<2x4xf32>
    %201 = arith.subf %200, %199 : vector<2x4xf32>
    %202 = math.exp %201 : vector<2x4xf32>
    %cst_93 = arith.constant 1.000000e+00 : f32
    %203 = vector.broadcast %cst_93 : f32 to vector<2x4xf32>
    %204 = arith.addf %203, %202 : vector<2x4xf32>
    %205 = math.log %204 : vector<2x4xf32>
    %206 = arith.addf %198, %205 : vector<2x4xf32>
    %c232 = arith.constant 232 : index
    %c0_94 = arith.constant 0 : index
    %207 = vector.load %arg1[%c232, %c0_94] : memref<1192x128xf32, #tpu.memory_space<vmem>>, vector<1x16xf32>
    %208 = vector.broadcast %207 : vector<1x16xf32> to vector<8x16xf32>
    %209 = arith.mulf %114, %208 : vector<8x16xf32>
    %c240 = arith.constant 240 : index
    %c0_95 = arith.constant 0 : index
    %210 = vector.load %arg1[%c240, %c0_95] : memref<1192x128xf32, #tpu.memory_space<vmem>>, vector<1x16xf32>
    %211 = vector.broadcast %210 : vector<1x16xf32> to vector<8x16xf32>
    %212 = arith.addf %209, %211 : vector<8x16xf32>
    %cst_96 = arith.constant 0.000000e+00 : f32
    %213 = vector.broadcast %cst_96 : f32 to vector<8x16xf32>
    %214 = arith.subf %213, %212 : vector<8x16xf32>
    %215 = math.exp %214 : vector<8x16xf32>
    %cst_97 = arith.constant 1.000000e+00 : f32
    %216 = vector.broadcast %cst_97 : f32 to vector<8x16xf32>
    %217 = arith.addf %216, %215 : vector<8x16xf32>
    %cst_98 = arith.constant 1.000000e+00 : f32
    %218 = vector.broadcast %cst_98 : f32 to vector<8x16xf32>
    %219 = arith.divf %218, %217 : vector<8x16xf32>
    %220 = arith.mulf %212, %219 : vector<8x16xf32>
    %c248 = arith.constant 248 : index
    %c0_99 = arith.constant 0 : index
    %221 = vector.load %arg1[%c248, %c0_99] : memref<1192x128xf32, #tpu.memory_space<vmem>>, vector<16x5xf32>
    %cst_100 = arith.constant dense<0.000000e+00> : vector<8x5xf32>
    %222 = tpu.matmul %220, %221, %cst_100 {dimension_numbers = #tpu.dot_dimension_numbers<[1], [0], [0], [1], [0, 0, 1, 1], [], []>} : vector<8x16xf32>, vector<16x5xf32>, vector<8x5xf32> -> vector<8x5xf32>
    %c264 = arith.constant 264 : index
    %c0_101 = arith.constant 0 : index
    %223 = vector.load %arg1[%c264, %c0_101] : memref<1192x128xf32, #tpu.memory_space<vmem>>, vector<1x5xf32>
    %224 = vector.broadcast %223 : vector<1x5xf32> to vector<8x5xf32>
    %225 = arith.addf %222, %224 : vector<8x5xf32>
    %c1168 = arith.constant 1168 : index
    %c0_102 = arith.constant 0 : index
    %226 = vector.load %arg1[%c1168, %c0_102] : memref<1192x128xf32, #tpu.memory_space<vmem>>, vector<8x2xf32>
    %cst_103 = arith.constant dense<0.000000e+00> : vector<8x4xf32>
    %227 = tpu.matmul %226, %206, %cst_103 {dimension_numbers = #tpu.dot_dimension_numbers<[1], [0], [0], [1], [0, 0, 1, 1], [], []>} : vector<8x2xf32>, vector<2x4xf32>, vector<8x4xf32> -> vector<8x4xf32>
    %c1176 = arith.constant 1176 : index
    %c0_104 = arith.constant 0 : index
    %228 = vector.load %arg1[%c1176, %c0_104] : memref<1192x128xf32, #tpu.memory_space<vmem>>, vector<8x4xf32>
    %229 = arith.mulf %227, %228 : vector<8x4xf32>
    %cst_105 = arith.constant dense<0.000000e+00> : vector<8xf32>
    %230 = vector.multi_reduction <add>, %229, %cst_105 [1] : vector<8x4xf32> to vector<8xf32>
    %231 = vector.shape_cast %230 : vector<8xf32> to vector<8x1xf32>
    %c1184 = arith.constant 1184 : index
    %c0_106 = arith.constant 0 : index
    %232 = vector.load %arg1[%c1184, %c0_106] : memref<1192x128xf32, #tpu.memory_space<vmem>>, vector<2x8xf32>
    %233 = vector.broadcast %231 : vector<8x1xf32> to vector<8x5xf32>
    %234 = arith.mulf %225, %233 : vector<8x5xf32>
    %cst_107 = arith.constant dense<0.000000e+00> : vector<2x5xf32>
    %235 = tpu.matmul %232, %234, %cst_107 {dimension_numbers = #tpu.dot_dimension_numbers<[1], [0], [0], [1], [0, 0, 1, 1], [], []>} : vector<2x8xf32>, vector<8x5xf32>, vector<2x5xf32> -> vector<2x5xf32>
    %cst_108 = arith.constant 0.000000e+00 : f32
    %236 = vector.broadcast %cst_108 : f32 to vector<56x128xf32>
    %c0_109 = arith.constant 0 : index
    %c0_110 = arith.constant 0 : index
    %237 = vector.load %arg2[%c0_109, %c0_110] : memref<56x128xf32, #tpu.memory_space<vmem>>, vector<56x128xf32>
    tpu.vector_store %arg2[%c0_109, %c0_110], %236 {strides = array<i32>} : memref<56x128xf32, #tpu.memory_space<vmem>>, vector<56x128xf32>,
    %c0_111 = arith.constant 0 : index
    %c0_112 = arith.constant 0 : index
    %238 = vector.load %arg2[%c0_111, %c0_112] : memref<56x128xf32, #tpu.memory_space<vmem>>, vector<8x16xf32>
    tpu.vector_store %arg2[%c0_111, %c0_112], %114 {strides = array<i32>} : memref<56x128xf32, #tpu.memory_space<vmem>>, vector<8x16xf32>,
    %c8_113 = arith.constant 8 : index
    %c0_114 = arith.constant 0 : index
    %239 = vector.load %arg2[%c8_113, %c0_114] : memref<56x128xf32, #tpu.memory_space<vmem>>, vector<32x4xf32>
    tpu.vector_store %arg2[%c8_113, %c0_114], %42 {strides = array<i32>} : memref<56x128xf32, #tpu.memory_space<vmem>>, vector<32x4xf32>,
    %c40_115 = arith.constant 40 : index
    %c0_116 = arith.constant 0 : index
    %240 = vector.load %arg2[%c40_115, %c0_116] : memref<56x128xf32, #tpu.memory_space<vmem>>, vector<2x4xf32>
    tpu.vector_store %arg2[%c40_115, %c0_116], %206 {strides = array<i32>} : memref<56x128xf32, #tpu.memory_space<vmem>>, vector<2x4xf32>,
    %c42 = arith.constant 42 : index
    %c0_117 = arith.constant 0 : index
    %241 = vector.load %arg2[%c42, %c0_117] : memref<56x128xf32, #tpu.memory_space<vmem>>, vector<2x5xf32>
    tpu.vector_store %arg2[%c42, %c0_117], %235 {strides = array<i32>} : memref<56x128xf32, #tpu.memory_space<vmem>>, vector<2x5xf32>,
    %c44 = arith.constant 44 : index
    %c0_118 = arith.constant 0 : index
    %242 = vector.load %arg2[%c44, %c0_118] : memref<56x128xf32, #tpu.memory_space<vmem>>, vector<8x5xf32>
    tpu.vector_store %arg2[%c44, %c0_118], %225 {strides = array<i32>} : memref<56x128xf32, #tpu.memory_space<vmem>>, vector<8x5xf32>,
    return
  }
}

</mosaic_0001>

<bundles_post_ra>
// kernel: _lambda_.1
= control target key start
LH: loop header
LB: loop body
LE: loop exit
PB: predicated region body
PF: predicated region fallthrough
CT: control target
= control target key end

     0   :  { %7 = vsyncpa [#allocation3], 0  ;;  %s5475_s9 = smov [#allocation2]   ;;  %s6402_s0 = inlined_call_operand.vmem [shape: f32[32,1], index: 0, kind: input, shape index: {}]   ;;  %s6403_s1 = inlined_call_operand.hbm [shape: f32[1192,128], index: 1, kind: input, shape index: {}]   ;;  %s6404_s2 = inlined_call_operand.vmem [shape: f32[56,128], index: 2, kind: output, shape index: {}]  }
   0x1   :  { %s15_s10 = sshll.u32 %s5475_s9, 4  ;;  %s16_s10 = int_to_ptr.vmem [resolvable:$true] %s15_s10 }
   0x2   :  { %s5461_s11 = scalar_lea.vmem %s16_s10, 19072  ;;  %p5466_p1 = scmp.lt.s32.totalorder %s16_s10, %s16_s10 }
   0x3   :  { %p5462_p0 = scmp.ne.s32.totalorder %s16_s10, %s5461_s11  ;;  %p5467_p2 = scmp.lt.s32.totalorder %s5461_s11, %s5461_s11 }
   0x5   :  { %p5468_p3 = por %p5467_p2, %p5466_p1 }
   0x7   :  { %p5469_p4 = pnand %p5468_p3, %p5462_p0 }
   0x9   :  { %5472 = shalt.err (!%p5469_p4)
}
   0xa   :  { %s5476_s12 = smov 128   ;;  %s5477_s13 = smov 8  }
   0xb   :  { %21 = dma.hbm_to_vmem [thread:$0]  %s6403_s1, 19072, %s16_s10, [#allocation3], %s5476_s12, %s5476_s12, %s5477_s13  }
   0xc   :  { %5473 = dma.done.wait [#allocation3], 19072  }
   0xd   :  { %5474 = vsyncadd [#allocation3], 4294948224  ;;  %v5478_v0 = vmov 0   ;;  %v28_v1 = vld [vmem:[%s6402_s0 + $0x18] sm:$0xff]  ;;  %v26_v2 = vld [vmem:[%s6402_s0 + $0x8] sm:$0xff]  ;;  %vm66_vm0 = vcmask 261120  }
   0xe   :  { %5247 = vset.pattern.permute.xlu1 %v5478_v0  ;;  %5246 = vset.pattern.permute.xlu0 %v5478_v0  ;;  %v27_v3 = vld [vmem:[%s6402_s0 + $0x10] sm:$0xff]  ;;  %v25_v4 = vld [vmem:[%s6402_s0] sm:$0xff]  ;;  %s5479_s23 = smov 112   ;;  %v30_v16 = vld [vmem:[#allocation2 + $0x118] sm:$0xff]  ;;  %s5480_s0 = smov 120   ;;  %vm402_vm1 = vcmask 64512  }
   0xf   :  { %55 = vperm.xlu0 %5246, %v28_v1   ;;  %45 = vperm.xlu1 %5247, %v26_v2   ;;  %v29_v5 = vld [vmem:[#allocation2 + $0x110] sm:$0xff]  ;;  %v4314_v6 = vld [vmem:[#allocation2] ss:$0 sm:$0xff]  ;;  %v4323_v18 = vld [vmem:[#allocation2 + $0x8] ss:$0 sm:$0xff]  ;;  %vm910_vm2 = vcmask 31744  }
  0x10   :  { %4743 = vmatprep.mubr.msk.f32.mxu0 %vm66_vm0, %v29_v5  ;;  %v33_v7 = vld [vmem:[#allocation2 + $0x130] sm:$0xff]  ;;  %v31_v17 = vld [vmem:[#allocation2 + $0x120] sm:$0xff]  ;;  %v32_v19 = vld [vmem:[#allocation2 + $0x128] sm:$0xff]  ;;  %s5482_s18 = smov 96   ;;  %s5483_s19 = smov 16   ;;  %vm2218_vm3 = vcmask 130048  }
  0x11   :  { %4757 = vmatprep.mubr.msk.f32.mxu1 %vm66_vm0, %v33_v7  ;;  %v34_v24 = vld [vmem:[#allocation2 + $0x138] sm:$0xff]  ;;  %v35_v25 = vld [vmem:[#allocation2 + $0x140] sm:$0xff]  ;;  %v36_v26 = vld [vmem:[#allocation2 + $0x148] sm:$0xff]  ;;  %vm2348_vm4 = vcmask 523264   ;;  %vm5484_vm5 = vmmov 0   ;;  %vm2826_vm6 = vcmask 261248  }
  0x12   :  { %v4324_v34 = vld [vmem:[#allocation2 + $0x10] ss:$0 sm:$0xff]  ;;  %v4325_v36 = vld [vmem:[#allocation2 + $0x18] ss:$0 sm:$0xff]  ;;  %v384_v37 = vld [vmem:[#allocation2 + $0x20] sm:$0xff]  ;;  %vm3830_vm7 = vcmask 1041409  }
  0x13   :  { %50 = vperm.xlu0 %5246, %v27_v3   ;;  %40 = vperm.xlu1 %5247, %v25_v4   ;;  %vm4023_vm8 = vcmask 1042434   ;;  %vm4026_vm9 = vcmask 1043459   ;;  %vm4029_vm10 = vcmask 1044484   ;;  %vm4032_vm11 = vcmask 1045509  }
  0x14   :  { %vm4035_vm12 = vcmask 1046534   ;;  %vm4038_vm13 = vcmask 1047559   ;;  %vm4119_vm14 = vcmask 1041408   ;;  %vm4303_vm15 = vcmask 25600  }
  0x8a   :  { %v56_v8 = vpop.permute.xlu0 %55  ;;  %v46_v9 = vpop.permute.xlu1 %45 }
  0x8b   :  { %v5518_v10 = vmul.f32 %v4314_v6, %v56_v8  ;;  %v5520_v11 = vmul.f32 %v4314_v6, %v46_v9 }
  0x8d   :  { %4735 = vmatprep.subr.mxu0 %v5518_v10  ;;  %194 = vrot.lane.b32.xlu0 %v5518_v10, %s5479_s23 }
  0x8e   :  { %4736 = vmatpush3.msra.mxu0 %v5518_v10  ;;  %v51_v12 = vpop.permute.xlu0 %50  ;;  %v41_v14 = vpop.permute.xlu1 %40 }
  0x8f   :  { %v5526_v13 = vmul.f32 %v4314_v6, %v51_v12  ;;  %v62_v15 = vmul.f32 %v4314_v6, %v41_v14 }
  0x91   :  { %4737 = vmatprep.subr.mxu0 %v5526_v13  ;;  %190 = vrot.lane.b32.xlu0 %v5520_v11, %s5479_s23 }
  0x92   :  { %192 = vrot.lane.b32.xlu1 %v5526_v13, %s5479_s23  ;;  %4738 = vmatpush3.msra.mxu0 %v5526_v13 }
  0x93   :  { %4739 = vmatprep.subr.mxu0 %v5520_v11 }
  0x94   :  { %4740 = vmatpush3.msra.mxu0 %v5520_v11 }
  0x95   :  { %4741 = vmatprep.subr.mxu0 %v62_v15 }
  0x96   :  { %188 = vrot.lane.b32.xlu1 %v62_v15, %s5479_s23  ;;  %4742 = vmatpush3.msra.mxu0 %v62_v15 }
  0x97   :  { %4744 = vmatmul.mubr.msk.f32.vlgmr.msra.gmra.mxu0 %vm66_vm0, %v30_v16  ;;  %4763 = vmatprep.subr.mxu0 %v384_v37 }
  0x98   :  { %4746 = vmatprep.mubr.msk.f32.mxu0 %vm66_vm0, %v31_v17  ;;  %4764 = vmatpush3.msra.mxu0 %v384_v37  ;;  %v5612_v37 = vld [vmem:[#allocation2 + $0x3a8] sm:$0xff] }
  0x9a   :  { %323 = vrot.lane.b32.xlu1 %v4323_v18, %s5477_s13 }
  0x9b   :  { %4747 = vmatmul.mubr.msk.f32.gmra.mxu0 %vm66_vm0, %v32_v19 }
  0xff   :  { %v195_v20 = vpop.permute.xlu0 %194 }
 0x100   :  { %4749 = vmatprep.subr.mxu1 %v195_v20 }
 0x101   :  { %4750 = vmatpush3.msra.mxu1 %v195_v20 }
 0x103   :  { %v191_v22 = vpop.permute.xlu0 %190 }
 0x104   :  { %v193_v21 = vpop.permute.xlu1 %192 }
 0x105   :  { %4751 = vmatprep.subr.mxu1 %v193_v21 }
 0x106   :  { %4752 = vmatpush3.msra.mxu1 %v193_v21 }
 0x107   :  { %4753 = vmatprep.subr.mxu1 %v191_v22 }
 0x108   :  { %4754 = vmatpush3.msra.mxu1 %v191_v22  ;;  %v189_v23 = vpop.permute.xlu1 %188 }
 0x109   :  { %4755 = vmatprep.subr.mxu1 %v189_v23 }
 0x10a   :  { %4756 = vmatpush3.msra.mxu1 %v189_v23 }
 0x10b   :  { %4758 = vmatmul.mubr.msk.f32.vlgmr.msra.gmra.mxu1 %vm66_vm0, %v34_v24 }
 0x10c   :  { %4760 = vmatprep.mubr.msk.f32.mxu1 %vm66_vm0, %v35_v25  ;;  %v324_v39 = vpop.permute.xlu1 %323 }
 0x10f   :  { %4761 = vmatmul.mubr.msk.f32.gmra.mxu1 %vm66_vm0, %v36_v26 }
 0x157   :  { %v4745_v27 = vpop.f32.mrf.mxu0 }
 0x158   :  { %170 = vrot.lane.b32.xlu1 %v4745_v27, %s5477_s13 }
 0x159   :  { %v145_v28 = vpop.f32.mrf.mxu0 }
 0x15a   :  { %168 = vrot.lane.b32.xlu0 %v145_v28, %s5477_s13 }
 0x15b   :  { %v4748_v29 = vpop.f32.mrf.mxu0 }
 0x15d   :  { %v155_v30 = vpop.f32.mrf.mxu0 }
 0x15e   :  { %174 = vrot.lane.b32.xlu0 %v4748_v29, %s5477_s13 }
 0x162   :  { %172 = vrot.lane.b32.xlu0 %v155_v30, %s5477_s13 }
 0x1ca   :  { %v171_v41 = vpop.permute.xlu1 %170 }
 0x1cb   :  { %v4759_v31 = vpop.f32.mrf.mxu1  ;;  %v181_v44 = vadd.f32 %v171_v41, %v5520_v11  ;;  %v5628_v41 = vld [vmem:[#allocation2 + $0x3c8] sm:$0xff] }
 0x1cc   :  { %303 = vrot.lane.b32.xlu1 %v4759_v31, %s5477_s13  ;;  %v169_v38 = vpop.permute.xlu0 %168 }
 0x1cd   :  { %v278_v32 = vpop.f32.mrf.mxu1  ;;  %v180_v45 = vadd.f32 %v169_v38, %v62_v15  ;;  %v5614_v38 = vld [vmem:[#allocation2 + $0x3b0] sm:$0xff] }
 0x1ce   :  { %301 = vrot.lane.b32.xlu0 %v278_v32, %s5477_s13 }
 0x1cf   :  { %v4762_v33 = vpop.f32.mrf.mxu1 }
 0x1d0   :  { %v175_v40 = vpop.permute.xlu0 %174 }
 0x1d1   :  { %v288_v35 = vpop.f32.mrf.mxu1  ;;  %v183_v55 = vadd.f32 %v175_v40, %v5518_v10  ;;  %v5622_v40 = vld [vmem:[#allocation2 + $0x3c0] sm:$0xff] }
 0x1d2   :  { %336 = vrot.lane.b32.xlu0 %v4324_v34, %s5477_s13  ;;  %305 = vrot.lane.b32.xlu1 %v288_v35, %s5477_s13  ;;  %v520_v34 = vld [vmem:[#allocation2 + $0x390] sm:$0xff]  ;;  %v5603_v35 = vld [vmem:[#allocation2 + $0x398] sm:$0xff] }
 0x1d3   :  { %4779 = vmatprep.mubr.msk.f32.mxu1 %vm66_vm0, %v520_v34 }
 0x1d4   :  { %v173_v42 = vpop.permute.xlu0 %172 }
 0x1d5   :  { %v182_v49 = vadd.f32 %v173_v42, %v5526_v13  ;;  %v5630_v42 = vld [vmem:[#allocation2 + $0x3d0] sm:$0xff] }
 0x1d6   :  { %349 = vrot.lane.b32.xlu0 %v4325_v36, %s5477_s13  ;;  %307 = vrot.lane.b32.xlu1 %v4762_v33, %s5477_s13  ;;  %v5481_v33 = vmov 0.0   ;;  %v5606_v36 = vld [vmem:[#allocation2 + $0x3a0] sm:$0xff] }
 0x1d7   :  { %4275 = vst [vmem:[%s6404_s2 + $0x10] sm:$0xff] %v5481_v33  ;;  %4273 = vst [vmem:[%s6404_s2] sm:$0xff] %v5481_v33 }
 0x1d8   :  { %4274 = vst [vmem:[%s6404_s2 + $0x8] sm:$0xff] %v5481_v33  ;;  %4276 = vst [vmem:[%s6404_s2 + $0x18] sm:$0xff] %v5481_v33 }
 0x1d9   :  { %4277 = vst [vmem:[%s6404_s2 + $0x20] sm:$0xff] %v5481_v33  ;;  %4278 = vst [vmem:[%s6404_s2 + $0x28] sm:$0xff] %v5481_v33 }
 0x1da   :  { %4279 = vst [vmem:[%s6404_s2 + $0x30] sm:$0xff] %v5481_v33  ;;  %v883_v33 = vld [vmem:[#allocation2 + $0x438] sm:$0xff] }
 0x23e   :  { %v304_v43 = vpop.permute.xlu1 %303 }
 0x23f   :  { %v314_v47 = vadd.f32 %v304_v43, %v181_v44  ;;  %v5636_v43 = vld [vmem:[#allocation2 + $0x3d8] sm:$0xff]  ;;  %v5638_v44 = vld [vmem:[#allocation2 + $0x3e0] sm:$0xff] }
 0x240   :  { %v302_v46 = vpop.permute.xlu0 %301 }
 0x241   :  { %v313_v48 = vadd.f32 %v302_v46, %v180_v45  ;;  %v327_v53 = vadd.f32 %v324_v39, %v314_v47  ;;  %v5644_v45 = vld [vmem:[#allocation2 + $0x3e8] sm:$0xff]  ;;  %v5646_v46 = vld [vmem:[#allocation2 + $0x3f0] sm:$0xff]  ;;  %v5652_v47 = vld [vmem:[#allocation2 + $0x3f8] sm:$0xff] }
 0x243   :  { %v326_v50 = vadd.f32 %v324_v39, %v313_v48  ;;  %v5654_v48 = vld [vmem:[#allocation2 + $0x400] sm:$0xff] }
 0x244   :  { %v337_v51 = vpop.permute.xlu0 %336  ;;  %v306_v52 = vpop.permute.xlu1 %305 }
 0x245   :  { %v315_v54 = vadd.f32 %v306_v52, %v182_v49  ;;  %v339_v57 = vmul.f32 %v337_v51, %v326_v50  ;;  %v340_v58 = vmul.f32 %v337_v51, %v327_v53  ;;  %v5660_v49 = vld [vmem:[#allocation2 + $0x408] sm:$0xff] }
 0x246   :  { %v4326_v50 = vld [vmem:[#allocation2 + $0x28] ss:$0 sm:$0xff] }
 0x247   :  { %v328_v56 = vadd.f32 %v324_v39, %v315_v54 }
 0x248   :  { %v350_v59 = vpop.permute.xlu0 %349  ;;  %v308_v60 = vpop.permute.xlu1 %307 }
 0x249   :  { %v341_v61 = vmul.f32 %v337_v51, %v328_v56  ;;  %v316_v62 = vadd.f32 %v308_v60, %v183_v55  ;;  %v352_v63 = vadd.f32 %v350_v59, %v339_v57  ;;  %v353_v0 = vadd.f32 %v350_v59, %v340_v58 }
 0x24b   :  { %v329_v1 = vadd.f32 %v324_v39, %v316_v62  ;;  %v356_v2 = vsub.f32 0.0, %v352_v63  ;;  %v357_v3 = vsub.f32 0.0, %v353_v0  ;;  %v354_v4 = vadd.f32 %v350_v59, %v341_v61  ;;  %v5620_v39 = vld [vmem:[#allocation2 + $0x3b8] sm:$0xff] }
 0x24d   :  { %v342_v5 = vmul.f32 %v337_v51, %v329_v1  ;;  %v360_v6 = vmul.f32 1.442695, %v356_v2  ;;  %v362_v7 = vmul.f32 1.442695, %v357_v3  ;;  %v358_v8 = vsub.f32 0.0, %v354_v4 }
 0x24f   :  { %5248 = vpow2.f32 %v360_v6  ;;  %v364_v9 = vmul.f32 1.442695, %v358_v8  ;;  %v355_v10 = vadd.f32 %v350_v59, %v342_v5 }
 0x250   :  { %5250 = vpow2.f32 %v362_v7 }
 0x251   :  { %5252 = vpow2.f32 %v364_v9  ;;  %v359_v11 = vsub.f32 0.0, %v355_v10 }
 0x253   :  { %v366_v12 = vmul.f32 1.442695, %v359_v11 }
 0x255   :  { %5254 = vpow2.f32 %v366_v12 }
 0x25c   :  { %v5249_v13 = vpop.eup %5248 }
 0x25d   :  { %v5251_v14 = vpop.eup %5250  ;;  %v368_v15 = vadd.f32 1.0, %v5249_v13 }
 0x25e   :  { %v5253_v16 = vpop.eup %5252  ;;  %v369_v17 = vadd.f32 1.0, %v5251_v14 }
 0x25f   :  { %5256 = vrcp.f32 %v368_v15  ;;  %v370_v18 = vadd.f32 1.0, %v5253_v16  ;;  %v1007_v15 = vld [vmem:[#allocation2 + $0x30] sm:$0xff]  ;;  %v879_v16 = vld [vmem:[#allocation2 + $0x418] sm:$0xff] }
 0x260   :  { %5258 = vrcp.f32 %v369_v17 }
 0x261   :  { %5260 = vrcp.f32 %v370_v18  ;;  %v878_v18 = vld [vmem:[#allocation2 + $0x410] sm:$0xff] }
 0x262   :  { %v5255_v19 = vpop.eup %5254 }
 0x263   :  { %v371_v20 = vadd.f32 1.0, %v5255_v19 }
 0x265   :  { %5262 = vrcp.f32 %v371_v20 }
 0x26c   :  { %v5257_v21 = vpop.eup %5256 }
 0x26d   :  { %v5259_v22 = vpop.eup %5258  ;;  %v380_v23 = vmul.f32 %v5257_v21, %v352_v63  ;;  %v881_v21 = vld [vmem:[#allocation2 + $0x428] sm:$0xff] }
 0x26e   :  { %v5261_v24 = vpop.eup %5260  ;;  %v381_v25 = vmul.f32 %v5259_v22, %v353_v0 }
 0x26f   :  { %394 = vrot.lane.b32.xlu1 %v380_v23, %s5480_s0  ;;  %v382_v26 = vmul.f32 %v5261_v24, %v354_v4 }
 0x270   :  { %396 = vrot.lane.b32.xlu0 %v381_v25, %s5480_s0  ;;  %v880_v25 = vld [vmem:[#allocation2 + $0x420] sm:$0xff] }
 0x272   :  { %v5263_v27 = vpop.eup %5262 }
 0x273   :  { %398 = vrot.lane.b32.xlu1 %v382_v26, %s5480_s0  ;;  %v383_v28 = vmul.f32 %v5263_v27, %v355_v10 }
 0x275   :  { %400 = vrot.lane.b32.xlu0 %v383_v28, %s5480_s0 }
 0x2e1   :  { %v5557_v29 = vpop.permute.xlu1 %394 }
 0x2e2   :  { %v5559_v30 = vpop.permute.xlu0 %396  ;;  %4765 = vmatprep.mubr.msk.f32.mxu0 %vm402_vm1, %v5557_v29 }
 0x2e3   :  { %4766 = vmatmul.mubr.msk.f32.vlgmr.msra.gmra.mxu0 %vm402_vm1, %v5559_v30 }
 0x2e5   :  { %v5565_v31 = vpop.permute.xlu1 %398 }
 0x2e6   :  { %4768 = vmatprep.mubr.msk.f32.mxu0 %vm402_vm1, %v5565_v31 }
 0x2e7   :  { %v5569_v32 = vpop.permute.xlu0 %400 }
 0x2e8   :  { %4769 = vmatmul.mubr.msk.f32.gmra.mxu0 %vm402_vm1, %v5569_v32  ;;  %4771 = vmatprep.subr.mxu1 %v5569_v32 }
 0x2e9   :  { %4772 = vmatpush3.msra.mxu1 %v5569_v32  ;;  %4811 = vmatprep.mubr.msk.f32.mxu0 %vm66_vm0, %v520_v34 }
 0x2ea   :  { %4773 = vmatprep.subr.mxu1 %v5565_v31 }
 0x2eb   :  { %4774 = vmatpush3.msra.mxu1 %v5565_v31 }
 0x2ec   :  { %4775 = vmatprep.subr.mxu1 %v5559_v30 }
 0x2ed   :  { %4776 = vmatpush3.msra.mxu1 %v5559_v30 }
 0x2ee   :  { %4777 = vmatprep.subr.mxu1 %v5557_v29 }
 0x2ef   :  { %4778 = vmatpush3.msra.mxu1 %v5557_v29 }
 0x2f0   :  { %4780 = vmatmul.mubr.msk.f32.vlgmr.msra.gmra.mxu1 %vm66_vm0, %v5603_v35  ;;  %4835 = vmatprep.subr.mxu1 %v1007_v15 }
 0x2f1   :  { %4782 = vmatprep.mubr.msk.f32.mxu1 %vm66_vm0, %v5606_v36  ;;  %4836 = vmatpush3.msra.mxu1 %v1007_v15 }
 0x2f4   :  { %4783 = vmatmul.mubr.msk.f32.gmra.mxu1 %vm66_vm0, %v5612_v37 }
 0x2f5   :  { %4785 = vmatprep.mubr.msk.f32.mxu1 %vm66_vm0, %v5614_v38 }
 0x2f8   :  { %4786 = vmatmul.mubr.msk.f32.gmra.mxu1 %vm66_vm0, %v5620_v39 }
 0x2f9   :  { %4788 = vmatprep.mubr.msk.f32.mxu1 %vm66_vm0, %v5622_v40 }
 0x2fc   :  { %4789 = vmatmul.mubr.msk.f32.gmra.mxu1 %vm66_vm0, %v5628_v41 }
 0x2fd   :  { %4791 = vmatprep.mubr.msk.f32.mxu1 %vm66_vm0, %v5630_v42 }
 0x300   :  { %4792 = vmatmul.mubr.msk.f32.gmra.mxu1 %vm66_vm0, %v5636_v43 }
 0x301   :  { %4794 = vmatprep.mubr.msk.f32.mxu1 %vm66_vm0, %v5638_v44 }
 0x304   :  { %4795 = vmatmul.mubr.msk.f32.gmra.mxu1 %vm66_vm0, %v5644_v45 }
 0x305   :  { %4797 = vmatprep.mubr.msk.f32.mxu1 %vm66_vm0, %v5646_v46 }
 0x308   :  { %4798 = vmatmul.mubr.msk.f32.gmra.mxu1 %vm66_vm0, %v5652_v47 }
 0x309   :  { %4800 = vmatprep.mubr.msk.f32.mxu1 %vm66_vm0, %v5654_v48 }
 0x30c   :  { %4801 = vmatmul.mubr.msk.f32.gmra.mxu1 %vm66_vm0, %v5660_v49 }
 0x3a3   :  { %v4767_v51 = vpop.f32.mrf.mxu0 }
 0x3a4   :  { %v483_v52 = vadd.f32 %v4767_v51, %v4326_v50 }
 0x3a5   :  { %v477_v53 = vpop.f32.mrf.mxu0 }
 0x3a6   :  { %v497_v54 = vsub.f32 0.0, %v483_v52  ;;  %v478_v55 = vadd.f32 %v4326_v50, %v477_v53  ;;  %v886_v52 = vld [vmem:[#allocation2 + $0x450] sm:$0xff] }
 0x3a8   :  { %v502_v56 = vmul.f32 1.442695, %v497_v54  ;;  %v496_v57 = vsub.f32 0.0, %v478_v55  ;;  %v4770_v58 = vpop.f32.mrf.mxu0 }
 0x3a9   :  { %v493_v59 = vadd.f32 %v4770_v58, %v4326_v50 }
 0x3aa   :  { %5264 = vpow2.f32 %v502_v56  ;;  %v500_v60 = vmul.f32 1.442695, %v496_v57  ;;  %v487_v61 = vpop.f32.mrf.mxu0  ;;  %v889_v57 = vld [vmem:[#allocation2 + $0x468] sm:$0xff] }
 0x3ab   :  { %v499_v62 = vsub.f32 0.0, %v493_v59  ;;  %v488_v63 = vadd.f32 %v4326_v50, %v487_v61 }
 0x3ac   :  { %5266 = vpow2.f32 %v500_v60  ;;  %v888_v60 = vld [vmem:[#allocation2 + $0x460] sm:$0xff] }
 0x3ad   :  { %v506_v0 = vmul.f32 1.442695, %v499_v62  ;;  %v498_v1 = vsub.f32 0.0, %v488_v63 }
 0x3af   :  { %5268 = vpow2.f32 %v506_v0  ;;  %v504_v2 = vmul.f32 1.442695, %v498_v1  ;;  %v891_v1 = vld [vmem:[#allocation2 + $0x478] sm:$0xff] }
 0x3b1   :  { %5270 = vpow2.f32 %v504_v2 }
 0x3b7   :  { %v5265_v3 = vpop.eup %5264 }
 0x3b8   :  { %v509_v4 = vadd.f32 1.0, %v5265_v3 }
 0x3b9   :  { %v5267_v5 = vpop.eup %5266 }
 0x3ba   :  { %5272 = vrcp.f32 %v509_v4  ;;  %v508_v6 = vadd.f32 1.0, %v5267_v5  ;;  %v890_v4 = vld [vmem:[#allocation2 + $0x470] sm:$0xff] }
 0x3bc   :  { %v5269_v7 = vpop.eup %5268  ;;  %5274 = vrcp.f32 %v508_v6 }
 0x3bd   :  { %v511_v8 = vadd.f32 1.0, %v5269_v7 }
 0x3be   :  { %v5271_v9 = vpop.eup %5270 }
 0x3bf   :  { %5276 = vrcp.f32 %v511_v8  ;;  %v510_v10 = vadd.f32 1.0, %v5271_v9  ;;  %v893_v9 = vld [vmem:[#allocation2 + $0x488] sm:$0xff] }
 0x3c1   :  { %5278 = vrcp.f32 %v510_v10 }
 0x3c7   :  { %v5273_v11 = vpop.eup %5272 }
 0x3c8   :  { %4300 = vst.msk [vmem:[%s6404_s2 + $0x10] sm:$0xff] %vm910_vm2, %v5273_v11 }
 0x3c9   :  { %v5275_v12 = vpop.eup %5274 }
 0x3ca   :  { %4299 = vst.msk [vmem:[%s6404_s2 + $0x8] sm:$0xff] %vm910_vm2, %v5275_v12 }
 0x3cc   :  { %v5277_v13 = vpop.eup %5276 }
 0x3cd   :  { %4302 = vst.msk [vmem:[%s6404_s2 + $0x20] sm:$0xff] %vm910_vm2, %v5277_v13  ;;  %4803 = vmatprep.subr.mxu0 %v5277_v13 }
 0x3ce   :  { %v5279_v14 = vpop.eup %5278  ;;  %4804 = vmatpush3.msra.mxu0 %v5277_v13 }
 0x3cf   :  { %4301 = vst.msk [vmem:[%s6404_s2 + $0x18] sm:$0xff] %vm910_vm2, %v5279_v14  ;;  %4805 = vmatprep.subr.mxu0 %v5279_v14 }
 0x3d0   :  { %4806 = vmatpush3.msra.mxu0 %v5279_v14 }
 0x3d1   :  { %4807 = vmatprep.subr.mxu0 %v5273_v11 }
 0x3d2   :  { %4808 = vmatpush3.msra.mxu0 %v5273_v11 }
 0x3d3   :  { %4809 = vmatprep.subr.mxu0 %v5275_v12 }
 0x3d4   :  { %4810 = vmatpush3.msra.mxu0 %v5275_v12  ;;  %v892_v12 = vld [vmem:[#allocation2 + $0x480] sm:$0xff] }
 0x3d5   :  { %4812 = vmatmul.mubr.msk.f32.vlgmr.msra.gmra.mxu0 %vm66_vm0, %v5603_v35 }
 0x3d6   :  { %4814 = vmatprep.mubr.msk.f32.mxu0 %vm66_vm0, %v5606_v36  ;;  %v882_v36 = vld [vmem:[#allocation2 + $0x430] sm:$0xff] }
 0x3d9   :  { %4815 = vmatmul.mubr.msk.f32.gmra.mxu0 %vm66_vm0, %v5612_v37 }
 0x3da   :  { %4817 = vmatprep.mubr.msk.f32.mxu0 %vm66_vm0, %v5614_v38 }
 0x3dd   :  { %4818 = vmatmul.mubr.msk.f32.gmra.mxu0 %vm66_vm0, %v5620_v39 }
 0x3de   :  { %4820 = vmatprep.mubr.msk.f32.mxu0 %vm66_vm0, %v5622_v40 }
 0x3e1   :  { %4821 = vmatmul.mubr.msk.f32.gmra.mxu0 %vm66_vm0, %v5628_v41  ;;  %v885_v41 = vld [vmem:[#allocation2 + $0x448] sm:$0xff] }
 0x3e2   :  { %4823 = vmatprep.mubr.msk.f32.mxu0 %vm66_vm0, %v5630_v42 }
 0x3e5   :  { %4824 = vmatmul.mubr.msk.f32.gmra.mxu0 %vm66_vm0, %v5636_v43 }
 0x3e6   :  { %4826 = vmatprep.mubr.msk.f32.mxu0 %vm66_vm0, %v5638_v44  ;;  %v884_v44 = vld [vmem:[#allocation2 + $0x440] sm:$0xff] }
 0x3e9   :  { %4827 = vmatmul.mubr.msk.f32.gmra.mxu0 %vm66_vm0, %v5644_v45 }
 0x3ea   :  { %4829 = vmatprep.mubr.msk.f32.mxu0 %vm66_vm0, %v5646_v46 }
 0x3ed   :  { %4830 = vmatmul.mubr.msk.f32.gmra.mxu0 %vm66_vm0, %v5652_v47 }
 0x3ee   :  { %4832 = vmatprep.mubr.msk.f32.mxu0 %vm66_vm0, %v5654_v48 }
 0x3f1   :  { %4833 = vmatmul.mubr.msk.f32.gmra.mxu0 %vm66_vm0, %v5660_v49  ;;  %v887_v49 = vld [vmem:[#allocation2 + $0x458] sm:$0xff] }
 0x495   :  { %v4813_v17 = vpop.f32.mrf.mxu0 }
 0x496   :  { %v895_v19 = vmul.f32 %v4813_v17, %v879_v16 }
 0x497   :  { %v799_v20 = vpop.f32.mrf.mxu0 }
 0x498   :  { %v894_v22 = vmul.f32 %v878_v18, %v799_v20  ;;  %v914_v23 = vsel %vm910_vm2, %v895_v19, 0.0  ;;  %v4781_v20 = vpop.f32.mrf.mxu1 }
 0x499   :  { %915 = vadd.xlane.f32.xlu0 %v914_v23  ;;  %v4816_v24 = vpop.f32.mrf.mxu0 }
 0x49a   :  { %v897_v26 = vmul.f32 %v4816_v24, %v881_v21  ;;  %v911_v27 = vsel %vm910_vm2, %v894_v22, 0.0  ;;  %v654_v21 = vpop.f32.mrf.mxu1 }
 0x49b   :  { %912 = vadd.xlane.f32.xlu1 %v911_v27  ;;  %v809_v28 = vpop.f32.mrf.mxu0 }
 0x49c   :  { %v896_v34 = vmul.f32 %v880_v25, %v809_v28  ;;  %v920_v38 = vsel %vm910_vm2, %v897_v26, 0.0  ;;  %v4784_v22 = vpop.f32.mrf.mxu1 }
 0x49d   :  { %v4819_v35 = vpop.f32.mrf.mxu0 }
 0x49e   :  { %v899_v37 = vmul.f32 %v4819_v35, %v883_v33  ;;  %v917_v39 = vsel %vm910_vm2, %v896_v34, 0.0  ;;  %v664_v23 = vpop.f32.mrf.mxu1 }
 0x49f   :  { %921 = vadd.xlane.f32.xlu1 %v920_v38  ;;  %918 = vadd.xlane.f32.xlu0 %v917_v39  ;;  %v819_v40 = vpop.f32.mrf.mxu0 }
 0x4a0   :  { %v898_v42 = vmul.f32 %v882_v36, %v819_v40  ;;  %v926_v46 = vsel %vm910_vm2, %v899_v37, 0.0  ;;  %v4787_v24 = vpop.f32.mrf.mxu1 }
 0x4a1   :  { %v4822_v43 = vpop.f32.mrf.mxu0 }
 0x4a2   :  { %v901_v45 = vmul.f32 %v4822_v43, %v885_v41  ;;  %v923_v47 = vsel %vm910_vm2, %v898_v42, 0.0  ;;  %v674_v25 = vpop.f32.mrf.mxu1 }
 0x4a3   :  { %927 = vadd.xlane.f32.xlu1 %v926_v46  ;;  %924 = vadd.xlane.f32.xlu0 %v923_v47  ;;  %v829_v48 = vpop.f32.mrf.mxu0 }
 0x4a4   :  { %v900_v50 = vmul.f32 %v884_v44, %v829_v48  ;;  %v932_v54 = vsel %vm910_vm2, %v901_v45, 0.0  ;;  %v4790_v26 = vpop.f32.mrf.mxu1 }
 0x4a5   :  { %v4825_v51 = vpop.f32.mrf.mxu0 }
 0x4a6   :  { %v903_v53 = vmul.f32 %v4825_v51, %v887_v49  ;;  %v929_v55 = vsel %vm910_vm2, %v900_v50, 0.0  ;;  %v684_v27 = vpop.f32.mrf.mxu1 }
 0x4a7   :  { %933 = vadd.xlane.f32.xlu1 %v932_v54  ;;  %930 = vadd.xlane.f32.xlu0 %v929_v55  ;;  %v839_v56 = vpop.f32.mrf.mxu0 }
 0x4a8   :  { %v902_v58 = vmul.f32 %v886_v52, %v839_v56  ;;  %v938_v62 = vsel %vm910_vm2, %v903_v53, 0.0  ;;  %v4793_v33 = vpop.f32.mrf.mxu1 }
 0x4a9   :  { %v4828_v59 = vpop.f32.mrf.mxu0 }
 0x4aa   :  { %v905_v61 = vmul.f32 %v4828_v59, %v889_v57  ;;  %v935_v63 = vsel %vm910_vm2, %v902_v58, 0.0  ;;  %v694_v37 = vpop.f32.mrf.mxu1 }
 0x4ab   :  { %939 = vadd.xlane.f32.xlu1 %v938_v62  ;;  %936 = vadd.xlane.f32.xlu0 %v935_v63  ;;  %v849_v0 = vpop.f32.mrf.mxu0 }
 0x4ac   :  { %v904_v2 = vmul.f32 %v888_v60, %v849_v0  ;;  %v944_v6 = vsel %vm910_vm2, %v905_v61, 0.0  ;;  %v4796_v42 = vpop.f32.mrf.mxu1 }
 0x4ad   :  { %v4831_v3 = vpop.f32.mrf.mxu0 }
 0x4ae   :  { %v907_v5 = vmul.f32 %v4831_v3, %v891_v1  ;;  %v941_v7 = vsel %vm910_vm2, %v904_v2, 0.0  ;;  %v704_v47 = vpop.f32.mrf.mxu1 }
 0x4af   :  { %945 = vadd.xlane.f32.xlu1 %v944_v6  ;;  %942 = vadd.xlane.f32.xlu0 %v941_v7  ;;  %v859_v8 = vpop.f32.mrf.mxu0 }
 0x4b0   :  { %v906_v10 = vmul.f32 %v890_v4, %v859_v8  ;;  %v950_v14 = vsel %vm910_vm2, %v907_v5, 0.0  ;;  %v4799_v52 = vpop.f32.mrf.mxu1  ;;  %v975_v8 = vld [vmem:[#allocation2 + $0x150] sm:$0xff] }
 0x4b1   :  { %v4834_v11 = vpop.f32.mrf.mxu0  ;;  %4893 = vmatprep.mubr.f32.mxu0 %v975_v8  ;;  %v1000_v8 = vld [vmem:[#allocation2 + $0x218] sm:$0xff] }
 0x4b2   :  { %v909_v13 = vmul.f32 %v4834_v11, %v893_v9  ;;  %v947_v15 = vsel %vm910_vm2, %v906_v10, 0.0  ;;  %v714_v57 = vpop.f32.mrf.mxu1 }
 0x4b3   :  { %951 = vadd.xlane.f32.xlu1 %v950_v14  ;;  %948 = vadd.xlane.f32.xlu0 %v947_v15  ;;  %v869_v16 = vpop.f32.mrf.mxu0 }
 0x4b4   :  { %v908_v17 = vmul.f32 %v892_v12, %v869_v16  ;;  %v956_v18 = vsel %vm910_vm2, %v909_v13, 0.0  ;;  %v4802_v62 = vpop.f32.mrf.mxu1 }
 0x4b6   :  { %v953_v19 = vsel %vm910_vm2, %v908_v17, 0.0  ;;  %v724_v3 = vpop.f32.mrf.mxu1 }
 0x4b7   :  { %957 = vadd.xlane.f32.xlu1 %v956_v18  ;;  %954 = vadd.xlane.f32.xlu0 %v953_v19 }
 0x522   :  { %v916_v28 = vpop.xlane.xlu0 %915 }
 0x523   :  { %v960_v36 = vmul.f32 %v4781_v20, %v916_v28  ;;  %v978_v28 = vld [vmem:[#allocation2 + $0x168] sm:$0xff] }
 0x524   :  { %v913_v34 = vpop.xlane.xlu1 %912 }
 0x525   :  { %v959_v35 = vmul.f32 %v913_v34, %v654_v21  ;;  %v980_v34 = vld [vmem:[#allocation2 + $0x178] sm:$0xff] }
 0x527   :  { %4837 = vmatprep.mubr.msk.f32.mxu1 %vm402_vm1, %v959_v35  ;;  %v981_v35 = vld [vmem:[#allocation2 + $0x180] sm:$0xff] }
 0x528   :  { %4838 = vmatmul.mubr.msk.f32.vlgmr.msra.gmra.mxu1 %vm402_vm1, %v960_v36  ;;  %v922_v38 = vpop.xlane.xlu1 %921  ;;  %v919_v39 = vpop.xlane.xlu0 %918  ;;  %v982_v36 = vld [vmem:[#allocation2 + $0x188] sm:$0xff] }
 0x529   :  { %v962_v40 = vmul.f32 %v4784_v22, %v922_v38  ;;  %v961_v41 = vmul.f32 %v919_v39, %v664_v23  ;;  %v984_v38 = vld [vmem:[#allocation2 + $0x198] sm:$0xff]  ;;  %v985_v39 = vld [vmem:[#allocation2 + $0x1a0] sm:$0xff] }
 0x52b   :  { %4840 = vmatprep.mubr.msk.f32.mxu1 %vm402_vm1, %v961_v41  ;;  %v987_v41 = vld [vmem:[#allocation2 + $0x1b0] sm:$0xff] }
 0x52c   :  { %4841 = vmatmul.mubr.msk.f32.gmra.mxu1 %vm402_vm1, %v962_v40  ;;  %v928_v43 = vpop.xlane.xlu1 %927  ;;  %v925_v44 = vpop.xlane.xlu0 %924  ;;  %v986_v40 = vld [vmem:[#allocation2 + $0x1a8] sm:$0xff] }
 0x52d   :  { %v964_v45 = vmul.f32 %v4787_v24, %v928_v43  ;;  %v963_v46 = vmul.f32 %v925_v44, %v674_v25  ;;  %v991_v25 = vld [vmem:[#allocation2 + $0x1d0] sm:$0xff]  ;;  %v989_v43 = vld [vmem:[#allocation2 + $0x1c0] sm:$0xff]  ;;  %v990_v44 = vld [vmem:[#allocation2 + $0x1c8] sm:$0xff] }
 0x52f   :  { %4843 = vmatprep.mubr.msk.f32.mxu1 %vm402_vm1, %v963_v46  ;;  %v4379_v46 = vld [vmem:[#allocation2 + $0x38] ss:$0 sm:$0xff] }
 0x530   :  { %4844 = vmatmul.mubr.msk.f32.gmra.mxu1 %vm402_vm1, %v964_v45  ;;  %v934_v48 = vpop.xlane.xlu1 %933  ;;  %v931_v49 = vpop.xlane.xlu0 %930  ;;  %v4380_v45 = vld [vmem:[#allocation2 + $0x40] ss:$0 sm:$0xff] }
 0x531   :  { %v966_v50 = vmul.f32 %v4790_v26, %v934_v48  ;;  %v965_v51 = vmul.f32 %v931_v49, %v684_v27  ;;  %v976_v26 = vld [vmem:[#allocation2 + $0x158] sm:$0xff]  ;;  %v977_v27 = vld [vmem:[#allocation2 + $0x160] sm:$0xff] }
 0x533   :  { %4846 = vmatprep.mubr.msk.f32.mxu1 %vm402_vm1, %v965_v51 }
 0x534   :  { %4847 = vmatmul.mubr.msk.f32.gmra.mxu1 %vm402_vm1, %v966_v50  ;;  %v940_v53 = vpop.xlane.xlu1 %939  ;;  %v937_v54 = vpop.xlane.xlu0 %936 }
 0x535   :  { %v968_v55 = vmul.f32 %v4793_v33, %v940_v53  ;;  %v967_v56 = vmul.f32 %v937_v54, %v694_v37  ;;  %v979_v33 = vld [vmem:[#allocation2 + $0x170] sm:$0xff] }
 0x536   :  { %v983_v37 = vld [vmem:[#allocation2 + $0x190] sm:$0xff] }
 0x537   :  { %4849 = vmatprep.mubr.msk.f32.mxu1 %vm402_vm1, %v967_v56 }
 0x538   :  { %4850 = vmatmul.mubr.msk.f32.gmra.mxu1 %vm402_vm1, %v968_v55  ;;  %v946_v58 = vpop.xlane.xlu1 %945  ;;  %v943_v59 = vpop.xlane.xlu0 %942 }
 0x539   :  { %v970_v60 = vmul.f32 %v4796_v42, %v946_v58  ;;  %v969_v61 = vmul.f32 %v943_v59, %v704_v47  ;;  %v988_v42 = vld [vmem:[#allocation2 + $0x1b8] sm:$0xff]  ;;  %v4381_v47 = vld [vmem:[#allocation2 + $0x48] ss:$0 sm:$0xff] }
 0x53b   :  { %4852 = vmatprep.mubr.msk.f32.mxu1 %vm402_vm1, %v969_v61 }
 0x53c   :  { %4853 = vmatmul.mubr.msk.f32.gmra.mxu1 %vm402_vm1, %v970_v60  ;;  %v952_v63 = vpop.xlane.xlu1 %951  ;;  %v949_v0 = vpop.xlane.xlu0 %948 }
 0x53d   :  { %v972_v1 = vmul.f32 %v4799_v52, %v952_v63  ;;  %v971_v2 = vmul.f32 %v949_v0, %v714_v57  ;;  %v992_v0 = vld [vmem:[#allocation2 + $0x1d8] sm:$0xff] }
 0x53f   :  { %4855 = vmatprep.mubr.msk.f32.mxu1 %vm402_vm1, %v971_v2  ;;  %v994_v2 = vld [vmem:[#allocation2 + $0x1e8] sm:$0xff] }
 0x540   :  { %4856 = vmatmul.mubr.msk.f32.gmra.mxu1 %vm402_vm1, %v972_v1  ;;  %v958_v4 = vpop.xlane.xlu1 %957  ;;  %v955_v5 = vpop.xlane.xlu0 %954  ;;  %v993_v1 = vld [vmem:[#allocation2 + $0x1e0] sm:$0xff] }
 0x541   :  { %v974_v6 = vmul.f32 %v4802_v62, %v958_v4  ;;  %v973_v7 = vmul.f32 %v955_v5, %v724_v3  ;;  %v995_v3 = vld [vmem:[#allocation2 + $0x1f0] sm:$0xff]  ;;  %v996_v4 = vld [vmem:[#allocation2 + $0x1f8] sm:$0xff]  ;;  %v997_v5 = vld [vmem:[#allocation2 + $0x200] sm:$0xff] }
 0x543   :  { %4858 = vmatprep.mubr.msk.f32.mxu1 %vm402_vm1, %v973_v7  ;;  %v999_v7 = vld [vmem:[#allocation2 + $0x210] sm:$0xff] }
 0x544   :  { %4859 = vmatmul.mubr.msk.f32.gmra.mxu1 %vm402_vm1, %v974_v6  ;;  %v998_v6 = vld [vmem:[#allocation2 + $0x208] sm:$0xff] }
 0x545   :  { %4949 = vmatprep.mubr.f32.mxu1 %v991_v25  ;;  %v1001_v25 = vld [vmem:[#allocation2 + $0x220] sm:$0xff] }
 0x5e8   :  { %v5742_v9 = vpop.f32.mrf.mxu1 }
 0x5ea   :  { %v5744_v10 = vpop.f32.mrf.mxu1 }
 0x5ec   :  { %v5746_v11 = vpop.f32.mrf.mxu1 }
 0x5ee   :  { %v5748_v12 = vpop.f32.mrf.mxu1 }
 0x5f0   :  { %v5750_v13 = vpop.f32.mrf.mxu1 }
 0x5f2   :  { %v5752_v14 = vpop.f32.mrf.mxu1 }
 0x5f4   :  { %v5754_v15 = vpop.f32.mrf.mxu1 }
 0x5f6   :  { %v5756_v16 = vpop.f32.mrf.mxu1 }
 0x5f8   :  { %v5758_v17 = vpop.f32.mrf.mxu1 }
 0x5fa   :  { %v5760_v18 = vpop.f32.mrf.mxu1 }
 0x5fc   :  { %v5762_v19 = vpop.f32.mrf.mxu1 }
 0x5fe   :  { %v5764_v20 = vpop.f32.mrf.mxu1 }
 0x600   :  { %v5766_v21 = vpop.f32.mrf.mxu1 }
 0x602   :  { %v5768_v22 = vpop.f32.mrf.mxu1 }
 0x604   :  { %v5770_v23 = vpop.f32.mrf.mxu1 }
 0x605   :  { %1472 = vrot.lane.b32.xlu0 %v5770_v23, %s5482_s18  ;;  %4861 = vmatprep.subr.mxu0 %v5770_v23 }
 0x606   :  { %v5775_v24 = vpop.f32.mrf.mxu1  ;;  %4862 = vmatpush3.msra.mxu0 %v5770_v23 }
 0x607   :  { %1470 = vrot.lane.b32.xlu1 %v5775_v24, %s5482_s18  ;;  %4863 = vmatprep.subr.mxu0 %v5775_v24 }
 0x608   :  { %4864 = vmatpush3.msra.mxu0 %v5775_v24 }
 0x609   :  { %1466 = vrot.lane.b32.xlu0 %v5768_v22, %s5482_s18  ;;  %4865 = vmatprep.subr.mxu0 %v5766_v21 }
 0x60a   :  { %4866 = vmatpush3.msra.mxu0 %v5766_v21 }
 0x60b   :  { %1468 = vrot.lane.b32.xlu1 %v5766_v21, %s5482_s18  ;;  %4867 = vmatprep.subr.mxu0 %v5768_v22 }
 0x60c   :  { %4868 = vmatpush3.msra.mxu0 %v5768_v22 }
 0x60d   :  { %1462 = vrot.lane.b32.xlu0 %v5764_v20, %s5482_s18  ;;  %4869 = vmatprep.subr.mxu0 %v5762_v19 }
 0x60e   :  { %4870 = vmatpush3.msra.mxu0 %v5762_v19 }
 0x60f   :  { %1464 = vrot.lane.b32.xlu1 %v5762_v19, %s5482_s18  ;;  %4871 = vmatprep.subr.mxu0 %v5764_v20 }
 0x610   :  { %4872 = vmatpush3.msra.mxu0 %v5764_v20 }
 0x611   :  { %1458 = vrot.lane.b32.xlu0 %v5760_v18, %s5482_s18  ;;  %4873 = vmatprep.subr.mxu0 %v5758_v17 }
 0x612   :  { %4874 = vmatpush3.msra.mxu0 %v5758_v17 }
 0x613   :  { %1460 = vrot.lane.b32.xlu1 %v5758_v17, %s5482_s18  ;;  %4875 = vmatprep.subr.mxu0 %v5760_v18 }
 0x614   :  { %4876 = vmatpush3.msra.mxu0 %v5760_v18 }
 0x615   :  { %1454 = vrot.lane.b32.xlu0 %v5756_v16, %s5482_s18  ;;  %4877 = vmatprep.subr.mxu0 %v5754_v15 }
 0x616   :  { %4878 = vmatpush3.msra.mxu0 %v5754_v15 }
 0x617   :  { %1456 = vrot.lane.b32.xlu1 %v5754_v15, %s5482_s18  ;;  %4879 = vmatprep.subr.mxu0 %v5756_v16 }
 0x618   :  { %4880 = vmatpush3.msra.mxu0 %v5756_v16 }
 0x619   :  { %1450 = vrot.lane.b32.xlu0 %v5752_v14, %s5482_s18  ;;  %4881 = vmatprep.subr.mxu0 %v5750_v13 }
 0x61a   :  { %4882 = vmatpush3.msra.mxu0 %v5750_v13 }
 0x61b   :  { %1452 = vrot.lane.b32.xlu1 %v5750_v13, %s5482_s18  ;;  %4883 = vmatprep.subr.mxu0 %v5752_v14 }
 0x61c   :  { %4884 = vmatpush3.msra.mxu0 %v5752_v14 }
 0x61d   :  { %1446 = vrot.lane.b32.xlu0 %v5748_v12, %s5482_s18  ;;  %4885 = vmatprep.subr.mxu0 %v5746_v11 }
 0x61e   :  { %4886 = vmatpush3.msra.mxu0 %v5746_v11 }
 0x61f   :  { %1448 = vrot.lane.b32.xlu1 %v5746_v11, %s5482_s18  ;;  %4887 = vmatprep.subr.mxu0 %v5748_v12 }
 0x620   :  { %4888 = vmatpush3.msra.mxu0 %v5748_v12 }
 0x621   :  { %1442 = vrot.lane.b32.xlu0 %v5744_v10, %s5482_s18  ;;  %4889 = vmatprep.subr.mxu0 %v5742_v9 }
 0x622   :  { %4890 = vmatpush3.msra.mxu0 %v5742_v9 }
 0x623   :  { %1444 = vrot.lane.b32.xlu1 %v5742_v9, %s5482_s18  ;;  %4891 = vmatprep.subr.mxu0 %v5744_v10 }
 0x624   :  { %4892 = vmatpush3.msra.mxu0 %v5744_v10 }
 0x625   :  { %4894 = vmatmul.mubr.f32.vlgmr.msra.gmra.mxu0 %v976_v26  ;;  %1721 = vrot.lane.b32.xlu0 %v4379_v46, %s5483_s19  ;;  %v1002_v26 = vld [vmem:[#allocation2 + $0x228] sm:$0xff] }
 0x626   :  { %4896 = vmatprep.mubr.f32.mxu0 %v977_v27  ;;  %v1003_v27 = vld [vmem:[#allocation2 + $0x230] sm:$0xff] }
 0x627   :  { %1746 = vrot.lane.b32.xlu1 %v4380_v45, %s5483_s19 }
 0x629   :  { %4897 = vmatmul.mubr.f32.gmra.mxu0 %v978_v28  ;;  %1771 = vrot.lane.b32.xlu0 %v4381_v47, %s5483_s19  ;;  %v1004_v28 = vld [vmem:[#allocation2 + $0x238] sm:$0xff] }
 0x62a   :  { %4899 = vmatprep.mubr.f32.mxu0 %v979_v33  ;;  %v1005_v33 = vld [vmem:[#allocation2 + $0x240] sm:$0xff] }
 0x62d   :  { %4900 = vmatmul.mubr.f32.gmra.mxu0 %v980_v34  ;;  %v1006_v34 = vld [vmem:[#allocation2 + $0x248] sm:$0xff] }
 0x62e   :  { %4902 = vmatprep.mubr.f32.mxu0 %v981_v35 }
 0x631   :  { %4903 = vmatmul.mubr.f32.gmra.mxu0 %v982_v36 }
 0x632   :  { %4905 = vmatprep.mubr.f32.mxu0 %v983_v37 }
 0x635   :  { %4906 = vmatmul.mubr.f32.gmra.mxu0 %v984_v38 }
 0x636   :  { %4908 = vmatprep.mubr.f32.mxu0 %v985_v39 }
 0x639   :  { %4909 = vmatmul.mubr.f32.gmra.mxu0 %v986_v40 }
 0x63a   :  { %4911 = vmatprep.mubr.f32.mxu0 %v987_v41 }
 0x63d   :  { %4912 = vmatmul.mubr.f32.gmra.mxu0 %v988_v42 }
 0x63e   :  { %4914 = vmatprep.mubr.f32.mxu0 %v989_v43 }
 0x641   :  { %4915 = vmatmul.mubr.f32.gmra.mxu0 %v990_v44 }
 0x677   :  { %v1473_v48 = vpop.permute.xlu0 %1472 }
 0x678   :  { %4917 = vmatprep.subr.mxu1 %v1473_v48 }
 0x679   :  { %4918 = vmatpush3.msra.mxu1 %v1473_v48  ;;  %v1471_v49 = vpop.permute.xlu1 %1470 }
 0x67a   :  { %4919 = vmatprep.subr.mxu1 %v1471_v49 }
 0x67b   :  { %v1467_v50 = vpop.permute.xlu0 %1466  ;;  %4920 = vmatpush3.msra.mxu1 %v1471_v49 }
 0x67d   :  { %v1469_v51 = vpop.permute.xlu1 %1468 }
 0x67e   :  { %4921 = vmatprep.subr.mxu1 %v1469_v51 }
 0x67f   :  { %v1463_v52 = vpop.permute.xlu0 %1462  ;;  %4922 = vmatpush3.msra.mxu1 %v1469_v51 }
 0x680   :  { %4923 = vmatprep.subr.mxu1 %v1467_v50 }
 0x681   :  { %4924 = vmatpush3.msra.mxu1 %v1467_v50  ;;  %v1465_v53 = vpop.permute.xlu1 %1464 }
 0x682   :  { %4925 = vmatprep.subr.mxu1 %v1465_v53 }
 0x683   :  { %v1459_v54 = vpop.permute.xlu0 %1458  ;;  %4926 = vmatpush3.msra.mxu1 %v1465_v53 }
 0x684   :  { %4927 = vmatprep.subr.mxu1 %v1463_v52 }
 0x685   :  { %4928 = vmatpush3.msra.mxu1 %v1463_v52  ;;  %v1461_v55 = vpop.permute.xlu1 %1460 }
 0x686   :  { %4929 = vmatprep.subr.mxu1 %v1461_v55 }
 0x687   :  { %v1455_v56 = vpop.permute.xlu0 %1454  ;;  %4930 = vmatpush3.msra.mxu1 %v1461_v55 }
 0x688   :  { %4931 = vmatprep.subr.mxu1 %v1459_v54 }
 0x689   :  { %4932 = vmatpush3.msra.mxu1 %v1459_v54  ;;  %v1457_v57 = vpop.permute.xlu1 %1456 }
 0x68a   :  { %4933 = vmatprep.subr.mxu1 %v1457_v57 }
 0x68b   :  { %v1451_v58 = vpop.permute.xlu0 %1450  ;;  %4934 = vmatpush3.msra.mxu1 %v1457_v57 }
 0x68c   :  { %4935 = vmatprep.subr.mxu1 %v1455_v56 }
 0x68d   :  { %4936 = vmatpush3.msra.mxu1 %v1455_v56  ;;  %v1453_v59 = vpop.permute.xlu1 %1452 }
 0x68e   :  { %4937 = vmatprep.subr.mxu1 %v1453_v59 }
 0x68f   :  { %4938 = vmatpush3.msra.mxu1 %v1453_v59  ;;  %v1447_v60 = vpop.permute.xlu0 %1446 }
 0x690   :  { %4939 = vmatprep.subr.mxu1 %v1451_v58 }
 0x691   :  { %4940 = vmatpush3.msra.mxu1 %v1451_v58  ;;  %v1449_v61 = vpop.permute.xlu1 %1448 }
 0x692   :  { %4941 = vmatprep.subr.mxu1 %v1449_v61 }
 0x693   :  { %4942 = vmatpush3.msra.mxu1 %v1449_v61  ;;  %v1443_v63 = vpop.permute.xlu0 %1442 }
 0x694   :  { %4943 = vmatprep.subr.mxu1 %v1447_v60 }
 0x695   :  { %4944 = vmatpush3.msra.mxu1 %v1447_v60  ;;  %v1445_v62 = vpop.permute.xlu1 %1444 }
 0x696   :  { %4945 = vmatprep.subr.mxu1 %v1445_v62 }
 0x697   :  { %4946 = vmatpush3.msra.mxu1 %v1445_v62 }
 0x698   :  { %4947 = vmatprep.subr.mxu1 %v1443_v63 }
 0x699   :  { %4948 = vmatpush3.msra.mxu1 %v1443_v63 }
 0x69a   :  { %4950 = vmatmul.mubr.f32.vlgmr.msra.gmra.mxu1 %v992_v0 }
 0x69b   :  { %4952 = vmatprep.mubr.f32.mxu1 %v993_v1 }
 0x69e   :  { %4953 = vmatmul.mubr.f32.gmra.mxu1 %v994_v2 }
 0x69f   :  { %4955 = vmatprep.mubr.f32.mxu1 %v995_v3  ;;  %v5873_v3 = vpop.permute.xlu1 %1746 }
 0x6a2   :  { %4956 = vmatmul.mubr.f32.gmra.mxu1 %v996_v4  ;;  %v5875_v4 = vpop.permute.xlu0 %1721 }
 0x6a3   :  { %4958 = vmatprep.mubr.f32.mxu1 %v997_v5 }
 0x6a6   :  { %4959 = vmatmul.mubr.f32.gmra.mxu1 %v998_v6  ;;  %v5877_v6 = vpop.permute.xlu0 %1771 }
 0x6a7   :  { %4961 = vmatprep.mubr.f32.mxu1 %v999_v7 }
 0x6aa   :  { %4962 = vmatmul.mubr.f32.gmra.mxu1 %v1000_v8 }
 0x6ab   :  { %4964 = vmatprep.mubr.f32.mxu1 %v1001_v25 }
 0x6ae   :  { %4965 = vmatmul.mubr.f32.gmra.mxu1 %v1002_v26 }
 0x6af   :  { %4967 = vmatprep.mubr.f32.mxu1 %v1003_v27 }
 0x6b2   :  { %4968 = vmatmul.mubr.f32.gmra.mxu1 %v1004_v28 }
 0x6b3   :  { %4970 = vmatprep.mubr.f32.mxu1 %v1005_v33 }
 0x6b6   :  { %4971 = vmatmul.mubr.f32.gmra.mxu1 %v1006_v34 }
 0x6e5   :  { %v4895_v35 = vpop.f32.mrf.mxu0 }
 0x6e7   :  { %v1267_v36 = vpop.f32.mrf.mxu0 }
 0x6e9   :  { %v4898_v37 = vpop.f32.mrf.mxu0 }
 0x6eb   :  { %v1277_v38 = vpop.f32.mrf.mxu0 }
 0x6ed   :  { %v4901_v39 = vpop.f32.mrf.mxu0 }
 0x6ef   :  { %v1287_v40 = vpop.f32.mrf.mxu0 }
 0x6f1   :  { %v4904_v41 = vpop.f32.mrf.mxu0 }
 0x6f2   :  { %1376 = vrot.lane.b32.xlu1 %v4904_v41, %s5483_s19 }
 0x6f3   :  { %v1297_v42 = vpop.f32.mrf.mxu0 }
 0x6f5   :  { %v4907_v43 = vpop.f32.mrf.mxu0 }
 0x6f6   :  { %1374 = vrot.lane.b32.xlu1 %v1297_v42, %s5483_s19 }
 0x6f7   :  { %v1307_v44 = vpop.f32.mrf.mxu0 }
 0x6f9   :  { %v4910_v45 = vpop.f32.mrf.mxu0 }
 0x6fa   :  { %1380 = vrot.lane.b32.xlu1 %v4907_v43, %s5483_s19  ;;  %1384 = vrot.lane.b32.xlu0 %v4910_v45, %s5483_s19 }
 0x6fb   :  { %v1317_v46 = vpop.f32.mrf.mxu0 }
 0x6fd   :  { %v4913_v47 = vpop.f32.mrf.mxu0 }
 0x6fe   :  { %1378 = vrot.lane.b32.xlu1 %v1307_v44, %s5483_s19  ;;  %1388 = vrot.lane.b32.xlu0 %v4913_v47, %s5483_s19 }
 0x6ff   :  { %v1327_v48 = vpop.f32.mrf.mxu0 }
 0x701   :  { %v4916_v49 = vpop.f32.mrf.mxu0 }
 0x702   :  { %1382 = vrot.lane.b32.xlu1 %v1317_v46, %s5483_s19 }
 0x703   :  { %v1337_v50 = vpop.f32.mrf.mxu0 }
 0x704   :  { %1390 = vrot.lane.b32.xlu0 %v1337_v50, %s5483_s19 }
 0x706   :  { %1386 = vrot.lane.b32.xlu1 %v1327_v48, %s5483_s19 }
 0x70a   :  { %1392 = vrot.lane.b32.xlu1 %v4916_v49, %s5483_s19 }
 0x75a   :  { %v4951_v51 = vpop.f32.mrf.mxu1 }
 0x75c   :  { %v1556_v52 = vpop.f32.mrf.mxu1 }
 0x75e   :  { %v4954_v53 = vpop.f32.mrf.mxu1 }
 0x760   :  { %v1566_v54 = vpop.f32.mrf.mxu1 }
 0x762   :  { %v4957_v55 = vpop.f32.mrf.mxu1 }
 0x764   :  { %v1576_v56 = vpop.f32.mrf.mxu1  ;;  %v1377_v5 = vpop.permute.xlu1 %1376 }
 0x765   :  { %v1417_v46 = vadd.f32 %v5754_v15, %v1377_v5 }
 0x766   :  { %v4960_v57 = vpop.f32.mrf.mxu1 }
 0x767   :  { %1665 = vrot.lane.b32.xlu0 %v4960_v57, %s5483_s19 }
 0x768   :  { %v1586_v58 = vpop.f32.mrf.mxu1  ;;  %v1375_v7 = vpop.permute.xlu1 %1374 }
 0x76a   :  { %v4963_v59 = vpop.f32.mrf.mxu1 }
 0x76b   :  { %1669 = vrot.lane.b32.xlu0 %v4963_v59, %s5483_s19 }
 0x76c   :  { %v1596_v60 = vpop.f32.mrf.mxu1  ;;  %v1381_v8 = vpop.permute.xlu1 %1380 }
 0x76d   :  { %v1385_v25 = vpop.permute.xlu0 %1384 }
 0x76e   :  { %v4966_v61 = vpop.f32.mrf.mxu1  ;;  %v1421_v41 = vadd.f32 %v5762_v19, %v1385_v25 }
 0x76f   :  { %1667 = vrot.lane.b32.xlu0 %v1596_v60, %s5483_s19 }
 0x770   :  { %v1606_v62 = vpop.f32.mrf.mxu1  ;;  %v1379_v26 = vpop.permute.xlu1 %1378 }
 0x771   :  { %v1389_v27 = vpop.permute.xlu0 %1388 }
 0x772   :  { %v4969_v63 = vpop.f32.mrf.mxu1  ;;  %v1423_v15 = vadd.f32 %v5766_v21, %v1389_v27 }
 0x773   :  { %1673 = vrot.lane.b32.xlu0 %v4966_v61, %s5483_s19 }
 0x774   :  { %v1616_v0 = vpop.f32.mrf.mxu1  ;;  %v1383_v33 = vpop.permute.xlu1 %1382 }
 0x775   :  { %1675 = vrot.lane.b32.xlu1 %v1616_v0, %s5483_s19  ;;  %v1420_v48 = vadd.f32 %v1383_v33, %v5764_v20 }
 0x776   :  { %v4972_v1 = vpop.f32.mrf.mxu1  ;;  %v1391_v28 = vpop.permute.xlu0 %1390 }
 0x777   :  { %1671 = vrot.lane.b32.xlu0 %v1606_v62, %s5483_s19  ;;  %v1424_v60 = vadd.f32 %v1391_v28, %v5775_v24 }
 0x778   :  { %v1626_v2 = vpop.f32.mrf.mxu1 }
 0x779   :  { %1681 = vrot.lane.b32.xlu1 %v4972_v1, %s5483_s19 }
 0x77b   :  { %1677 = vrot.lane.b32.xlu0 %v4969_v63, %s5483_s19 }
 0x77d   :  { %1679 = vrot.lane.b32.xlu1 %v1626_v2, %s5483_s19  ;;  %v1416_v2 = vadd.f32 %v1375_v7, %v5756_v16 }
 0x77f   :  { %1663 = vrot.lane.b32.xlu0 %v1586_v58, %s5483_s19 }
 0x781   :  { %1372 = vrot.lane.b32.xlu1 %v4901_v39, %s5483_s19 }
 0x783   :  { %1661 = vrot.lane.b32.xlu0 %v4957_v55, %s5483_s19 }
 0x785   :  { %1370 = vrot.lane.b32.xlu1 %v1287_v40, %s5483_s19 }
 0x787   :  { %1659 = vrot.lane.b32.xlu0 %v1576_v56, %s5483_s19 }
 0x789   :  { %1368 = vrot.lane.b32.xlu1 %v4898_v37, %s5483_s19 }
 0x78b   :  { %1657 = vrot.lane.b32.xlu0 %v4954_v53, %s5483_s19 }
 0x78d   :  { %1366 = vrot.lane.b32.xlu1 %v1277_v38, %s5483_s19 }
 0x78f   :  { %1655 = vrot.lane.b32.xlu0 %v1566_v54, %s5483_s19 }
 0x791   :  { %1364 = vrot.lane.b32.xlu1 %v4895_v35, %s5483_s19  ;;  %v1387_v35 = vpop.permute.xlu1 %1386 }
 0x792   :  { %v1422_v44 = vadd.f32 %v1387_v35, %v5768_v22 }
 0x793   :  { %1653 = vrot.lane.b32.xlu0 %v4951_v51, %s5483_s19 }
 0x795   :  { %1362 = vrot.lane.b32.xlu1 %v1267_v36, %s5483_s19  ;;  %v1419_v36 = vadd.f32 %v5758_v17, %v1381_v8  ;;  %v1393_v40 = vpop.permute.xlu1 %1392  ;;  %v1418_v17 = vadd.f32 %v1379_v26, %v5760_v18 }
 0x796   :  { %v1425_v53 = vadd.f32 %v5770_v23, %v1393_v40 }
 0x799   :  { %1651 = vrot.lane.b32.xlu1 %v1556_v52, %s5483_s19 }
 0x7d9   :  { %v1666_v34 = vpop.permute.xlu0 %1665 }
 0x7da   :  { %v1706_v51 = vadd.f32 %v1666_v34, %v1417_v46 }
 0x7dc   :  { %v1731_v23 = vadd.f32 %v5875_v4, %v1706_v51 }
 0x7dd   :  { %v1670_v37 = vpop.permute.xlu0 %1669 }
 0x7de   :  { %v1708_v38 = vadd.f32 %v1670_v37, %v1419_v36  ;;  %v1756_v33 = vmul.f32 %v5873_v3, %v1731_v23 }
 0x7e0   :  { %v1733_v42 = vadd.f32 %v5875_v4, %v1708_v38  ;;  %v5928_v46 = vadd.f32 %v5877_v6, %v1756_v33 }
 0x7e1   :  { %v1668_v39 = vpop.permute.xlu0 %1667 }
 0x7e2   :  { %v1758_v52 = vmul.f32 %v5873_v3, %v1733_v42  ;;  %v1707_v56 = vadd.f32 %v1668_v39, %v1418_v17 }
 0x7e4   :  { %v5900_v62 = vadd.f32 %v5877_v6, %v1758_v52  ;;  %v1732_v5 = vadd.f32 %v5875_v4, %v1707_v56 }
 0x7e5   :  { %v1674_v43 = vpop.permute.xlu0 %1673 }
 0x7e6   :  { %v1710_v45 = vadd.f32 %v1674_v43, %v1421_v41  ;;  %v1799_v16 = vsub.f32 0.0, %v5900_v62  ;;  %v1757_v39 = vmul.f32 %v5873_v3, %v1732_v5 }
 0x7e7   :  { %v1676_v47 = vpop.permute.xlu1 %1675 }
 0x7e8   :  { %v1735_v49 = vadd.f32 %v5875_v4, %v1710_v45  ;;  %v1711_v50 = vadd.f32 %v1676_v47, %v1422_v44 }
 0x7e9   :  { %v1672_v19 = vpop.permute.xlu0 %1671 }
 0x7ea   :  { %v1760_v54 = vmul.f32 %v5873_v3, %v1735_v49  ;;  %v1736_v22 = vadd.f32 %v5875_v4, %v1711_v50  ;;  %v1709_v55 = vadd.f32 %v1672_v19, %v1420_v48  ;;  %v1824_v19 = vmul.f32 1.442695, %v1799_v16 }
 0x7eb   :  { %v1682_v20 = vpop.permute.xlu1 %1681 }
 0x7ec   :  { %v1761_v57 = vmul.f32 %v5873_v3, %v1736_v22  ;;  %v1734_v58 = vadd.f32 %v5875_v4, %v1709_v55  ;;  %v1714_v18 = vadd.f32 %v1682_v20, %v1425_v53  ;;  %v5895_v59 = vadd.f32 %v5877_v6, %v1760_v54 }
 0x7ed   :  { %v1678_v61 = vpop.permute.xlu0 %1677  ;;  %v5941_v22 = vadd.f32 %v5877_v6, %v1757_v39  ;;  %v1797_v20 = vsub.f32 0.0, %v5928_v46 }
 0x7ee   :  { %v1759_v21 = vmul.f32 %v5873_v3, %v1734_v58  ;;  %v1739_v63 = vadd.f32 %v5875_v4, %v1714_v18  ;;  %v1712_v0 = vadd.f32 %v1678_v61, %v1423_v15  ;;  %v5905_v1 = vadd.f32 %v5877_v6, %v1761_v57 }
 0x7ef   :  { %v1680_v8 = vpop.permute.xlu1 %1679  ;;  %v1801_v24 = vsub.f32 0.0, %v5895_v59 }
 0x7f0   :  { %v1764_v25 = vmul.f32 %v5873_v3, %v1739_v63  ;;  %v1737_v26 = vadd.f32 %v5875_v4, %v1712_v0  ;;  %v1713_v27 = vadd.f32 %v1680_v8, %v1424_v60  ;;  %v1802_v28 = vsub.f32 0.0, %v5905_v1 }
 0x7f1   :  { %v1664_v34 = vpop.permute.xlu0 %1663  ;;  %v5915_v35 = vadd.f32 %v5877_v6, %v1759_v21  ;;  %v1828_v41 = vmul.f32 1.442695, %v1801_v24  ;;  %v1820_v8 = vmul.f32 1.442695, %v1797_v20 }
 0x7f2   :  { %v1762_v7 = vmul.f32 %v5873_v3, %v1737_v26  ;;  %v1738_v37 = vadd.f32 %v5875_v4, %v1713_v27  ;;  %v1705_v36 = vadd.f32 %v1664_v34, %v1416_v2  ;;  %v5921_v38 = vadd.f32 %v5877_v6, %v1764_v25 }
 0x7f3   :  { %v1373_v40 = vpop.permute.xlu1 %1372  ;;  %v1830_v45 = vmul.f32 1.442695, %v1802_v28  ;;  %v1800_v50 = vsub.f32 0.0, %v5915_v35  ;;  %5280 = vpow2.f32 %v1828_v41 }
 0x7f4   :  { %v1763_v42 = vmul.f32 %v5873_v3, %v1738_v37  ;;  %v1730_v43 = vadd.f32 %v5875_v4, %v1705_v36  ;;  %v1415_v44 = vadd.f32 %v5750_v13, %v1373_v40  ;;  %v1805_v48 = vsub.f32 0.0, %v5921_v38 }
 0x7f5   :  { %v1662_v47 = vpop.permute.xlu0 %1661  ;;  %v5932_v49 = vadd.f32 %v5877_v6, %v1762_v7  ;;  %5282 = vpow2.f32 %v1830_v45  ;;  %v1826_v18 = vmul.f32 1.442695, %v1800_v50 }
 0x7f6   :  { %v1755_v17 = vmul.f32 %v5873_v3, %v1730_v43  ;;  %v1704_v51 = vadd.f32 %v1662_v47, %v1415_v44  ;;  %v5937_v52 = vadd.f32 %v5877_v6, %v1763_v42  ;;  %v1836_v53 = vmul.f32 1.442695, %v1805_v48 }
 0x7f7   :  { %v1371_v13 = vpop.permute.xlu1 %1370  ;;  %v1803_v54 = vsub.f32 0.0, %v5932_v49 }
 0x7f8   :  { %v1729_v55 = vadd.f32 %v5875_v4, %v1704_v51  ;;  %v1414_v15 = vadd.f32 %v1371_v13, %v5752_v14  ;;  %v1804_v56 = vsub.f32 0.0, %v5937_v52  ;;  %5284 = vpow2.f32 %v1836_v53 }
 0x7f9   :  { %v1660_v57 = vpop.permute.xlu0 %1659  ;;  %v1832_v58 = vmul.f32 1.442695, %v1803_v54  ;;  %v5948_v60 = vadd.f32 %v5877_v6, %v1755_v17  ;;  %v1798_v14 = vsub.f32 0.0, %v5941_v22 }
 0x7fa   :  { %v1754_v23 = vmul.f32 %v5873_v3, %v1729_v55  ;;  %v1703_v61 = vadd.f32 %v1660_v57, %v1414_v15  ;;  %v1834_v21 = vmul.f32 1.442695, %v1804_v56 }
 0x7fb   :  { %v1369_v63 = vpop.permute.xlu1 %1368  ;;  %5286 = vpow2.f32 %v1832_v58  ;;  %v1796_v25 = vsub.f32 0.0, %v5948_v60  ;;  %v1822_v34 = vmul.f32 1.442695, %v1798_v14 }
 0x7fc   :  { %v5953_v0 = vadd.f32 %v5877_v6, %v1754_v23  ;;  %v1728_v2 = vadd.f32 %v5875_v4, %v1703_v61  ;;  %v1413_v5 = vadd.f32 %v5746_v11, %v1369_v63  ;;  %5288 = vpow2.f32 %v1824_v19 }
 0x7fd   :  { %v1658_v24 = vpop.permute.xlu0 %1657  ;;  %5290 = vpow2.f32 %v1834_v21  ;;  %v1818_v36 = vmul.f32 1.442695, %v1796_v25 }
 0x7fe   :  { %v1753_v26 = vmul.f32 %v5873_v3, %v1728_v2  ;;  %v1702_v27 = vadd.f32 %v1658_v24, %v1413_v5  ;;  %5292 = vpow2.f32 %v1826_v18  ;;  %v1795_v28 = vsub.f32 0.0, %v5953_v0 }
 0x7ff   :  { %v1367_v33 = vpop.permute.xlu1 %1366  ;;  %5294 = vpow2.f32 %v1820_v8 }
 0x800   :  { %v5961_v16 = vadd.f32 %v5877_v6, %v1753_v26  ;;  %v1727_v7 = vadd.f32 %v5875_v4, %v1702_v27  ;;  %v1412_v11 = vadd.f32 %v1367_v33, %v5748_v12  ;;  %v1816_v42 = vmul.f32 1.442695, %v1795_v28  ;;  %v5281_v44 = vpop.eup %5280 }
 0x801   :  { %v1656_v37 = vpop.permute.xlu0 %1655  ;;  %5296 = vpow2.f32 %v1822_v34  ;;  %v1849_v15 = vadd.f32 1.0, %v5281_v44 }
 0x802   :  { %v1794_v39 = vsub.f32 0.0, %v5961_v16  ;;  %v1752_v40 = vmul.f32 %v5873_v3, %v1727_v7  ;;  %v1701_v41 = vadd.f32 %v1656_v37, %v1412_v11  ;;  %v5283_v50 = vpop.eup %5282  ;;  %5298 = vpow2.f32 %v1818_v36 }
 0x803   :  { %v1365_v43 = vpop.permute.xlu1 %1364  ;;  %5300 = vpow2.f32 %v1816_v42  ;;  %v1850_v23 = vadd.f32 1.0, %v5283_v50 }
 0x804   :  { %v1814_v45 = vmul.f32 1.442695, %v1794_v39  ;;  %v5968_v47 = vadd.f32 %v5877_v6, %v1752_v40  ;;  %v1726_v48 = vadd.f32 %v5875_v4, %v1701_v41  ;;  %v1411_v12 = vadd.f32 %v5742_v9, %v1365_v43 }
 0x805   :  { %v1654_v17 = vpop.permute.xlu0 %1653  ;;  %v5285_v51 = vpop.eup %5284 }
 0x806   :  { %v1793_v19 = vsub.f32 0.0, %v5968_v47  ;;  %v1751_v13 = vmul.f32 %v5873_v3, %v1726_v48  ;;  %v1700_v53 = vadd.f32 %v1654_v17, %v1411_v12  ;;  %v1853_v55 = vadd.f32 1.0, %v5285_v51 }
 0x807   :  { %v1363_v54 = vpop.permute.xlu1 %1362  ;;  %5302 = vpow2.f32 %v1814_v45 }
 0x808   :  { %v5287_v56 = vpop.eup %5286  ;;  %v1812_v20 = vmul.f32 1.442695, %v1793_v19  ;;  %v5975_v57 = vadd.f32 %v5877_v6, %v1751_v13  ;;  %v1725_v9 = vadd.f32 %v5875_v4, %v1700_v53  ;;  %5304 = vrcp.f32 %v1853_v55 }
 0x809   :  { %v5289_v58 = vpop.eup %5288  ;;  %v1851_v18 = vadd.f32 1.0, %v5287_v56  ;;  %v1410_v14 = vadd.f32 %v1363_v54, %v5744_v10 }
 0x80a   :  { %v5291_v61 = vpop.eup %5290  ;;  %5306 = vpow2.f32 %v1812_v20  ;;  %v1792_v21 = vsub.f32 0.0, %v5975_v57  ;;  %v1750_v63 = vmul.f32 %v5873_v3, %v1725_v9  ;;  %v1847_v27 = vadd.f32 1.0, %v5289_v58 }
 0x80b   :  { %v5293_v2 = vpop.eup %5292  ;;  %v1652_v5 = vpop.permute.xlu1 %1651  ;;  %v1852_v8 = vadd.f32 1.0, %v5291_v61  ;;  %5308 = vrcp.f32 %v1851_v18 }
 0x80c   :  { %v1810_v24 = vmul.f32 1.442695, %v1792_v21  ;;  %v5982_v25 = vadd.f32 %v5877_v6, %v1750_v63  ;;  %v1699_v26 = vadd.f32 %v1652_v5, %v1410_v14  ;;  %5310 = vrcp.f32 %v1849_v15  ;;  %v5295_v28 = vpop.eup %5294 }
 0x80d   :  { %5312 = vrcp.f32 %v1852_v8  ;;  %v1848_v7 = vadd.f32 1.0, %v5293_v2  ;;  %v1845_v36 = vadd.f32 1.0, %v5295_v28 }
 0x80e   :  { %v1791_v33 = vsub.f32 0.0, %v5982_v25  ;;  %v1724_v34 = vadd.f32 %v5875_v4, %v1699_v26  ;;  %5314 = vrcp.f32 %v1850_v23  ;;  %v5297_v10 = vpop.eup %5296  ;;  %v1902_v26 = vld [vmem:[#allocation2 + $0x2f0] sm:$0xff] }
 0x80f   :  { %5316 = vpow2.f32 %v1810_v24  ;;  %v5299_v40 = vpop.eup %5298  ;;  %v1846_v41 = vadd.f32 1.0, %v5297_v10  ;;  %5005 = vmatprep.mubr.f32.mxu0 %v1902_v26 }
 0x810   :  { %v1808_v11 = vmul.f32 1.442695, %v1791_v33  ;;  %v1749_v37 = vmul.f32 %v5873_v3, %v1724_v34  ;;  %5318 = vrcp.f32 %v1847_v27  ;;  %v5301_v42 = vpop.eup %5300  ;;  %v1844_v45 = vadd.f32 1.0, %v5299_v40 }
 0x811   :  { %5320 = vrcp.f32 %v1848_v7  ;;  %v1843_v50 = vadd.f32 1.0, %v5301_v42 }
 0x812   :  { %v5988_v39 = vadd.f32 %v5877_v6, %v1749_v37  ;;  %5322 = vpow2.f32 %v1808_v11 }
 0x813   :  { %5324 = vrcp.f32 %v1845_v36 }
 0x814   :  { %v1790_v43 = vsub.f32 0.0, %v5988_v39  ;;  %v5303_v4 = vpop.eup %5302  ;;  %5326 = vrcp.f32 %v1846_v41 }
 0x815   :  { %v5305_v44 = vpop.eup %5304  ;;  %v1842_v19 = vadd.f32 1.0, %v5303_v4 }
 0x816   :  { %v1806_v48 = vmul.f32 1.442695, %v1790_v43  ;;  %v1901_v3 = vmul.f32 %v5305_v44, %v5921_v38 }
 0x817   :  { %v5307_v12 = vpop.eup %5306 }
 0x818   :  { %v5309_v17 = vpop.eup %5308  ;;  %5328 = vpow2.f32 %v1806_v48  ;;  %1956 = vrot.lane.b32.xlu0 %v1901_v3, %s5479_s23  ;;  %v1841_v53 = vadd.f32 1.0, %v5307_v12  ;;  %v1903_v48 = vld [vmem:[#allocation2 + $0x2f8] sm:$0xff]  ;;  %v2081_v3 = vld [vmem:[#allocation2 + $0x340] sm:$0xff] }
 0x819   :  { %v5311_v6 = vpop.eup %5310  ;;  %5330 = vrcp.f32 %v1844_v45  ;;  %v1899_v55 = vmul.f32 %v5309_v17, %v5932_v49  ;;  %v2080_v12 = vld [vmem:[#allocation2 + $0x338] sm:$0xff] }
 0x81a   :  { %v5313_v51 = vpop.eup %5312  ;;  %5332 = vrcp.f32 %v1843_v50  ;;  %v1897_v58 = vmul.f32 %v5311_v6, %v5895_v59  ;;  %v1904_v50 = vld [vmem:[#allocation2 + $0x300] sm:$0xff]  ;;  %v2217_v17 = vld [vmem:[#allocation2 + $0x58] sm:$0xff]  ;;  %v1905_v6 = vld [vmem:[#allocation2 + $0x308] sm:$0xff] }
 0x81b   :  { %v5315_v13 = vpop.eup %5314  ;;  %v1900_v54 = vmul.f32 %v5313_v51, %v5937_v52  ;;  %5334 = vrcp.f32 %v1842_v19  ;;  %v2082_v51 = vld [vmem:[#allocation2 + $0x348] sm:$0xff]  ;;  %v1906_v19 = vld [vmem:[#allocation2 + $0x310] sm:$0xff] }
 0x81c   :  { %v5317_v15 = vpop.eup %5316  ;;  %1952 = vrot.lane.b32.xlu0 %v1899_v55, %s5479_s23  ;;  %5336 = vrcp.f32 %v1841_v53  ;;  %v1898_v9 = vmul.f32 %v5315_v13, %v5905_v1  ;;  %v2083_v13 = vld [vmem:[#allocation2 + $0x350] sm:$0xff]  ;;  %v1907_v53 = vld [vmem:[#allocation2 + $0x318] sm:$0xff]  ;;  %v1908_v55 = vld [vmem:[#allocation2 + $0x320] sm:$0xff] }
 0x81d   :  { %1954 = vrot.lane.b32.xlu1 %v1900_v54, %s5479_s23  ;;  %v5319_v38 = vpop.eup %5318  ;;  %v1840_v56 = vadd.f32 1.0, %v5317_v15  ;;  %v2084_v54 = vld [vmem:[#allocation2 + $0x358] sm:$0xff]  ;;  %v2085_v15 = vld [vmem:[#allocation2 + $0x360] sm:$0xff] }
 0x81e   :  { %v5321_v20 = vpop.eup %5320  ;;  %v1895_v61 = vmul.f32 %v5319_v38, %v5900_v62  ;;  %v1909_v38 = vld [vmem:[#allocation2 + $0x328] sm:$0xff] }
 0x81f   :  { %v5323_v18 = vpop.eup %5322  ;;  %5338 = vrcp.f32 %v1840_v56  ;;  %v1896_v52 = vmul.f32 %v5321_v20, %v5915_v35  ;;  %v2086_v56 = vld [vmem:[#allocation2 + $0x368] sm:$0xff]  ;;  %v2216_v20 = vld [vmem:[#allocation2 + $0x50] sm:$0xff] }
 0x820   :  { %v1839_v23 = vadd.f32 1.0, %v5323_v18  ;;  %1948 = vrot.lane.b32.xlu0 %v1897_v58, %s5479_s23  ;;  %v5325_v49 = vpop.eup %5324 }
 0x821   :  { %1950 = vrot.lane.b32.xlu1 %v1898_v9, %s5479_s23  ;;  %v5327_v21 = vpop.eup %5326  ;;  %v1893_v2 = vmul.f32 %v5325_v49, %v5928_v46 }
 0x822   :  { %5340 = vrcp.f32 %v1839_v23  ;;  %v1894_v14 = vmul.f32 %v5327_v21, %v5941_v22  ;;  %v2079_v22 = vld [vmem:[#allocation2 + $0x330] sm:$0xff] }
 0x823   :  { %5049 = vmatprep.mubr.f32.mxu1 %v2079_v22 }
 0x824   :  { %1944 = vrot.lane.b32.xlu0 %v1895_v61, %s5479_s23 }
 0x825   :  { %v5329_v63 = vpop.eup %5328  ;;  %1946 = vrot.lane.b32.xlu1 %v1896_v52, %s5479_s23 }
 0x826   :  { %v1838_v59 = vadd.f32 1.0, %v5329_v63  ;;  %v5331_v1 = vpop.eup %5330 }
 0x827   :  { %v5333_v5 = vpop.eup %5332  ;;  %v1892_v62 = vmul.f32 %v5331_v1, %v5948_v60 }
 0x828   :  { %5342 = vrcp.f32 %v1838_v59  ;;  %1940 = vrot.lane.b32.xlu0 %v1893_v2, %s5479_s23  ;;  %v5335_v35 = vpop.eup %5334  ;;  %v1891_v8 = vmul.f32 %v5333_v5, %v5953_v0 }
 0x829   :  { %1942 = vrot.lane.b32.xlu1 %v1894_v14, %s5479_s23  ;;  %v5337_v24 = vpop.eup %5336  ;;  %v1890_v27 = vmul.f32 %v5335_v35, %v5961_v16 }
 0x82a   :  { %v1889_v28 = vmul.f32 %v5337_v24, %v5968_v47 }
 0x82c   :  { %1936 = vrot.lane.b32.xlu0 %v1891_v8, %s5479_s23  ;;  %v5339_v46 = vpop.eup %5338 }
 0x82d   :  { %1938 = vrot.lane.b32.xlu1 %v1892_v62, %s5479_s23  ;;  %v1888_v60 = vmul.f32 %v5339_v46, %v5975_v57 }
 0x82f   :  { %v5341_v33 = vpop.eup %5340 }
 0x830   :  { %1932 = vrot.lane.b32.xlu0 %v1889_v28, %s5479_s23  ;;  %v1887_v0 = vmul.f32 %v5341_v33, %v5982_v25 }
 0x831   :  { %1934 = vrot.lane.b32.xlu1 %v1890_v27, %s5479_s23 }
 0x834   :  { %1928 = vrot.lane.b32.xlu0 %v1887_v0, %s5479_s23 }
 0x835   :  { %v5343_v34 = vpop.eup %5342  ;;  %1930 = vrot.lane.b32.xlu1 %v1888_v60, %s5479_s23  ;;  %v2200_v60 = vld [vmem:[#allocation2 + $0x250] sm:$0xff] }
 0x836   :  { %v1886_v7 = vmul.f32 %v5343_v34, %v5988_v39 }
 0x839   :  { %1926 = vrot.lane.b32.xlu1 %v1886_v7, %s5479_s23 }
 0x88a   :  { %v1957_v16 = vpop.permute.xlu0 %1956 }
 0x88b   :  { %4973 = vmatprep.subr.mxu0 %v1957_v16  ;;  %5017 = vmatprep.subr.mxu1 %v1957_v16 }
 0x88c   :  { %4974 = vmatpush3.msra.mxu0 %v1957_v16  ;;  %5018 = vmatpush3.msra.mxu1 %v1957_v16 }
 0x88e   :  { %v1953_v10 = vpop.permute.xlu0 %1952 }
 0x88f   :  { %v1955_v47 = vpop.permute.xlu1 %1954 }
 0x890   :  { %4975 = vmatprep.subr.mxu0 %v1955_v47  ;;  %5019 = vmatprep.subr.mxu1 %v1955_v47 }
 0x891   :  { %4976 = vmatpush3.msra.mxu0 %v1955_v47  ;;  %5020 = vmatpush3.msra.mxu1 %v1955_v47 }
 0x892   :  { %4977 = vmatprep.subr.mxu0 %v1953_v10  ;;  %5021 = vmatprep.subr.mxu1 %v1953_v10  ;;  %v1949_v25 = vpop.permute.xlu0 %1948 }
 0x893   :  { %v1951_v57 = vpop.permute.xlu1 %1950  ;;  %4978 = vmatpush3.msra.mxu0 %v1953_v10  ;;  %5022 = vmatpush3.msra.mxu1 %v1953_v10 }
 0x894   :  { %4979 = vmatprep.subr.mxu0 %v1951_v57  ;;  %5023 = vmatprep.subr.mxu1 %v1951_v57 }
 0x895   :  { %4980 = vmatpush3.msra.mxu0 %v1951_v57  ;;  %5024 = vmatpush3.msra.mxu1 %v1951_v57 }
 0x896   :  { %4981 = vmatprep.subr.mxu0 %v1949_v25  ;;  %5025 = vmatprep.subr.mxu1 %v1949_v25  ;;  %v1945_v37 = vpop.permute.xlu0 %1944 }
 0x897   :  { %v1947_v11 = vpop.permute.xlu1 %1946  ;;  %4982 = vmatpush3.msra.mxu0 %v1949_v25  ;;  %5026 = vmatpush3.msra.mxu1 %v1949_v25 }
 0x898   :  { %4983 = vmatprep.subr.mxu0 %v1947_v11  ;;  %5027 = vmatprep.subr.mxu1 %v1947_v11 }
 0x899   :  { %4984 = vmatpush3.msra.mxu0 %v1947_v11  ;;  %5028 = vmatpush3.msra.mxu1 %v1947_v11  ;;  %v2201_v11 = vld [vmem:[#allocation2 + $0x258] sm:$0xff] }
 0x89a   :  { %4985 = vmatprep.subr.mxu0 %v1945_v37  ;;  %5029 = vmatprep.subr.mxu1 %v1945_v37  ;;  %v1941_v39 = vpop.permute.xlu0 %1940 }
 0x89b   :  { %v1943_v36 = vpop.permute.xlu1 %1942  ;;  %4986 = vmatpush3.msra.mxu0 %v1945_v37  ;;  %5030 = vmatpush3.msra.mxu1 %v1945_v37  ;;  %v2883_v37 = vld [vmem:[#allocation2 + $0x78] sm:$0xff] }
 0x89c   :  { %4987 = vmatprep.subr.mxu0 %v1943_v36  ;;  %5031 = vmatprep.subr.mxu1 %v1943_v36 }
 0x89d   :  { %4988 = vmatpush3.msra.mxu0 %v1943_v36  ;;  %5032 = vmatpush3.msra.mxu1 %v1943_v36  ;;  %v2202_v36 = vld [vmem:[#allocation2 + $0x260] sm:$0xff] }
 0x89e   :  { %4989 = vmatprep.subr.mxu0 %v1941_v39  ;;  %5033 = vmatprep.subr.mxu1 %v1941_v39  ;;  %v1937_v41 = vpop.permute.xlu0 %1936 }
 0x89f   :  { %v1939_v40 = vpop.permute.xlu1 %1938  ;;  %4990 = vmatpush3.msra.mxu0 %v1941_v39  ;;  %5034 = vmatpush3.msra.mxu1 %v1941_v39  ;;  %v2203_v39 = vld [vmem:[#allocation2 + $0x268] sm:$0xff] }
 0x8a0   :  { %4991 = vmatprep.subr.mxu0 %v1939_v40  ;;  %5035 = vmatprep.subr.mxu1 %v1939_v40 }
 0x8a1   :  { %4992 = vmatpush3.msra.mxu0 %v1939_v40  ;;  %5036 = vmatpush3.msra.mxu1 %v1939_v40  ;;  %v2204_v40 = vld [vmem:[#allocation2 + $0x270] sm:$0xff] }
 0x8a2   :  { %4993 = vmatprep.subr.mxu0 %v1937_v41  ;;  %5037 = vmatprep.subr.mxu1 %v1937_v41  ;;  %v1933_v43 = vpop.permute.xlu0 %1932 }
 0x8a3   :  { %v1935_v42 = vpop.permute.xlu1 %1934  ;;  %4994 = vmatpush3.msra.mxu0 %v1937_v41  ;;  %5038 = vmatpush3.msra.mxu1 %v1937_v41  ;;  %v2205_v41 = vld [vmem:[#allocation2 + $0x278] sm:$0xff] }
 0x8a4   :  { %4995 = vmatprep.subr.mxu0 %v1935_v42  ;;  %5039 = vmatprep.subr.mxu1 %v1935_v42 }
 0x8a5   :  { %4996 = vmatpush3.msra.mxu0 %v1935_v42  ;;  %5040 = vmatpush3.msra.mxu1 %v1935_v42  ;;  %v2206_v42 = vld [vmem:[#allocation2 + $0x280] sm:$0xff] }
 0x8a6   :  { %4997 = vmatprep.subr.mxu0 %v1933_v43  ;;  %5041 = vmatprep.subr.mxu1 %v1933_v43  ;;  %v1929_v44 = vpop.permute.xlu0 %1928 }
 0x8a7   :  { %v1931_v4 = vpop.permute.xlu1 %1930  ;;  %4998 = vmatpush3.msra.mxu0 %v1933_v43  ;;  %5042 = vmatpush3.msra.mxu1 %v1933_v43  ;;  %v2207_v43 = vld [vmem:[#allocation2 + $0x288] sm:$0xff] }
 0x8a8   :  { %4999 = vmatprep.subr.mxu0 %v1931_v4  ;;  %5043 = vmatprep.subr.mxu1 %v1931_v4 }
 0x8a9   :  { %5000 = vmatpush3.msra.mxu0 %v1931_v4  ;;  %5044 = vmatpush3.msra.mxu1 %v1931_v4  ;;  %v5444_v4 = vld [vmem:[#allocation2 + $0x110] sm:$0xff] }
 0x8aa   :  { %5001 = vmatprep.subr.mxu0 %v1929_v44  ;;  %5045 = vmatprep.subr.mxu1 %v1929_v44 }
 0x8ab   :  { %v1927_v45 = vpop.permute.xlu1 %1926  ;;  %5002 = vmatpush3.msra.mxu0 %v1929_v44  ;;  %5046 = vmatpush3.msra.mxu1 %v1929_v44  ;;  %v2208_v44 = vld [vmem:[#allocation2 + $0x290] sm:$0xff] }
 0x8ac   :  { %5003 = vmatprep.subr.mxu0 %v1927_v45  ;;  %5047 = vmatprep.subr.mxu1 %v1927_v45 }
 0x8ad   :  { %5004 = vmatpush3.msra.mxu0 %v1927_v45  ;;  %5048 = vmatpush3.msra.mxu1 %v1927_v45 }
 0x8ae   :  { %5006 = vmatmul.mubr.f32.vlgmr.msra.gmra.mxu0 %v1903_v48  ;;  %5050 = vmatmul.mubr.f32.vlgmr.msra.gmra.mxu1 %v2080_v12 }
 0x8af   :  { %5008 = vmatprep.mubr.f32.mxu0 %v1904_v50  ;;  %5052 = vmatprep.mubr.f32.mxu1 %v2081_v3  ;;  %v2209_v3 = vld [vmem:[#allocation2 + $0x298] sm:$0xff] }
 0x8b0   :  { %5061 = vmatprep.subr.mxu0 %v2217_v17 }
 0x8b1   :  { %5062 = vmatpush3.msra.mxu0 %v2217_v17  ;;  %v2210_v17 = vld [vmem:[#allocation2 + $0x2a0] sm:$0xff] }
 0x8b2   :  { %5009 = vmatmul.mubr.f32.gmra.mxu0 %v1905_v6  ;;  %5053 = vmatmul.mubr.f32.gmra.mxu1 %v2082_v51  ;;  %v2211_v6 = vld [vmem:[#allocation2 + $0x2a8] sm:$0xff]  ;;  %v2212_v51 = vld [vmem:[#allocation2 + $0x2b0] sm:$0xff] }
 0x8b3   :  { %5011 = vmatprep.mubr.f32.mxu0 %v1906_v19  ;;  %5055 = vmatprep.mubr.f32.mxu1 %v2083_v13 }
 0x8b4   :  { %5063 = vmatprep.subr.mxu0 %v2216_v20 }
 0x8b5   :  { %5064 = vmatpush3.msra.mxu0 %v2216_v20  ;;  %v2215_v20 = vld [vmem:[#allocation2 + $0x2c8] sm:$0xff] }
 0x8b6   :  { %5012 = vmatmul.mubr.f32.gmra.mxu0 %v1907_v53  ;;  %5056 = vmatmul.mubr.f32.gmra.mxu1 %v2084_v54 }
 0x8b7   :  { %5014 = vmatprep.mubr.f32.mxu0 %v1908_v55  ;;  %5058 = vmatprep.mubr.f32.mxu1 %v2085_v15  ;;  %v2213_v55 = vld [vmem:[#allocation2 + $0x2b8] sm:$0xff] }
 0x8ba   :  { %5015 = vmatmul.mubr.f32.gmra.mxu0 %v1909_v38  ;;  %5059 = vmatmul.mubr.f32.gmra.mxu1 %v2086_v56  ;;  %v2214_v56 = vld [vmem:[#allocation2 + $0x2c0] sm:$0xff] }
 0x8bb   :  { %5121 = vmatprep.mubr.msk.f32.mxu1 %vm2348_vm4, %v2208_v44 }
 0x96e   :  { %v5007_v9 = vpop.f32.mrf.mxu0  ;;  %v5051_v58 = vpop.f32.mrf.mxu1 }
 0x96f   :  { %v2193_v52 = vmax.f32 %v5007_v9, %v5051_v58  ;;  %v5445_v58 = vld [vmem:[#allocation2 + $0x130] sm:$0xff] }
 0x970   :  { %v2040_v18 = vpop.f32.mrf.mxu0  ;;  %v2153_v23 = vpop.f32.mrf.mxu1 }
 0x971   :  { %v2192_v49 = vmax.f32 %v2040_v18, %v2153_v23 }
 0x972   :  { %v5010_v61 = vpop.f32.mrf.mxu0  ;;  %v5054_v21 = vpop.f32.mrf.mxu1 }
 0x973   :  { %5065 = vmatprep.mubr.msk.f32.mxu0 %vm2218_vm3, %v2192_v49  ;;  %v2195_v14 = vmax.f32 %v5010_v61, %v5054_v21  ;;  %v4422_v21 = vld [vmem:[#allocation2 + $0x88] ss:$0 sm:$0xff] }
 0x974   :  { %v2050_v63 = vpop.f32.mrf.mxu0  ;;  %v2163_v59 = vpop.f32.mrf.mxu1  ;;  %5066 = vmatmul.mubr.msk.f32.vlgmr.msra.gmra.mxu0 %vm2218_vm3, %v2193_v52 }
 0x975   :  { %v2194_v1 = vmax.f32 %v2050_v63, %v2163_v59  ;;  %v4421_v63 = vld [vmem:[#allocation2 + $0x80] ss:$0 sm:$0xff]  ;;  %v5446_v59 = vld [vmem:[#allocation2 + $0x118] sm:$0xff] }
 0x976   :  { %v5013_v2 = vpop.f32.mrf.mxu0  ;;  %v5057_v5 = vpop.f32.mrf.mxu1 }
 0x977   :  { %5068 = vmatprep.mubr.msk.f32.mxu0 %vm2218_vm3, %v2194_v1  ;;  %v2197_v24 = vmax.f32 %v5013_v2, %v5057_v5  ;;  %v5447_v1 = vld [vmem:[#allocation2 + $0x120] sm:$0xff] }
 0x978   :  { %v2060_v35 = vpop.f32.mrf.mxu0  ;;  %v2173_v62 = vpop.f32.mrf.mxu1  ;;  %5069 = vmatmul.mubr.msk.f32.gmra.mxu0 %vm2218_vm3, %v2195_v14  ;;  %v5448_v14 = vld [vmem:[#allocation2 + $0x128] sm:$0xff] }
 0x979   :  { %v2196_v8 = vmax.f32 %v2060_v35, %v2173_v62 }
 0x97a   :  { %v5016_v26 = vpop.f32.mrf.mxu0  ;;  %v5060_v22 = vpop.f32.mrf.mxu1 }
 0x97b   :  { %5071 = vmatprep.mubr.msk.f32.mxu0 %vm2218_vm3, %v2196_v8  ;;  %v2199_v33 = vmax.f32 %v5016_v26, %v5060_v22  ;;  %v5449_v8 = vld [vmem:[#allocation2 + $0x138] sm:$0xff]  ;;  %v5451_v26 = vld [vmem:[#allocation2 + $0x148] sm:$0xff] }
 0x97c   :  { %v2070_v46 = vpop.f32.mrf.mxu0  ;;  %v2183_v27 = vpop.f32.mrf.mxu1  ;;  %5072 = vmatmul.mubr.msk.f32.gmra.mxu0 %vm2218_vm3, %v2197_v24  ;;  %v5450_v24 = vld [vmem:[#allocation2 + $0x140] sm:$0xff] }
 0x97d   :  { %v2198_v28 = vmax.f32 %v2070_v46, %v2183_v27 }
 0x97f   :  { %5074 = vmatprep.mubr.msk.f32.mxu0 %vm2218_vm3, %v2198_v28 }
 0x980   :  { %5075 = vmatmul.mubr.msk.f32.gmra.mxu0 %vm2218_vm3, %v2199_v33 }
 0x981   :  { %5093 = vmatprep.mubr.msk.f32.mxu0 %vm2348_vm4, %v2200_v60 }
 0xa34   :  { %v6032_v0 = vpop.f32.mrf.mxu0 }
 0xa36   :  { %v6034_v34 = vpop.f32.mrf.mxu0 }
 0xa38   :  { %v6036_v7 = vpop.f32.mrf.mxu0 }
 0xa3a   :  { %v6038_v16 = vpop.f32.mrf.mxu0 }
 0xa3c   :  { %v6040_v47 = vpop.f32.mrf.mxu0 }
 0xa3e   :  { %v6042_v10 = vpop.f32.mrf.mxu0 }
 0xa40   :  { %v6044_v57 = vpop.f32.mrf.mxu0 }
 0xa41   :  { %2540 = vrot.lane.b32.xlu0 %v6044_v57, %s5482_s18  ;;  %5077 = vmatprep.subr.mxu0 %v6044_v57 }
 0xa42   :  { %v6049_v25 = vpop.f32.mrf.mxu0  ;;  %5078 = vmatpush3.msra.mxu0 %v6044_v57 }
 0xa43   :  { %2538 = vrot.lane.b32.xlu1 %v6049_v25, %s5482_s18  ;;  %5079 = vmatprep.subr.mxu0 %v6049_v25 }
 0xa44   :  { %5080 = vmatpush3.msra.mxu0 %v6049_v25 }
 0xa45   :  { %2536 = vrot.lane.b32.xlu0 %v6040_v47, %s5482_s18  ;;  %5081 = vmatprep.subr.mxu0 %v6040_v47 }
 0xa46   :  { %5082 = vmatpush3.msra.mxu0 %v6040_v47 }
 0xa47   :  { %2534 = vrot.lane.b32.xlu1 %v6042_v10, %s5482_s18  ;;  %5083 = vmatprep.subr.mxu0 %v6042_v10 }
 0xa48   :  { %5084 = vmatpush3.msra.mxu0 %v6042_v10 }
 0xa49   :  { %2532 = vrot.lane.b32.xlu0 %v6036_v7, %s5482_s18  ;;  %5085 = vmatprep.subr.mxu0 %v6036_v7 }
 0xa4a   :  { %5086 = vmatpush3.msra.mxu0 %v6036_v7 }
 0xa4b   :  { %2530 = vrot.lane.b32.xlu1 %v6038_v16, %s5482_s18  ;;  %5087 = vmatprep.subr.mxu0 %v6038_v16 }
 0xa4c   :  { %5088 = vmatpush3.msra.mxu0 %v6038_v16 }
 0xa4d   :  { %2528 = vrot.lane.b32.xlu0 %v6032_v0, %s5482_s18  ;;  %5089 = vmatprep.subr.mxu0 %v6032_v0 }
 0xa4e   :  { %5090 = vmatpush3.msra.mxu0 %v6032_v0 }
 0xa4f   :  { %2526 = vrot.lane.b32.xlu1 %v6034_v34, %s5482_s18  ;;  %5091 = vmatprep.subr.mxu0 %v6034_v34 }
 0xa50   :  { %5092 = vmatpush3.msra.mxu0 %v6034_v34 }
 0xa51   :  { %5094 = vmatmul.mubr.msk.f32.vlgmr.msra.gmra.mxu0 %vm2348_vm4, %v2201_v11  ;;  %5133 = vmatprep.subr.mxu0 %v2883_v37 }
 0xa52   :  { %5096 = vmatprep.mubr.msk.f32.mxu0 %vm2348_vm4, %v2202_v36  ;;  %5134 = vmatpush3.msra.mxu0 %v2883_v37 }
 0xa55   :  { %5097 = vmatmul.mubr.msk.f32.gmra.mxu0 %vm2348_vm4, %v2203_v39 }
 0xa56   :  { %5099 = vmatprep.mubr.msk.f32.mxu0 %vm2348_vm4, %v2204_v40 }
 0xa59   :  { %5100 = vmatmul.mubr.msk.f32.gmra.mxu0 %vm2348_vm4, %v2205_v41 }
 0xa5a   :  { %5102 = vmatprep.mubr.msk.f32.mxu0 %vm2348_vm4, %v2206_v42 }
 0xa5d   :  { %5103 = vmatmul.mubr.msk.f32.gmra.mxu0 %vm2348_vm4, %v2207_v43 }
 0xa5e   :  { %5135 = vmatprep.mubr.msk.f32.mxu0 %vm402_vm1, %v5557_v29 }
 0xa61   :  { %5136 = vmatmul.mubr.msk.f32.vlgmr.msra.gmra.mxu0 %vm402_vm1, %v5559_v30 }
 0xa62   :  { %5138 = vmatprep.mubr.msk.f32.mxu0 %vm402_vm1, %v5565_v31 }
 0xa65   :  { %5139 = vmatmul.mubr.msk.f32.gmra.mxu0 %vm402_vm1, %v5569_v32 }
 0xa66   :  { %5149 = vmatprep.mubr.msk.f32.mxu0 %vm66_vm0, %v5444_v4 }
 0xab3   :  { %v2541_v45 = vpop.permute.xlu0 %2540 }
 0xab4   :  { %5105 = vmatprep.subr.mxu1 %v2541_v45 }
 0xab5   :  { %5106 = vmatpush3.msra.mxu1 %v2541_v45  ;;  %v2539_v48 = vpop.permute.xlu1 %2538  ;;  %v4423_v45 = vld [vmem:[#allocation2 + $0x90] ss:$0 sm:$0xff] }
 0xab6   :  { %5107 = vmatprep.subr.mxu1 %v2539_v48 }
 0xab7   :  { %v2537_v29 = vpop.permute.xlu0 %2536  ;;  %5108 = vmatpush3.msra.mxu1 %v2539_v48 }
 0xab8   :  { %5109 = vmatprep.subr.mxu1 %v2537_v29 }
 0xab9   :  { %5110 = vmatpush3.msra.mxu1 %v2537_v29  ;;  %v2535_v30 = vpop.permute.xlu1 %2534 }
 0xaba   :  { %5111 = vmatprep.subr.mxu1 %v2535_v30 }
 0xabb   :  { %v2533_v31 = vpop.permute.xlu0 %2532  ;;  %5112 = vmatpush3.msra.mxu1 %v2535_v30 }
 0xabc   :  { %5113 = vmatprep.subr.mxu1 %v2533_v31 }
 0xabd   :  { %5114 = vmatpush3.msra.mxu1 %v2533_v31  ;;  %v2531_v32 = vpop.permute.xlu1 %2530 }
 0xabe   :  { %5115 = vmatprep.subr.mxu1 %v2531_v32 }
 0xabf   :  { %v2529_v12 = vpop.permute.xlu0 %2528  ;;  %5116 = vmatpush3.msra.mxu1 %v2531_v32 }
 0xac0   :  { %5117 = vmatprep.subr.mxu1 %v2529_v12 }
 0xac1   :  { %5118 = vmatpush3.msra.mxu1 %v2529_v12  ;;  %v2527_v50 = vpop.permute.xlu1 %2526 }
 0xac2   :  { %5119 = vmatprep.subr.mxu1 %v2527_v50 }
 0xac3   :  { %5120 = vmatpush3.msra.mxu1 %v2527_v50 }
 0xac4   :  { %5122 = vmatmul.mubr.msk.f32.vlgmr.msra.gmra.mxu1 %vm2348_vm4, %v2209_v3 }
 0xac5   :  { %5124 = vmatprep.mubr.msk.f32.mxu1 %vm2348_vm4, %v2210_v17 }
 0xac8   :  { %5125 = vmatmul.mubr.msk.f32.gmra.mxu1 %vm2348_vm4, %v2211_v6 }
 0xac9   :  { %5127 = vmatprep.mubr.msk.f32.mxu1 %vm2348_vm4, %v2212_v51 }
 0xacc   :  { %5128 = vmatmul.mubr.msk.f32.gmra.mxu1 %vm2348_vm4, %v2213_v55 }
 0xacd   :  { %5130 = vmatprep.mubr.msk.f32.mxu1 %vm2348_vm4, %v2214_v56 }
 0xad0   :  { %5131 = vmatmul.mubr.msk.f32.gmra.mxu1 %vm2348_vm4, %v2215_v20  ;;  %vm4307_vm4 = vcmask 39936  }
 0xad1   :  { %5163 = vmatprep.mubr.msk.f32.mxu1 %vm66_vm0, %v5445_v58 }
 0xb11   :  { %v6101_v19 = vpop.f32.mrf.mxu0 }
 0xb13   :  { %v6103_v13 = vpop.f32.mrf.mxu0 }
 0xb15   :  { %v6105_v53 = vpop.f32.mrf.mxu0 }
 0xb17   :  { %v6107_v54 = vpop.f32.mrf.mxu0 }
 0xb19   :  { %v6109_v15 = vpop.f32.mrf.mxu0 }
 0xb1b   :  { %v6112_v38 = vpop.f32.mrf.mxu0 }
 0xb1d   :  { %v6115_v9 = vpop.f32.mrf.mxu0 }
 0xb1f   :  { %v6119_v18 = vpop.f32.mrf.mxu0 }
 0xb21   :  { %v6121_v23 = vpop.f32.mrf.mxu0 }
 0xb23   :  { %v6123_v49 = vpop.f32.mrf.mxu0 }
 0xb25   :  { %v6125_v52 = vpop.f32.mrf.mxu0 }
 0xb26   :  { %3084 = vrot.lane.b32.xlu0 %v6125_v52, %s5482_s18  ;;  %5141 = vmatprep.subr.mxu0 %v6125_v52 }
 0xb27   :  { %v6130_v61 = vpop.f32.mrf.mxu0  ;;  %5142 = vmatpush3.msra.mxu0 %v6125_v52 }
 0xb28   :  { %3082 = vrot.lane.b32.xlu1 %v6130_v61, %s5482_s18  ;;  %5143 = vmatprep.subr.mxu0 %v6130_v61 }
 0xb29   :  { %5144 = vmatpush3.msra.mxu0 %v6130_v61 }
 0xb2a   :  { %3080 = vrot.lane.b32.xlu0 %v6121_v23, %s5482_s18  ;;  %5145 = vmatprep.subr.mxu0 %v6121_v23 }
 0xb2b   :  { %5146 = vmatpush3.msra.mxu0 %v6121_v23 }
 0xb2c   :  { %3078 = vrot.lane.b32.xlu1 %v6123_v49, %s5482_s18  ;;  %5147 = vmatprep.subr.mxu0 %v6123_v49 }
 0xb2d   :  { %5148 = vmatpush3.msra.mxu0 %v6123_v49 }
 0xb2e   :  { %5150 = vmatmul.mubr.msk.f32.vlgmr.msra.gmra.mxu0 %vm66_vm0, %v5446_v59  ;;  %3214 = vrot.lane.b32.xlu0 %v4422_v21, %s5483_s19 }
 0xb2f   :  { %5152 = vmatprep.mubr.msk.f32.mxu0 %vm66_vm0, %v5447_v1 }
 0xb30   :  { %3201 = vrot.lane.b32.xlu1 %v4421_v63, %s5483_s19 }
 0xb32   :  { %5153 = vmatmul.mubr.msk.f32.gmra.mxu0 %vm66_vm0, %v5448_v14 }
 0xb84   :  { %v6157_v33 = vpop.f32.mrf.mxu1 }
 0xb86   :  { %v6159_v60 = vpop.f32.mrf.mxu1 }
 0xb88   :  { %v6161_v11 = vpop.f32.mrf.mxu1 }
 0xb8a   :  { %v6163_v37 = vpop.f32.mrf.mxu1 }
 0xb8c   :  { %v6165_v36 = vpop.f32.mrf.mxu1 }
 0xb8e   :  { %v6167_v39 = vpop.f32.mrf.mxu1 }
 0xb90   :  { %v6169_v40 = vpop.f32.mrf.mxu1 }
 0xb92   :  { %v6171_v41 = vpop.f32.mrf.mxu1 }
 0xb98   :  { %v3085_v2 = vpop.permute.xlu0 %3084 }
 0xb99   :  { %5155 = vmatprep.subr.mxu1 %v3085_v2 }
 0xb9a   :  { %5156 = vmatpush3.msra.mxu1 %v3085_v2  ;;  %v3083_v5 = vpop.permute.xlu1 %3082 }
 0xb9b   :  { %5157 = vmatprep.subr.mxu1 %v3083_v5 }
 0xb9c   :  { %v3081_v35 = vpop.permute.xlu0 %3080  ;;  %5158 = vmatpush3.msra.mxu1 %v3083_v5 }
 0xb9d   :  { %5159 = vmatprep.subr.mxu1 %v3081_v35 }
 0xb9e   :  { %5160 = vmatpush3.msra.mxu1 %v3081_v35  ;;  %v3079_v62 = vpop.permute.xlu1 %3078 }
 0xb9f   :  { %5161 = vmatprep.subr.mxu1 %v3079_v62 }
 0xba0   :  { %5162 = vmatpush3.msra.mxu1 %v3079_v62  ;;  %v3215_v29 = vpop.permute.xlu0 %3214 }
 0xba1   :  { %5164 = vmatmul.mubr.msk.f32.vlgmr.msra.gmra.mxu1 %vm66_vm0, %v5449_v8 }
 0xba2   :  { %5166 = vmatprep.mubr.msk.f32.mxu1 %vm66_vm0, %v5450_v24  ;;  %v3202_v48 = vpop.permute.xlu1 %3201 }
 0xba5   :  { %5167 = vmatmul.mubr.msk.f32.gmra.mxu1 %vm66_vm0, %v5451_v26 }
 0xbee   :  { %v5151_v22 = vpop.f32.mrf.mxu0 }
 0xbef   :  { %3060 = vrot.lane.b32.xlu1 %v5151_v22, %s5483_s19 }
 0xbf0   :  { %v3035_v46 = vpop.f32.mrf.mxu0 }
 0xbf1   :  { %3058 = vrot.lane.b32.xlu0 %v3035_v46, %s5483_s19 }
 0xbf2   :  { %v5154_v27 = vpop.f32.mrf.mxu0 }
 0xbf4   :  { %v3045_v28 = vpop.f32.mrf.mxu0 }
 0xbf5   :  { %3064 = vrot.lane.b32.xlu0 %v5154_v27, %s5483_s19  ;;  %3062 = vrot.lane.b32.xlu1 %v3045_v28, %s5483_s19 }
 0xc61   :  { %v5165_v42 = vpop.f32.mrf.mxu1  ;;  %v3061_v30 = vpop.permute.xlu1 %3060 }
 0xc62   :  { %3181 = vrot.lane.b32.xlu1 %v5165_v42, %s5483_s19  ;;  %v3071_v3 = vadd.f32 %v6121_v23, %v3061_v30 }
 0xc63   :  { %v3156_v43 = vpop.f32.mrf.mxu1  ;;  %v3059_v31 = vpop.permute.xlu0 %3058 }
 0xc64   :  { %v3070_v17 = vadd.f32 %v3059_v31, %v6123_v49 }
 0xc65   :  { %v5168_v4 = vpop.f32.mrf.mxu1 }
 0xc66   :  { %3185 = vrot.lane.b32.xlu0 %v5168_v4, %s5483_s19  ;;  %3179 = vrot.lane.b32.xlu1 %v3156_v43, %s5483_s19 }
 0xc67   :  { %v3166_v44 = vpop.f32.mrf.mxu1  ;;  %v3063_v32 = vpop.permute.xlu1 %3062 }
 0xc68   :  { %v3065_v12 = vpop.permute.xlu0 %3064  ;;  %v3072_v21 = vadd.f32 %v3063_v32, %v6130_v61 }
 0xc69   :  { %v3073_v6 = vadd.f32 %v6125_v52, %v3065_v12 }
 0xc6a   :  { %3183 = vrot.lane.b32.xlu0 %v3166_v44, %s5483_s19 }
 0xc6e   :  { %3227 = vrot.lane.b32.xlu0 %v4423_v45, %s5483_s19 }
 0xcd4   :  { %v3182_v50 = vpop.permute.xlu1 %3181 }
 0xcd5   :  { %v3192_v51 = vadd.f32 %v3182_v50, %v3071_v3  ;;  %v3262_v3 = vld [vmem:[#allocation2 + $0x370] sm:$0xff] }
 0xcd6   :  { %5177 = vmatprep.mubr.msk.f32.mxu0 %vm66_vm0, %v3262_v3  ;;  %v4437_v3 = vld [vmem:[#allocation2 + $0xc0] ss:$0 sm:$0xff] }
 0xcd7   :  { %v3205_v63 = vadd.f32 %v3202_v48, %v3192_v51 }
 0xcd8   :  { %v3186_v55 = vpop.permute.xlu0 %3185  ;;  %v3180_v56 = vpop.permute.xlu1 %3179 }
 0xcd9   :  { %v3194_v20 = vadd.f32 %v3186_v55, %v3073_v6  ;;  %v3191_v58 = vadd.f32 %v3180_v56, %v3070_v17  ;;  %v3218_v5 = vmul.f32 %v3215_v29, %v3205_v63  ;;  %v3361_v17 = vld [vmem:[#allocation2 + $0x380] sm:$0xff] }
 0xcda   :  { %5188 = vmatprep.mubr.msk.f32.mxu1 %vm66_vm0, %v3361_v17  ;;  %v4438_v17 = vld [vmem:[#allocation2 + $0xc8] ss:$0 sm:$0xff] }
 0xcdb   :  { %v3207_v59 = vadd.f32 %v3202_v48, %v3194_v20  ;;  %v3204_v1 = vadd.f32 %v3202_v48, %v3191_v58 }
 0xcdc   :  { %v3184_v14 = vpop.permute.xlu0 %3183 }
 0xcdd   :  { %v3193_v2 = vadd.f32 %v3184_v14, %v3072_v21  ;;  %v3220_v35 = vmul.f32 %v3215_v29, %v3207_v59  ;;  %v3217_v62 = vmul.f32 %v3215_v29, %v3204_v1 }
 0xcdf   :  { %v3206_v23 = vadd.f32 %v3202_v48, %v3193_v2 }
 0xce0   :  { %v3228_v8 = vpop.permute.xlu0 %3227 }
 0xce1   :  { %v3219_v49 = vmul.f32 %v3215_v29, %v3206_v23  ;;  %v3230_v24 = vadd.f32 %v3228_v8, %v3217_v62  ;;  %v3231_v52 = vadd.f32 %v3228_v8, %v3218_v5  ;;  %v3233_v26 = vadd.f32 %v3228_v8, %v3220_v35  ;;  %v3263_v5 = vld [vmem:[#allocation2 + $0x378] sm:$0xff]  ;;  %v3362_v35 = vld [vmem:[#allocation2 + $0x388] sm:$0xff]  ;;  %v3451_v62 = vld [vmem:[#allocation2 + $0xa0] sm:$0xff] }
 0xce2   :  { %v3450_v23 = vld [vmem:[#allocation2 + $0x98] sm:$0xff] }
 0xce3   :  { %v3232_v22 = vadd.f32 %v3228_v8, %v3219_v49  ;;  %v3234_v46 = vsub.f32 0.0, %v3230_v24  ;;  %v3235_v27 = vsub.f32 0.0, %v3231_v52  ;;  %v3237_v28 = vsub.f32 0.0, %v3233_v26 }
 0xce5   :  { %v3236_v42 = vsub.f32 0.0, %v3232_v22  ;;  %v3238_v61 = vmul.f32 1.442695, %v3234_v46  ;;  %v3240_v43 = vmul.f32 1.442695, %v3235_v27  ;;  %v3446_v46 = vld [vmem:[#allocation2 + $0x2d0] sm:$0xff] }
 0xce6   :  { %v3244_v4 = vmul.f32 1.442695, %v3237_v28  ;;  %v3448_v27 = vld [vmem:[#allocation2 + $0x2e0] sm:$0xff] }
 0xce7   :  { %5344 = vpow2.f32 %v3238_v61  ;;  %v3242_v44 = vmul.f32 1.442695, %v3236_v42  ;;  %v3447_v61 = vld [vmem:[#allocation2 + $0x2d8] sm:$0xff] }
 0xce8   :  { %5346 = vpow2.f32 %v3240_v43  ;;  %v6200_v43 = vld [vmem:[%s6404_s2] sm:$0xff] }
 0xce9   :  { %5348 = vpow2.f32 %v3242_v44 }
 0xcea   :  { %5350 = vpow2.f32 %v3244_v4 }
 0xcf4   :  { %v5345_v45 = vpop.eup %5344 }
 0xcf5   :  { %v5347_v48 = vpop.eup %5346  ;;  %v3246_v31 = vadd.f32 1.0, %v5345_v45  ;;  %v3449_v45 = vld [vmem:[#allocation2 + $0x2e8] sm:$0xff] }
 0xcf6   :  { %v5349_v30 = vpop.eup %5348  ;;  %v3247_v12 = vadd.f32 1.0, %v5347_v48 }
 0xcf7   :  { %v5351_v29 = vpop.eup %5350  ;;  %v3248_v32 = vadd.f32 1.0, %v5349_v30 }
 0xcf8   :  { %v3249_v50 = vadd.f32 1.0, %v5351_v29 }
 0xcf9   :  { %5352 = vrcp.f32 %v3248_v32  ;;  %v4434_v32 = vld [vmem:[#allocation2 + $0xa8] ss:$0 sm:$0xff] }
 0xcfa   :  { %5354 = vrcp.f32 %v3249_v50  ;;  %v4436_v50 = vld [vmem:[#allocation2 + $0xb8] ss:$0 sm:$0xff] }
 0xcfb   :  { %5356 = vrcp.f32 %v3246_v31 }
 0xcfc   :  { %5358 = vrcp.f32 %v3247_v12  ;;  %v4435_v12 = vld [vmem:[#allocation2 + $0xb0] ss:$0 sm:$0xff] }
 0xd06   :  { %v5353_v6 = vpop.eup %5352 }
 0xd07   :  { %v5355_v51 = vpop.eup %5354  ;;  %v3260_v55 = vmul.f32 %v5353_v6, %v3232_v22  ;;  %v4406_v6 = vld [vmem:[#allocation2 + $0x60] ss:$0 sm:$0xff] }
 0xd08   :  { %v5357_v56 = vpop.eup %5356  ;;  %v3261_v20 = vmul.f32 %v5355_v51, %v3233_v26 }
 0xd09   :  { %v5359_v58 = vpop.eup %5358  ;;  %3272 = vrot.lane.b32.xlu0 %v3260_v55, %s5479_s23  ;;  %v3258_v21 = vmul.f32 %v5357_v56, %v3230_v24 }
 0xd0a   :  { %3274 = vrot.lane.b32.xlu1 %v3261_v20, %s5479_s23  ;;  %v3259_v63 = vmul.f32 %v5359_v58, %v3231_v52 }
 0xd0d   :  { %3268 = vrot.lane.b32.xlu0 %v3258_v21, %s5479_s23 }
 0xd0e   :  { %3270 = vrot.lane.b32.xlu1 %v3259_v63, %s5479_s23 }
 0xd7b   :  { %v3273_v59 = vpop.permute.xlu0 %3272 }
 0xd7c   :  { %v3275_v1 = vpop.permute.xlu1 %3274 }
 0xd7d   :  { %5169 = vmatprep.subr.mxu0 %v3275_v1  ;;  %5180 = vmatprep.subr.mxu1 %v3275_v1 }
 0xd7e   :  { %5170 = vmatpush3.msra.mxu0 %v3275_v1  ;;  %5181 = vmatpush3.msra.mxu1 %v3275_v1 }
 0xd7f   :  { %5171 = vmatprep.subr.mxu0 %v3273_v59  ;;  %5182 = vmatprep.subr.mxu1 %v3273_v59  ;;  %v3269_v2 = vpop.permute.xlu0 %3268 }
 0xd80   :  { %5172 = vmatpush3.msra.mxu0 %v3273_v59  ;;  %5183 = vmatpush3.msra.mxu1 %v3273_v59  ;;  %v3271_v14 = vpop.permute.xlu1 %3270 }
 0xd81   :  { %5173 = vmatprep.subr.mxu0 %v3271_v14  ;;  %5184 = vmatprep.subr.mxu1 %v3271_v14 }
 0xd82   :  { %5174 = vmatpush3.msra.mxu0 %v3271_v14  ;;  %5185 = vmatpush3.msra.mxu1 %v3271_v14  ;;  %v4408_v14 = vld [vmem:[#allocation2 + $0x70] ss:$0 sm:$0xff] }
 0xd83   :  { %5175 = vmatprep.subr.mxu0 %v3269_v2  ;;  %5186 = vmatprep.subr.mxu1 %v3269_v2 }
 0xd84   :  { %5176 = vmatpush3.msra.mxu0 %v3269_v2  ;;  %5187 = vmatpush3.msra.mxu1 %v3269_v2 }
 0xd85   :  { %5178 = vmatmul.mubr.msk.f32.vlgmr.msra.gmra.mxu0 %vm66_vm0, %v3263_v5  ;;  %5189 = vmatmul.mubr.msk.f32.vlgmr.msra.gmra.mxu1 %vm66_vm0, %v3362_v35  ;;  %vm4115_vm0 = vcmask 15360  }
 0xd86   :  { %5191 = vmatprep.subr.mxu0 %v3451_v62  ;;  %5202 = vmatprep.mubr.msk.f32.mxu1 %vm2218_vm3, %v3446_v46 }
 0xd87   :  { %5192 = vmatpush3.msra.mxu0 %v3451_v62 }
 0xd88   :  { %5193 = vmatprep.subr.mxu0 %v3450_v23 }
 0xd89   :  { %5194 = vmatpush3.msra.mxu0 %v3450_v23  ;;  %v4442_v23 = vld [vmem:[#allocation2 + $0xf0] ss:$0 sm:$0xff] }
 0xe45   :  { %v5179_v8 = vpop.f32.mrf.mxu0  ;;  %v5190_v49 = vpop.f32.mrf.mxu1 }
 0xe46   :  { %v3445_v22 = vmax.f32 %v5179_v8, %v5190_v49  ;;  %v3821_v8 = vld [vmem:[#allocation2 + $0xd8] sm:$0xff]  ;;  %v3820_v49 = vld [vmem:[#allocation2 + $0xd0] sm:$0xff] }
 0xe47   :  { %v3352_v24 = vpop.f32.mrf.mxu0  ;;  %v3435_v52 = vpop.f32.mrf.mxu1 }
 0xe48   :  { %v3444_v26 = vmax.f32 %v3352_v24, %v3435_v52 }
 0xe4a   :  { %5195 = vmatprep.mubr.msk.f32.mxu0 %vm2218_vm3, %v3444_v26 }
 0xe4b   :  { %5196 = vmatmul.mubr.msk.f32.vlgmr.msra.gmra.mxu0 %vm2218_vm3, %v3445_v22 }
 0xe4c   :  { %5209 = vmatprep.mubr.msk.f32.mxu0 %vm2218_vm3, %v3448_v27 }
 0xf0b   :  { %v5197_v28 = vpop.f32.mrf.mxu0 }
 0xf0c   :  { %3628 = vrot.lane.b32.xlu1 %v5197_v28, %s5482_s18  ;;  %5198 = vmatprep.subr.mxu1 %v5197_v28 }
 0xf0d   :  { %v3524_v42 = vpop.f32.mrf.mxu0  ;;  %5199 = vmatpush3.msra.mxu1 %v5197_v28 }
 0xf0e   :  { %3626 = vrot.lane.b32.xlu0 %v3524_v42, %s5482_s18  ;;  %5200 = vmatprep.subr.mxu1 %v3524_v42 }
 0xf0f   :  { %5201 = vmatpush3.msra.mxu1 %v3524_v42 }
 0xf10   :  { %5203 = vmatmul.mubr.msk.f32.vlgmr.msra.gmra.mxu1 %vm2218_vm3, %v3447_v61  ;;  %5212 = vmatprep.subr.mxu1 %v6200_v43 }
 0xf11   :  { %5213 = vmatpush3.msra.mxu1 %v3821_v8  ;;  %5216 = vmatprep.mubr.msk.f32.mxu1 %vm5484_vm5, %v6200_v43 }
 0xf12   :  { %5214 = vmatprep.subr.mxu1 %v6200_v43 }
 0xf13   :  { %5215 = vmatpush3.msra.mxu1 %v3820_v49 }
 0xf14   :  { %5226 = vmatprep.subr.mxu1 %v6200_v43 }
 0xf7e   :  { %v3629_v4 = vpop.permute.xlu1 %3628 }
 0xf7f   :  { %5205 = vmatprep.subr.mxu0 %v3629_v4 }
 0xf80   :  { %5206 = vmatpush3.msra.mxu0 %v3629_v4  ;;  %v3627_v44 = vpop.permute.xlu0 %3626 }
 0xf81   :  { %5207 = vmatprep.subr.mxu0 %v3627_v44 }
 0xf82   :  { %5208 = vmatpush3.msra.mxu0 %v3627_v44 }
 0xf83   :  { %5210 = vmatmul.mubr.msk.f32.vlgmr.msra.gmra.mxu0 %vm2218_vm3, %v3449_v45  ;;  %5219 = vmatprep.subr.mxu0 %v6200_v43 }
 0xf84   :  { %5223 = vmatprep.mubr.msk.f32.mxu0 %vm5484_vm5, %v6200_v43 }
 0xfd0   :  { %v5204_v48 = vpop.f32.mrf.mxu1 }
 0xfd1   :  { %3618 = vrot.lane.b32.xlu1 %v5204_v48, %s5483_s19 }
 0xfd2   :  { %v3605_v30 = vpop.f32.mrf.mxu1 }
 0xfd3   :  { %3616 = vrot.lane.b32.xlu0 %v3605_v30, %s5483_s19 }
0x1043   :  { %v5211_v29 = vpop.f32.mrf.mxu0 }
0x1044   :  { %3717 = vrot.lane.b32.xlu1 %v5211_v29, %s5483_s19 }
0x1045   :  { %v3704_v31 = vpop.f32.mrf.mxu0 }
0x1046   :  { %3715 = vrot.lane.b32.xlu0 %v3704_v31, %s5483_s19 }
0x1048   :  { %3729 = vrot.lane.b32.xlu1 %v4434_v32, %s5483_s19 }
0x104a   :  { %3740 = vrot.lane.b32.xlu0 %v4435_v12, %s5483_s19 }
0x104c   :  { %3751 = vrot.lane.b32.xlu1 %v4436_v50, %s5483_s19 }
0x104e   :  { %3790 = vrot.lane.b32.xlu0 %v4437_v3, %s5483_s19 }
0x1050   :  { %3801 = vrot.lane.b32.xlu1 %v4438_v17, %s5483_s19 }
0x1054   :  { %2488 = vrot.lane.b32.xlu1 %v6101_v19, %s5483_s19  ;;  %v3619_v19 = vpop.permute.xlu1 %3618 }
0x1055   :  { %v3623_v51 = vadd.f32 %v5197_v28, %v3619_v19 }
0x1058   :  { %2486 = vrot.lane.b32.xlu1 %v6103_v13, %s5483_s19  ;;  %v3617_v13 = vpop.permute.xlu0 %3616 }
0x105c   :  { %2689 = vrot.lane.b32.xlu1 %v6157_v33, %s5483_s19 }
0x1060   :  { %2691 = vrot.lane.b32.xlu1 %v6163_v37, %s5483_s19  ;;  %v3622_v37 = vadd.f32 %v3617_v13, %v3524_v42 }
0x1064   :  { %2687 = vrot.lane.b32.xlu1 %v6159_v60, %s5483_s19 }
0x1068   :  { %2725 = vrot.lane.b32.xlu1 %v4406_v6, %s5483_s19 }
0x106c   :  { %2695 = vrot.lane.b32.xlu1 %v6167_v39, %s5483_s19 }
0x1070   :  { %2697 = vrot.lane.b32.xlu1 %v6165_v36, %s5483_s19 }
0x1074   :  { %2699 = vrot.lane.b32.xlu1 %v6171_v41, %s5483_s19 }
0x1078   :  { %2759 = vrot.lane.b32.xlu1 %v4408_v14, %s5483_s19 }
0x107c   :  { %3938 = vrot.lane.b32.xlu1 %v4442_v23, %s5483_s19 }
0x10b6   :  { %v3718_v33 = vpop.permute.xlu1 %3717 }
0x10b7   :  { %v3722_v56 = vadd.f32 %v3718_v33, %v3623_v51 }
0x10b8   :  { %v3716_v55 = vpop.permute.xlu0 %3715 }
0x10b9   :  { %v3721_v60 = vadd.f32 %v3716_v55, %v3622_v37 }
0x10ba   :  { %v3730_v20 = vpop.permute.xlu1 %3729 }
0x10bb   :  { %v3732_v58 = vadd.f32 %v3730_v20, %v3721_v60  ;;  %v3733_v21 = vadd.f32 %v3730_v20, %v3722_v56 }
0x10bc   :  { %v3741_v63 = vpop.permute.xlu0 %3740 }
0x10bd   :  { %v3743_v59 = vmul.f32 %v3741_v63, %v3732_v58  ;;  %v3744_v39 = vmul.f32 %v3741_v63, %v3733_v21 }
0x10be   :  { %v3752_v1 = vpop.permute.xlu1 %3751 }
0x10bf   :  { %v3754_v36 = vadd.f32 %v3752_v1, %v3743_v59  ;;  %v3755_v2 = vadd.f32 %v3752_v1, %v3744_v39 }
0x10c0   :  { %v3791_v17 = vpop.permute.xlu0 %3790 }
0x10c1   :  { %v3756_v41 = vsub.f32 0.0, %v3754_v36  ;;  %v3757_v5 = vsub.f32 0.0, %v3755_v2 }
0x10c2   :  { %v3802_v33 = vpop.permute.xlu1 %3801 }
0x10c3   :  { %v3758_v35 = vmul.f32 1.442695, %v3756_v41  ;;  %v3760_v62 = vmul.f32 1.442695, %v3757_v5 }
0x10c5   :  { %5360 = vpow2.f32 %v3758_v35  ;;  %v4407_v35 = vld [vmem:[#allocation2 + $0x68] ss:$0 sm:$0xff] }
0x10c6   :  { %5362 = vpow2.f32 %v3760_v62 }
0x10d2   :  { %v5361_v24 = vpop.eup %5360 }
0x10d3   :  { %v5363_v52 = vpop.eup %5362  ;;  %v3762_v26 = vadd.f32 1.0, %v5361_v24 }
0x10d4   :  { %v3763_v22 = vadd.f32 1.0, %v5363_v52 }
0x10d5   :  { %5364 = vrcp.f32 %v3762_v26 }
0x10d6   :  { %5366 = vrcp.f32 %v3763_v22 }
0x10e2   :  { %v5365_v46 = vpop.eup %5364 }
0x10e3   :  { %v5367_v27 = vpop.eup %5366  ;;  %v3768_v28 = vmul.f32 %v5365_v46, %v3754_v36 }
0x10e4   :  { %v3769_v42 = vmul.f32 %v5367_v27, %v3755_v2 }
0x10e5   :  { %v3770_v61 = vsel %vm2826_vm6, %v3768_v28, -inf }
0x10e6   :  { %v3771_v4 = vrot.slane %v3770_v61, 4  ;;  %v3777_v44 = vsel %vm2826_vm6, %v3769_v42, -inf }
0x10e7   :  { %v3778_v45 = vrot.slane %v3777_v44, 4 }
0x10e8   :  { %v3772_v48 = vmax.f32 %v3770_v61, %v3771_v4 }
0x10e9   :  { %v3779_v30 = vmax.f32 %v3777_v44, %v3778_v45 }
0x10ea   :  { %v3773_v29 = vrot.slane %v3772_v48, 2 }
0x10eb   :  { %v3780_v31 = vrot.slane %v3779_v30, 2 }
0x10ec   :  { %v3774_v32 = vmax.f32 %v3772_v48, %v3773_v29 }
0x10ed   :  { %v3781_v12 = vmax.f32 %v3779_v30, %v3780_v31 }
0x10ee   :  { %v3775_v50 = vrot.slane %v3774_v32, 1 }
0x10ef   :  { %v3782_v3 = vrot.slane %v3781_v12, 1 }
0x10f0   :  { %v3776_v6 = vmax.f32 %v3774_v32, %v3775_v50 }
0x10f1   :  { %v3783_v19 = vmax.f32 %v3781_v12, %v3782_v3 }
0x10f2   :  { %v3793_v13 = vmul.f32 %v3791_v17, %v3776_v6 }
0x10f3   :  { %v3794_v51 = vmul.f32 %v3791_v17, %v3783_v19 }
0x10f4   :  { %v3804_v37 = vadd.f32 %v3802_v33, %v3793_v13 }
0x10f5   :  { %v3805_v55 = vadd.f32 %v3802_v33, %v3794_v51 }
0x10f6   :  { %v3806_v56 = vsub.f32 0.0, %v3804_v37 }
0x10f7   :  { %v3807_v60 = vsub.f32 0.0, %v3805_v55 }
0x10f8   :  { %v3808_v20 = vmul.f32 1.442695, %v3806_v56 }
0x10f9   :  { %v3810_v58 = vmul.f32 1.442695, %v3807_v60 }
0x10fa   :  { %5368 = vpow2.f32 %v3808_v20 }
0x10fb   :  { %5370 = vpow2.f32 %v3810_v58 }
0x1107   :  { %v5369_v21 = vpop.eup %5368 }
0x1108   :  { %v5371_v63 = vpop.eup %5370  ;;  %v3812_v59 = vadd.f32 1.0, %v5369_v21 }
0x1109   :  { %v3813_v39 = vadd.f32 1.0, %v5371_v63 }
0x110a   :  { %5372 = vrcp.f32 %v3812_v59 }
0x110b   :  { %5374 = vrcp.f32 %v3813_v39 }
0x1117   :  { %v5373_v1 = vpop.eup %5372 }
0x1118   :  { %v5375_v14 = vpop.eup %5374  ;;  %v3818_v2 = vmul.f32 %v5373_v1, %v3804_v37 }
0x1119   :  { %v3819_v36 = vmul.f32 %v5375_v14, %v3805_v55 }
0x111b   :  { %v3829_v41 = vrot.slane %v3819_v36, 7 }
0x111d   :  { %v3831_v5 = vsel %vm3830_vm7, %v3829_v41, %v3818_v2 }
0x111e   :  { %3832 = vrot.lane.b32.xlu0 %v3831_v5, %s5479_s23 }
0x1122   :  { %2490 = vrot.lane.b32.xlu0 %v6107_v54, %s5483_s19  ;;  %v2489_v54 = vpop.permute.xlu1 %2488 }
0x1123   :  { %v2511_v4 = vadd.f32 %v6032_v0, %v2489_v54 }
0x1126   :  { %2492 = vrot.lane.b32.xlu0 %v6105_v53, %s5483_s19  ;;  %v4441_v53 = vld [vmem:[#allocation2 + $0xe8] ss:$0 sm:$0xff] }
0x112a   :  { %2494 = vrot.lane.b32.xlu0 %v6112_v38, %s5483_s19 }
0x112e   :  { %2496 = vrot.lane.b32.xlu0 %v6109_v15, %s5483_s19  ;;  %v2487_v15 = vpop.permute.xlu1 %2486 }
0x112f   :  { %v2510_v44 = vadd.f32 %v2487_v15, %v6034_v34 }
0x1132   :  { %2693 = vrot.lane.b32.xlu0 %v6161_v11, %s5483_s19  ;;  %v2690_v38 = vpop.permute.xlu1 %2689 }
0x1133   :  { %v2712_v12 = vadd.f32 %v2690_v38, %v2511_v4 }
0x1136   :  { %2498 = vrot.lane.b32.xlu0 %v6119_v18, %s5483_s19  ;;  %v2692_v62 = vpop.permute.xlu1 %2691 }
0x113a   :  { %2500 = vrot.lane.b32.xlu0 %v6115_v9, %s5483_s19  ;;  %v2688_v9 = vpop.permute.xlu1 %2687 }
0x113e   :  { %2742 = vrot.lane.b32.xlu0 %v4407_v35, %s5483_s19  ;;  %v2726_v8 = vpop.permute.xlu1 %2725 }
0x1142   :  { %2701 = vrot.lane.b32.xlu0 %v6169_v40, %s5483_s19  ;;  %v2696_v24 = vpop.permute.xlu1 %2695 }
0x1146   :  { %3921 = vrot.lane.b32.xlu0 %v4441_v53, %s5483_s19  ;;  %v2698_v26 = vpop.permute.xlu1 %2697 }
0x114a   :  { %v2700_v45 = vpop.permute.xlu1 %2699 }
0x114e   :  { %v2760_v0 = vpop.permute.xlu1 %2759 }
0x1190   :  { %v3833_v11 = vpop.permute.xlu0 %3832 }
0x1191   :  { %5217 = vmatmul.mubr.msk.f32.vlgmr.msra.gmra.mxu1 %vm2218_vm3, %v3833_v11 }
0x1192   :  { %5228 = vmatprep.mubr.msk.f32.mxu1 %vm5484_vm5, %v6200_v43 }
0x1194   :  { %v2491_v18 = vpop.permute.xlu0 %2490 }
0x1195   :  { %v2512_v22 = vadd.f32 %v2491_v18, %v6038_v16 }
0x1197   :  { %v2713_v48 = vadd.f32 %v2692_v62, %v2512_v22 }
0x1198   :  { %v2493_v23 = vpop.permute.xlu0 %2492 }
0x1199   :  { %v2513_v42 = vadd.f32 %v6036_v7, %v2493_v23  ;;  %v2730_v3 = vadd.f32 %v2726_v8, %v2713_v48 }
0x119c   :  { %v2495_v49 = vpop.permute.xlu0 %2494 }
0x119d   :  { %v2514_v46 = vadd.f32 %v2495_v49, %v6042_v10  ;;  %v2711_v10 = vadd.f32 %v2688_v9, %v2510_v44 }
0x119f   :  { %v2715_v29 = vadd.f32 %v2696_v24, %v2514_v46  ;;  %v2728_v50 = vadd.f32 %v2726_v8, %v2711_v10 }
0x11a0   :  { %v2497_v40 = vpop.permute.xlu0 %2496 }
0x11a1   :  { %v2515_v27 = vadd.f32 %v6040_v47, %v2497_v40  ;;  %v2729_v47 = vadd.f32 %v2726_v8, %v2712_v12  ;;  %v2732_v7 = vadd.f32 %v2726_v8, %v2715_v29 }
0x11a3   :  { %v2716_v31 = vadd.f32 %v2698_v26, %v2515_v27 }
0x11a4   :  { %v2694_v52 = vpop.permute.xlu0 %2693 }
0x11a5   :  { %v2714_v30 = vadd.f32 %v2694_v52, %v2513_v42  ;;  %v2733_v6 = vadd.f32 %v2726_v8, %v2716_v31 }
0x11a7   :  { %v2731_v17 = vadd.f32 %v2726_v8, %v2714_v30 }
0x11a8   :  { %v2499_v28 = vpop.permute.xlu0 %2498 }
0x11a9   :  { %v2516_v61 = vadd.f32 %v2499_v28, %v6049_v25 }
0x11ab   :  { %v2717_v32 = vadd.f32 %v2700_v45, %v2516_v61 }
0x11ac   :  { %v2501_v16 = vpop.permute.xlu0 %2500 }
0x11ad   :  { %v2734_v25 = vadd.f32 %v2726_v8, %v2717_v32  ;;  %v2517_v63 = vadd.f32 %v6044_v57, %v2501_v16 }
0x11b0   :  { %v2743_v19 = vpop.permute.xlu0 %2742 }
0x11b1   :  { %v2745_v13 = vmul.f32 %v2743_v19, %v2728_v50  ;;  %v2746_v34 = vmul.f32 %v2743_v19, %v2729_v47  ;;  %v2747_v33 = vmul.f32 %v2743_v19, %v2730_v3  ;;  %v2748_v51 = vmul.f32 %v2743_v19, %v2731_v17 }
0x11b2   :  { %v2749_v37 = vmul.f32 %v2743_v19, %v2732_v7  ;;  %v2750_v55 = vmul.f32 %v2743_v19, %v2733_v6  ;;  %v2751_v56 = vmul.f32 %v2743_v19, %v2734_v25 }
0x11b3   :  { %v6271_v60 = vadd.f32 %v2760_v0, %v2745_v13  ;;  %v6273_v20 = vadd.f32 %v2760_v0, %v2746_v34  ;;  %v6275_v58 = vadd.f32 %v2760_v0, %v2747_v33  ;;  %v6277_v21 = vadd.f32 %v2760_v0, %v2748_v51 }
0x11b4   :  { %v6280_v59 = vadd.f32 %v2760_v0, %v2749_v37  ;;  %v6282_v39 = vadd.f32 %v2760_v0, %v2750_v55  ;;  %v6284_v1 = vadd.f32 %v2760_v0, %v2751_v56  ;;  %v2702_v14 = vpop.permute.xlu0 %2701 }
0x11b5   :  { %v2770_v36 = vsub.f32 0.0, %v6271_v60  ;;  %v2771_v2 = vsub.f32 0.0, %v6273_v20  ;;  %v2772_v41 = vsub.f32 0.0, %v6275_v58  ;;  %v2773_v5 = vsub.f32 0.0, %v6277_v21 }
0x11b6   :  { %v2774_v35 = vsub.f32 0.0, %v6280_v59  ;;  %v2775_v53 = vsub.f32 0.0, %v6282_v39  ;;  %v2776_v57 = vsub.f32 0.0, %v6284_v1  ;;  %v2718_v54 = vadd.f32 %v2702_v14, %v2517_v63 }
0x11b7   :  { %v2778_v15 = vmul.f32 1.442695, %v2770_v36  ;;  %v2780_v38 = vmul.f32 1.442695, %v2771_v2  ;;  %v2782_v62 = vmul.f32 1.442695, %v2772_v41 }
0x11b8   :  { %v2784_v11 = vmul.f32 1.442695, %v2773_v5  ;;  %v2735_v9 = vadd.f32 %v2726_v8, %v2718_v54  ;;  %v2786_v18 = vmul.f32 1.442695, %v2774_v35  ;;  %v2788_v23 = vmul.f32 1.442695, %v2775_v53 }
0x11b9   :  { %5376 = vpow2.f32 %v2778_v15  ;;  %v2790_v24 = vmul.f32 1.442695, %v2776_v57 }
0x11ba   :  { %5378 = vpow2.f32 %v2780_v38  ;;  %v2752_v49 = vmul.f32 %v2743_v19, %v2735_v9 }
0x11bb   :  { %5380 = vpow2.f32 %v2782_v62 }
0x11bc   :  { %5382 = vpow2.f32 %v2784_v11  ;;  %v6293_v40 = vadd.f32 %v2760_v0, %v2752_v49 }
0x11bd   :  { %5384 = vpow2.f32 %v2786_v18 }
0x11be   :  { %5386 = vpow2.f32 %v2788_v23  ;;  %v2777_v52 = vsub.f32 0.0, %v6293_v40 }
0x11bf   :  { %5388 = vpow2.f32 %v2790_v24 }
0x11c0   :  { %v2792_v26 = vmul.f32 1.442695, %v2777_v52 }
0x11c2   :  { %5390 = vpow2.f32 %v2792_v26 }
0x11c6   :  { %v5377_v22 = vpop.eup %5376 }
0x11c7   :  { %v5379_v46 = vpop.eup %5378  ;;  %v2794_v8 = vadd.f32 1.0, %v5377_v22 }
0x11c8   :  { %v5381_v27 = vpop.eup %5380  ;;  %v2795_v28 = vadd.f32 1.0, %v5379_v46 }
0x11c9   :  { %v5383_v42 = vpop.eup %5382  ;;  %v2796_v61 = vadd.f32 1.0, %v5381_v27  ;;  %5392 = vrcp.f32 %v2794_v8  ;;  %v3922_v27 = vpop.permute.xlu0 %3921 }
0x11ca   :  { %v5385_v4 = vpop.eup %5384  ;;  %v2797_v44 = vadd.f32 1.0, %v5383_v42  ;;  %5394 = vrcp.f32 %v2795_v28 }
0x11cb   :  { %v5387_v45 = vpop.eup %5386  ;;  %v2798_v48 = vadd.f32 1.0, %v5385_v4  ;;  %5396 = vrcp.f32 %v2796_v61 }
0x11cc   :  { %v5389_v30 = vpop.eup %5388  ;;  %v2799_v29 = vadd.f32 1.0, %v5387_v45  ;;  %5398 = vrcp.f32 %v2797_v44 }
0x11cd   :  { %v2800_v31 = vadd.f32 1.0, %v5389_v30  ;;  %5400 = vrcp.f32 %v2798_v48  ;;  %v3939_v30 = vpop.permute.xlu1 %3938 }
0x11ce   :  { %5402 = vrcp.f32 %v2799_v29 }
0x11cf   :  { %v5391_v32 = vpop.eup %5390  ;;  %5404 = vrcp.f32 %v2800_v31 }
0x11d0   :  { %v2801_v16 = vadd.f32 1.0, %v5391_v32 }
0x11d2   :  { %5406 = vrcp.f32 %v2801_v16 }
0x11d6   :  { %v5393_v12 = vpop.eup %5392 }
0x11d7   :  { %v5395_v10 = vpop.eup %5394  ;;  %v2818_v50 = vmul.f32 %v5393_v12, %v6271_v60 }
0x11d8   :  { %v5397_v47 = vpop.eup %5396  ;;  %v2819_v3 = vmul.f32 %v5395_v10, %v6273_v20 }
0x11d9   :  { %v5399_v17 = vpop.eup %5398  ;;  %v2820_v7 = vmul.f32 %v5397_v47, %v6275_v58  ;;  %v2827_v6 = vsel %vm2826_vm6, %v2818_v50, -inf }
0x11da   :  { %v5401_v25 = vpop.eup %5400  ;;  %v2821_v19 = vmul.f32 %v5399_v17, %v6277_v21  ;;  %v2828_v0 = vrot.slane %v2827_v6, 4  ;;  %v2834_v13 = vsel %vm2826_vm6, %v2819_v3, -inf }
0x11db   :  { %v5403_v34 = vpop.eup %5402  ;;  %v2822_v33 = vmul.f32 %v5401_v25, %v6280_v59  ;;  %v2835_v51 = vrot.slane %v2834_v13, 4  ;;  %v2841_v37 = vsel %vm2826_vm6, %v2820_v7, -inf }
0x11dc   :  { %v5405_v55 = vpop.eup %5404  ;;  %v2823_v56 = vmul.f32 %v5403_v34, %v6282_v39  ;;  %v2829_v60 = vmax.f32 %v2827_v6, %v2828_v0  ;;  %v2842_v20 = vrot.slane %v2841_v37, 4  ;;  %v2848_v58 = vsel %vm2826_vm6, %v2821_v19, -inf }
0x11dd   :  { %v2824_v63 = vmul.f32 %v5405_v55, %v6284_v1  ;;  %v2836_v14 = vmax.f32 %v2834_v13, %v2835_v51  ;;  %v2849_v21 = vrot.slane %v2848_v58, 4  ;;  %v2855_v36 = vsel %vm2826_vm6, %v2822_v33, -inf }
0x11de   :  { %v2843_v2 = vmax.f32 %v2841_v37, %v2842_v20  ;;  %v2856_v41 = vrot.slane %v2855_v36, 4  ;;  %v2862_v59 = vsel %vm2826_vm6, %v2823_v56, -inf  ;;  %v2830_v5 = vrot.slane %v2829_v60, 2 }
0x11df   :  { %v5407_v35 = vpop.eup %5406  ;;  %v2850_v53 = vmax.f32 %v2848_v58, %v2849_v21  ;;  %v2863_v57 = vrot.slane %v2862_v59, 4  ;;  %v2837_v54 = vrot.slane %v2836_v14, 2  ;;  %v2869_v39 = vsel %vm2826_vm6, %v2824_v63, -inf }
0x11e0   :  { %v2857_v15 = vmax.f32 %v2855_v36, %v2856_v41  ;;  %v2825_v38 = vmul.f32 %v5407_v35, %v6293_v40  ;;  %v2831_v62 = vmax.f32 %v2829_v60, %v2830_v5  ;;  %v2844_v1 = vrot.slane %v2843_v2, 2 }
0x11e1   :  { %v2838_v11 = vmax.f32 %v2836_v14, %v2837_v54  ;;  %v2851_v9 = vrot.slane %v2850_v53, 2  ;;  %v2864_v18 = vmax.f32 %v2862_v59, %v2863_v57  ;;  %v2870_v23 = vrot.slane %v2869_v39, 4 }
0x11e2   :  { %v2876_v49 = vsel %vm2826_vm6, %v2825_v38, -inf  ;;  %v2832_v24 = vrot.slane %v2831_v62, 1  ;;  %v2845_v52 = vmax.f32 %v2843_v2, %v2844_v1  ;;  %v2858_v26 = vrot.slane %v2857_v15, 2 }
0x11e3   :  { %v2877_v22 = vrot.slane %v2876_v49, 4  ;;  %v2839_v46 = vrot.slane %v2838_v11, 1  ;;  %v2852_v8 = vmax.f32 %v2850_v53, %v2851_v9  ;;  %v2865_v28 = vrot.slane %v2864_v18, 2 }
0x11e4   :  { %v6312_v42 = vmax.f32 %v2831_v62, %v2832_v24  ;;  %v2846_v61 = vrot.slane %v2845_v52, 1  ;;  %v2859_v40 = vmax.f32 %v2857_v15, %v2858_v26  ;;  %v2871_v4 = vmax.f32 %v2869_v39, %v2870_v23 }
0x11e5   :  { %v2878_v44 = vmax.f32 %v2876_v49, %v2877_v22  ;;  %v6314_v45 = vmax.f32 %v2838_v11, %v2839_v46  ;;  %v2853_v48 = vrot.slane %v2852_v8, 1  ;;  %v2866_v29 = vmax.f32 %v2864_v18, %v2865_v28 }
0x11e6   :  { %v6316_v31 = vmax.f32 %v2845_v52, %v2846_v61  ;;  %v3924_v32 = vmul.f32 %v3922_v27, %v6312_v42  ;;  %v2860_v16 = vrot.slane %v2859_v40, 1  ;;  %v2872_v12 = vrot.slane %v2871_v4, 2 }
0x11e7   :  { %v2879_v10 = vrot.slane %v2878_v44, 2  ;;  %v6319_v50 = vmax.f32 %v2852_v8, %v2853_v48  ;;  %v3925_v47 = vmul.f32 %v3922_v27, %v6314_v45  ;;  %v2867_v3 = vrot.slane %v2866_v29, 1  ;;  %v4006_v8 = vld [vmem:[#allocation2 + $0x100] sm:$0xff] }
0x11e8   :  { %v3926_v17 = vmul.f32 %v3922_v27, %v6316_v31  ;;  %v6323_v7 = vadd.f32 %v3939_v30, %v3924_v32  ;;  %v6325_v6 = vmax.f32 %v2859_v40, %v2860_v16  ;;  %v2873_v25 = vmax.f32 %v2871_v4, %v2872_v12  ;;  %5220 = vmatpush3.msra.mxu0 %v4006_v8 }
0x11e9   :  { %v2880_v19 = vmax.f32 %v2878_v44, %v2879_v10  ;;  %v3927_v0 = vmul.f32 %v3922_v27, %v6319_v50  ;;  %v6328_v13 = vadd.f32 %v3939_v30, %v3925_v47  ;;  %v6330_v34 = vmax.f32 %v2866_v29, %v2867_v3  ;;  %5221 = vmatprep.subr.mxu0 %v6200_v43 }
0x11ea   :  { %v6332_v33 = vadd.f32 %v3939_v30, %v3926_v17  ;;  %v3949_v51 = vsub.f32 0.0, %v6323_v7  ;;  %v2874_v37 = vrot.slane %v2873_v25, 1  ;;  %v3928_v55 = vmul.f32 %v3922_v27, %v6325_v6 }
0x11eb   :  { %v2881_v56 = vrot.slane %v2880_v19, 1  ;;  %v3950_v60 = vsub.f32 0.0, %v6328_v13  ;;  %v3929_v20 = vmul.f32 %v3922_v27, %v6330_v34  ;;  %v6338_v58 = vadd.f32 %v3939_v30, %v3927_v0 }
0x11ec   :  { %v3951_v63 = vsub.f32 0.0, %v6332_v33  ;;  %v3957_v14 = vmul.f32 1.442695, %v3949_v51  ;;  %v6341_v21 = vmax.f32 %v2873_v25, %v2874_v37  ;;  %v6343_v36 = vadd.f32 %v3939_v30, %v3928_v55 }
0x11ed   :  { %v3959_v2 = vmul.f32 1.442695, %v3950_v60  ;;  %v6345_v41 = vmax.f32 %v2880_v19, %v2881_v56  ;;  %v6347_v59 = vadd.f32 %v3939_v30, %v3929_v20  ;;  %v3952_v5 = vsub.f32 0.0, %v6338_v58 }
0x11ee   :  { %5408 = vpow2.f32 %v3957_v14  ;;  %v3961_v35 = vmul.f32 1.442695, %v3951_v63  ;;  %v3930_v53 = vmul.f32 %v3922_v27, %v6341_v21  ;;  %v3953_v57 = vsub.f32 0.0, %v6343_v36 }
0x11ef   :  { %5410 = vpow2.f32 %v3959_v2  ;;  %v3931_v54 = vmul.f32 %v3922_v27, %v6345_v41  ;;  %v3954_v39 = vsub.f32 0.0, %v6347_v59  ;;  %v3963_v15 = vmul.f32 1.442695, %v3952_v5  ;;  %v4005_v27 = vld [vmem:[#allocation2 + $0xf8] sm:$0xff] }
0x11f0   :  { %5412 = vpow2.f32 %v3961_v35  ;;  %v6354_v38 = vadd.f32 %v3939_v30, %v3930_v53  ;;  %v3965_v62 = vmul.f32 1.442695, %v3953_v57  ;;  %5222 = vmatpush3.msra.mxu0 %v4005_v27  ;;  %v4288_v25 = vsel %vm3830_vm7, %v6314_v45, %v6312_v42 }
0x11f1   :  { %v6356_v1 = vadd.f32 %v3939_v30, %v3931_v54  ;;  %5414 = vpow2.f32 %v3963_v15  ;;  %v3967_v11 = vmul.f32 1.442695, %v3954_v39  ;;  %5231 = vmatprep.subr.mxu0 %v6200_v43 }
0x11f2   :  { %v3955_v9 = vsub.f32 0.0, %v6354_v38  ;;  %5416 = vpow2.f32 %v3965_v62 }
0x11f3   :  { %v3956_v18 = vsub.f32 0.0, %v6356_v1  ;;  %5418 = vpow2.f32 %v3967_v11 }
0x11f4   :  { %v3969_v23 = vmul.f32 1.442695, %v3955_v9 }
0x11f5   :  { %v3971_v49 = vmul.f32 1.442695, %v3956_v18 }
0x11f6   :  { %5420 = vpow2.f32 %v3969_v23 }
0x11f7   :  { %5422 = vpow2.f32 %v3971_v49 }
0x11fb   :  { %v5409_v24 = vpop.eup %5408 }
0x11fc   :  { %v5411_v52 = vpop.eup %5410  ;;  %v3973_v26 = vadd.f32 1.0, %v5409_v24 }
0x11fd   :  { %v5413_v22 = vpop.eup %5412  ;;  %v3974_v46 = vadd.f32 1.0, %v5411_v52 }
0x11fe   :  { %v5415_v28 = vpop.eup %5414  ;;  %v3975_v61 = vadd.f32 1.0, %v5413_v22  ;;  %5424 = vrcp.f32 %v3973_v26 }
0x11ff   :  { %v5417_v40 = vpop.eup %5416  ;;  %5426 = vrcp.f32 %v3974_v46  ;;  %v3976_v4 = vadd.f32 1.0, %v5415_v28 }
0x1200   :  { %v5419_v44 = vpop.eup %5418  ;;  %5428 = vrcp.f32 %v3975_v61  ;;  %v3977_v48 = vadd.f32 1.0, %v5417_v40  ;;  %v4193_v61 = vld [vmem:[#allocation2 + $0x498] sm:$0xff] }
0x1201   :  { %v3978_v30 = vadd.f32 1.0, %v5419_v44  ;;  %5430 = vrcp.f32 %v3976_v4 }
0x1202   :  { %5432 = vrcp.f32 %v3977_v48 }
0x1203   :  { %v5421_v29 = vpop.eup %5420  ;;  %5434 = vrcp.f32 %v3978_v30  ;;  %v4443_v30 = vld [vmem:[#allocation2 + $0x108] ss:$0 sm:$0xff] }
0x1204   :  { %v5423_v32 = vpop.eup %5422  ;;  %v3979_v16 = vadd.f32 1.0, %v5421_v29 }
0x1205   :  { %v3980_v12 = vadd.f32 1.0, %v5423_v32 }
0x1206   :  { %5436 = vrcp.f32 %v3979_v16 }
0x1207   :  { %5438 = vrcp.f32 %v3980_v12 }
0x120b   :  { %v5425_v10 = vpop.eup %5424 }
0x120c   :  { %v5427_v47 = vpop.eup %5426  ;;  %v3997_v37 = vmul.f32 %v5425_v10, %v6323_v7  ;;  %v4198_v10 = vld [vmem:[#allocation2 + $0x4a0] sm:$0x3] }
0x120d   :  { %v5429_v3 = vpop.eup %5428  ;;  %v3998_v17 = vmul.f32 %v5427_v47, %v6328_v13  ;;  %v4289_v13 = vsel %vm4023_vm8, %v6316_v31, %v4288_v25 }
0x120e   :  { %v5431_v19 = vpop.eup %5430  ;;  %v3999_v0 = vmul.f32 %v5429_v3, %v6332_v33  ;;  %v4290_v35 = vsel %vm4026_vm9, %v6319_v50, %v4289_v13 }
0x120f   :  { %v5433_v51 = vpop.eup %5432  ;;  %v4000_v55 = vmul.f32 %v5431_v19, %v6338_v58  ;;  %v4020_v56 = vrot.slane %v3998_v17, 7  ;;  %v4291_v39 = vsel %vm4029_vm10, %v6325_v6, %v4290_v35 }
0x1210   :  { %v5435_v60 = vpop.eup %5434  ;;  %v4001_v20 = vmul.f32 %v5433_v51, %v6343_v36  ;;  %v4022_v63 = vrot.slane %v3999_v0, 6  ;;  %v4292_v9 = vsel %vm4032_vm11, %v6330_v34, %v4291_v39 }
0x1211   :  { %v4002_v14 = vmul.f32 %v5435_v60, %v6347_v59  ;;  %v4021_v42 = vsel %vm3830_vm7, %v4020_v56, %v3997_v37  ;;  %v4025_v45 = vrot.slane %v4000_v55, 5  ;;  %v4293_v50 = vsel %vm4035_vm12, %v6341_v21, %v4292_v9 }
0x1212   :  { %v4024_v33 = vsel %vm4023_vm8, %v4022_v63, %v4021_v42  ;;  %v4028_v2 = vrot.slane %v4001_v20, 4 }
0x1213   :  { %v5437_v7 = vpop.eup %5436  ;;  %v4027_v5 = vsel %vm4026_vm9, %v4025_v45, %v4024_v33  ;;  %v4031_v58 = vrot.slane %v4002_v14, 3 }
0x1214   :  { %v5439_v36 = vpop.eup %5438  ;;  %v4003_v53 = vmul.f32 %v5437_v7, %v6354_v38  ;;  %v4030_v57 = vsel %vm4029_vm10, %v4028_v2, %v4027_v5  ;;  %v4294_v38 = vsel %vm4038_vm13, %v6345_v41, %v4293_v50  ;;  %v4114_v41 = vld [vmem:[#allocation2 + $0x490] sm:$0xff] }
0x1215   :  { %v4004_v31 = vmul.f32 %v5439_v36, %v6356_v1  ;;  %v4033_v59 = vsel %vm4032_vm11, %v4031_v58, %v4030_v57  ;;  %v4439_v1 = vld [vmem:[#allocation2 + $0xe0] ss:$0 sm:$0xff] }
0x1216   :  { %v4034_v54 = vrot.slane %v4003_v53, 2 }
0x1217   :  { %v4037_v15 = vrot.slane %v4004_v31, 1 }
0x1218   :  { %v4036_v62 = vsel %vm4035_vm12, %v4034_v54, %v4033_v59 }
0x1219   :  { %v4039_v11 = vsel %vm4038_vm13, %v4037_v15, %v4036_v62 }
0x121a   :  { %4040 = vrot.lane.b32.xlu0 %v4039_v11, %s5479_s23 }
0x121e   :  { %4295 = vrot.lane.b32.xlu0 %v4294_v38, %s5479_s23 }
0x1251   :  { %v3902_v18 = vpop.f32.mrf.mxu1 }
0x1252   :  { %v3903_v23 = vadd.f32 %v4439_v1, %v3902_v18 }
0x1253   :  { %v5218_v49 = vpop.f32.mrf.mxu1 }
0x1254   :  { %v3907_v6 = vand.u32 2147483647, %v3903_v23  ;;  %v3906_v46 = vmax.f32 %v3903_v23, 0.0 }
0x1256   :  { %v3908_v24 = vsub.f32 0.0, %v3907_v6 }
0x1258   :  { %v3909_v52 = vmul.f32 1.442695, %v3908_v24 }
0x125a   :  { %5440 = vpow2.f32 %v3909_v52 }
0x1267   :  { %v5441_v26 = vpop.eup %5440 }
0x1268   :  { %v3911_v22 = vadd.f32 1.0, %v5441_v26 }
0x126a   :  { %5442 = vlog2.f32 %v3911_v22 }
0x1277   :  { %v5443_v34 = vpop.eup %5442 }
0x1278   :  { %v3913_v8 = vmul.f32 0.6931472, %v5443_v34 }
0x127a   :  { %v3914_v21 = vadd.f32 %v3913_v8, %v3906_v46 }
0x127c   :  { %5227 = vmatpush3.msk.msra.mxu1 %vm4119_vm14, %v3914_v21  ;;  %4304 = vst.msk [vmem:[%s6404_s2 + $0x28] sm:$0x3] %vm4303_vm15, %v3914_v21 }
0x127d   :  { %5229 = vmatmul.mubr.msk.f32.vlgmr.msra.gmra.mxu1 %vm4115_vm0, %v4114_v41 }
0x128c   :  { %v4041_v27 = vpop.permute.xlu0 %4040 }
0x128d   :  { %5224 = vmatmul.mubr.msk.f32.vlgmr.msra.gmra.mxu0 %vm2218_vm3, %v4041_v27 }
0x128e   :  { %5233 = vmatprep.mubr.msk.f32.mxu0 %vm5484_vm5, %v6200_v43 }
0x1290   :  { %v4296_v28 = vpop.permute.xlu0 %4295 }
0x1291   :  { %4298 = vst.msk [vmem:[%s6404_s2] sm:$0xff] %vm2218_vm3, %v4296_v28  ;;  %vm4305_vm3 = vcmask 33792  }
0x133d   :  { %v4189_v40 = vpop.f32.mrf.mxu1 }
0x133e   :  { %v4194_v4 = vmul.f32 %v4193_v61, %v4189_v40 }
0x133f   :  { %v5230_v44 = vpop.f32.mrf.mxu1 }
0x1340   :  { %v4195_v48 = vsel %vm910_vm2, %v4194_v4, 0.0 }
0x1341   :  { %4196 = vadd.xlane.f32.xlu1 %v4195_v48 }
0x134d   :  { %v4110_v29 = vpop.f32.mrf.mxu0 }
0x134e   :  { %v4111_v32 = vadd.f32 %v4443_v30, %v4110_v29 }
0x134f   :  { %v5225_v16 = vpop.f32.mrf.mxu0 }
0x1350   :  { %4308 = vst.msk [vmem:[%s6404_s2 + $0x2c] sm:$0xff] %vm4307_vm4, %v4111_v32 }
0x13ca   :  { %v4197_v43 = vpop.xlane.xlu1 %4196 }
0x13cb   :  { %v4199_v12 = vmul.f32 %v4197_v43, %v4111_v32 }
0x13cd   :  { %5232 = vmatpush3.msra.mxu0 %v4199_v12 }
0x13ce   :  { %5234 = vmatmul.mubr.msk.f32.vlgmr.msra.gmra.mxu0 %vm402_vm1, %v4198_v10 }
0x148e   :  { %v4269_v47 = vpop.f32.mrf.mxu0 }
0x148f   :  { %4306 = vst.msk [vmem:[%s6404_s2 + $0x2a] sm:$0x3] %vm4305_vm3, %v4269_v47 }
0x1490   :  { %v5235_v3 = vpop.f32.mrf.mxu0 }
0x1491   :  { %4313 = vsyncpa [#allocation3], 1 }

</bundles_post_ra>
